<compile_context>
chip_gen: v5e
topology: v5e:2x2
jax: 0.10.0
libtpu: 0.0.40
codegen_flags: <defaults>
</compile_context>

<pallas_src>
import functools

import jax
import jax.numpy as jnp
from jax import lax
from jax.experimental import pallas as pl
from jax.experimental.pallas import tpu as pltpu

EPS = 1e-5          # PyTorch InstanceNorm3d default eps (affine=False)
NEG_SLOPE = 0.01    # PyTorch LeakyReLU default negative_slope


# ---------------------------------------------------------------------------
# In-kernel helpers. All operate on (Cp, S) f32 values: S = D*H*W on lanes,
# branch channels (zero-padded to a sublane multiple Cp) on sublanes.
# ---------------------------------------------------------------------------
def _instance_norm(y):
    """InstanceNorm3d (affine=False) with fused sum / sum-of-squares reduce."""
    inv_s = 1.0 / y.shape[-1]
    s1 = jnp.sum(y, axis=-1, keepdims=True)
    s2 = jnp.sum(y * y, axis=-1, keepdims=True)
    mean = s1 * inv_s
    var = jnp.maximum(s2 * inv_s - mean * mean, 0.0)
    return (y - mean) * lax.rsqrt(var + EPS)


def _leaky_relu(y):
    return jnp.where(y >= 0, y, NEG_SLOPE * y)


def _flat_mod(a, m):
    if m & (m - 1) == 0:                           # power of two: VPU bitwise AND
        return a & (m - 1)
    return a % m  # TODO(synk): non-pow2 spatial dims exercise vector remainder


def _boundary_masks(d, h, w):
    """Lane-validity masks for the flat-spatial depthwise taps.

    Each of d_ok / h_ok / w_ok is a 3-tuple indexed by the kernel offset
    (-1, 0, +1); `None` means 'always valid' so no select is emitted."""
    s, hw = d * h * w, h * w
    lane = lax.broadcasted_iota(jnp.int32, (1, s), 1)
    rem_w = _flat_mod(lane, w)
    rem_hw = _flat_mod(lane, hw)
    d_ok = (lane >= hw, None, lane < s - hw)
    h_ok = (rem_hw >= w, None, rem_hw < hw - w)
    w_ok = (rem_w >= 1, None, rem_w < w - 1)
    return d_ok, h_ok, w_ok


def _and_mask(a, b):
    if a is None:
        return b
    if b is None:
        return a
    return a & b


def _depthwise_conv3x3x3(y, w_taps, masks, d, h, w):
    """Depthwise 3x3x3, stride=1, zero-pad=1, on lane-dense (Cp, S) layout.

    27 taps = lane rolls of the flat spatial axis; shared d/h boundary masks
    applied once per (kd, kh) group; kd-plane partial sums kept independent so
    the VALU add chain stays short (rolls land on the XLU slots)."""
    s, hw = d * h * w, h * w
    d_ok, h_ok, w_ok = masks

    planes = []
    for kd in range(3):
        rows = []
        for kh in range(3):
            inner = None
            for kw in range(3):
                tap = kd * 9 + kh * 3 + kw
                off = (kd - 1) * hw + (kh - 1) * w + (kw - 1)
                shifted = y if off == 0 else pltpu.roll(y, (-off) % s, axis=1)
                if w_ok[kw] is not None:
                    shifted = jnp.where(w_ok[kw], shifted, 0.0)
                term = w_taps[tap] * shifted           # per-channel tap (Cp, 1)
                inner = term if inner is None else inner + term
            dh = _and_mask(d_ok[kd], h_ok[kh])
            rows.append(inner if dh is None else jnp.where(dh, inner, 0.0))
        planes.append((rows[0] + rows[1]) + rows[2])
    return (planes[0] + planes[1]) + planes[2]


# ---------------------------------------------------------------------------
# Fused kernel: full branch2 + concat + channel_shuffle, `nb` samples per step
# ---------------------------------------------------------------------------
def _fused_shuffle_block_kernel(x_ref, w1_ref, wdw_ref, w2_ref, o_ref,
                                *, cb, d, h, w):
    # x_ref : (nb, C, S) VMEM     w1 : (Cp, C) VMEM      wdw : (Cp, 27) VMEM
    # o_ref : (nb, cb, 2, S)      w2 : (Cp, Cp) VMEM
    nb = x_ref.shape[0]
    w1 = w1_ref[...]
    w2 = w2_ref[...]
    wdw = wdw_ref[...]
    w_taps = [wdw[:, t:t + 1] for t in range(27)]     # hoisted (Cp, 1) tap cols
    masks = _boundary_masks(d, h, w)                  # hoisted boundary masks

    for b in range(nb):                               # static unroll, nb small
        x = x_ref[b].astype(jnp.float32)              # (C, S), channels on sublanes

        # Conv1x1 (channel split folded into w1) -> IN -> LeakyReLU       [MXU]
        y = jnp.dot(w1, x, preferred_element_type=jnp.float32,
                    precision=lax.Precision.HIGHEST)
        y = _leaky_relu(_instance_norm(y))
        # depthwise Conv3x3x3 -> IN                                   [XLU/VPU]
        y = _instance_norm(_depthwise_conv3x3x3(y, w_taps, masks, d, h, w))
        # Conv1x1 -> IN -> LeakyReLU                                       [MXU]
        y = jnp.dot(w2, y, preferred_element_type=jnp.float32,
                    precision=lax.Precision.HIGHEST)
        y = _leaky_relu(_instance_norm(y))

        # Fused concat + channel_shuffle(groups=2): out[2k] = x1[k],
        # out[2k+1] = branch2[k], stored as (cb, 2, S); the wrapper reshape
        # (cb, 2) -> C is a free row-major view.
        o_ref[b, :, 0, :] = x[:cb, :].astype(o_ref.dtype)
        o_ref[b, :, 1, :] = y[:cb, :].astype(o_ref.dtype)


def shuffle_inverted_residual_stride1(x, params, *, samples_per_step=None):
    """Forward of ShuffleInvertedResidual with stride=1 (input_c == output_c)."""
    n, c, d, h, w = x.shape
    assert c % 2 == 0
    cb = c // 2
    s = d * h * w
    cp = -(-cb // 8) * 8        # branch width padded up to a sublane multiple

    if samples_per_step is None:
        # Amortize the ~0.35us per-grid-step overhead, but keep an even number
        # (>= 2) of grid steps so both v7x TensorCores stay loaded.
        samples_per_step = 2 if n % 4 == 0 else 1
    nb = samples_per_step
    assert n % nb == 0

    # No activation cast here: the kernel casts to f32 on load (halves DMA
    # bytes when the model runs in bf16).
    x_flat = x.reshape(n, c, s)

    f32 = jnp.float32
    w_pw1 = params["w_pw1"].astype(f32)               # (cb, cb), (out, in)
    w_pw2 = params["w_pw2"].astype(f32)
    w_dw = params["w_dw"].astype(f32)                 # (cb, 27)
    # Fold the x2 = x[cb:] channel split into the first pointwise weight and
    # zero-pad the output rows to `cp`; padded rows stay exactly zero through
    # the whole branch2 chain and are dropped at the final store.
    w1_eff = jnp.zeros((cp, c), f32).at[:cb, cb:].set(w_pw1)
    w2_eff = jnp.zeros((cp, cp), f32).at[:cb, :cb].set(w_pw2)
    wdw_eff = jnp.zeros((cp, 27), f32).at[:cb, :].set(w_dw)

    kernel = functools.partial(_fused_shuffle_block_kernel, cb=cb, d=d, h=h, w=w)
    out = pl.pallas_call(
        kernel,
        out_shape=jax.ShapeDtypeStruct((n, cb, 2, s), x.dtype),
        grid=(n // nb,),
        in_specs=[
            pl.BlockSpec((nb, c, s), lambda i: (i, 0, 0)),       # activations
            pl.BlockSpec((cp, c), lambda i: (0, 0)),             # w_pw1 (folded split)
            pl.BlockSpec((cp, 27), lambda i: (0, 0)),            # depthwise taps
            pl.BlockSpec((cp, cp), lambda i: (0, 0)),            # w_pw2
        ],
        out_specs=pl.BlockSpec((nb, cb, 2, s), lambda i: (i, 0, 0, 0)),
        compiler_params=pltpu.CompilerParams(
            dimension_semantics=("parallel",)),   # batch shards across v7x's 2 TCs
    )(x_flat, w1_eff, wdw_eff, w2_eff)
    # (n, cb, 2, s) -> (n, c, d, h, w) is a free row-major view that realizes
    # the channel interleave out[:, 2k] = x1[k], out[:, 2k+1] = branch2[k].
    return out.reshape(n, c, d, h, w)


# ---------------------------------------------------------------------------
# Pure-JAX reference (for correctness check)
# ---------------------------------------------------------------------------
def channel_shuffle(x, groups):
    n, c, d, h, w = x.shape
    x = x.reshape(n, groups, c // groups, d, h, w)
    x = jnp.swapaxes(x, 1, 2)
    return x.reshape(n, c, d, h, w)


def _instance_norm_ref(x):
    mean = jnp.mean(x, axis=(2, 3, 4), keepdims=True)
    var = jnp.mean(jnp.square(x - mean), axis=(2, 3, 4), keepdims=True)
    return (x - mean) * lax.rsqrt(var + EPS)


def _leaky_ref(x):
    return jnp.where(x >= 0, x, NEG_SLOPE * x)


def reference_forward(x, params):
    n, c, d, h, w = x.shape
    cb = c // 2
    hp = lax.Precision.HIGHEST
    x1, x2 = x[:, :cb], x[:, cb:]
    y = jnp.einsum('oc,ncdhw->nodhw', params["w_pw1"], x2, precision=hp)
    y = _leaky_ref(_instance_norm_ref(y))
    wd = params["w_dw"].reshape(cb, 1, 3, 3, 3)   # OIDHW, groups=cb
    y = lax.conv_general_dilated(
        y, wd, window_strides=(1, 1, 1),
        padding=((1, 1), (1, 1), (1, 1)),
        dimension_numbers=('NCDHW', 'OIDHW', 'NCDHW'),
        feature_group_count=cb, precision=hp)
    y = _instance_norm_ref(y)
    y = jnp.einsum('oc,ncdhw->nodhw', params["w_pw2"], y, precision=hp)
    y = _leaky_ref(_instance_norm_ref(y))
    out = jnp.concatenate([x1, y], axis=1)
    return channel_shuffle(out, 2)


# ---------------------------------------------------------------------------
if __name__ == "__main__":
    # Module config: input_c = output_c = 8, stride = 1 -> branch_features = 4
    N, C, D, H, W = 4, 8, 8, 8, 8          # S = 512 lanes; 2 samples per grid step
    Cb = C // 2

    key = jax.random.PRNGKey(0)
    k_x, k_w1, k_wd, k_w2 = jax.random.split(key, 4)

    x = jax.random.normal(k_x, (N, C, D, H, W), dtype=jnp.float32)
    params = {
        # Conv3d(Cb, Cb, 1x1x1, bias=False) weights, stored as (Cout, Cin)
        "w_pw1": 0.2 * jax.random.normal(k_w1, (Cb, Cb), dtype=jnp.float32),
        # depthwise Conv3d(Cb, Cb, 3x3x3, groups=Cb, bias=False): (Cb, kd*kh*kw)
        "w_dw": 0.2 * jax.random.normal(k_wd, (Cb, 27), dtype=jnp.float32),
        "w_pw2": 0.2 * jax.random.normal(k_w2, (Cb, Cb), dtype=jnp.float32),
    }

    fwd = jax.jit(shuffle_inverted_residual_stride1)
    out = jax.block_until_ready(fwd(x, params))

    ref = jax.block_until_ready(reference_forward(x, params))
    assert out.shape == (N, C, D, H, W)
    max_err = float(jnp.max(jnp.abs(out - ref)))
    assert jnp.allclose(out, ref, rtol=1e-3, atol=1e-3), max_err

    print("KERNEL_OK")
</pallas_src>

<mosaic_0001>
module attributes {stable_mosaic.version = 11 : i64} {
  func.func @_fused_shuffle_block_kernel(%arg0: i32, %arg1: memref<2x8x512xf32, #tpu.memory_space<vmem>>, %arg2: memref<8x8xf32, #tpu.memory_space<vmem>>, %arg3: memref<8x27xf32, #tpu.memory_space<vmem>>, %arg4: memref<8x8xf32, #tpu.memory_space<vmem>>, %arg5: memref<2x4x2x512xf32, #tpu.memory_space<vmem>>) attributes {dimension_semantics = [#tpu.dimension_semantics<parallel>], iteration_bounds = array<i64: 2>, scalar_prefetch = 0 : i64, scratch_operands = 0 : i64, tpu.core_type = #tpu.core_type<tc>, window_params = [{transform_indices = @transform_0, window_bounds = array<i64: 2, 8, 512>}, {pipeline_mode = #tpu.pipeline_mode<synchronous>, transform_indices = @transform_1, window_bounds = array<i64: 8, 8>}, {pipeline_mode = #tpu.pipeline_mode<synchronous>, transform_indices = @transform_2, window_bounds = array<i64: 8, 27>}, {pipeline_mode = #tpu.pipeline_mode<synchronous>, transform_indices = @transform_3, window_bounds = array<i64: 8, 8>}, {transform_indices = @transform_4, window_bounds = array<i64: 2, 4, 2, 512>}]} {
    %c0 = arith.constant 0 : index
    %c0_0 = arith.constant 0 : index
    %0 = vector.load %arg2[%c0, %c0_0] : memref<8x8xf32, #tpu.memory_space<vmem>>, vector<8x8xf32>
    %c0_1 = arith.constant 0 : index
    %c0_2 = arith.constant 0 : index
    %1 = vector.load %arg4[%c0_1, %c0_2] : memref<8x8xf32, #tpu.memory_space<vmem>>, vector<8x8xf32>
    %c0_3 = arith.constant 0 : index
    %c0_4 = arith.constant 0 : index
    %2 = vector.load %arg3[%c0_3, %c0_4] : memref<8x27xf32, #tpu.memory_space<vmem>>, vector<8x27xf32>
    %3 = vector.extract_strided_slice %2 {offsets = [0, 0], sizes = [8, 1], strides = [1, 1]} : vector<8x27xf32> to vector<8x1xf32>
    %4 = vector.extract_strided_slice %2 {offsets = [0, 1], sizes = [8, 1], strides = [1, 1]} : vector<8x27xf32> to vector<8x1xf32>
    %5 = vector.extract_strided_slice %2 {offsets = [0, 2], sizes = [8, 1], strides = [1, 1]} : vector<8x27xf32> to vector<8x1xf32>
    %6 = vector.extract_strided_slice %2 {offsets = [0, 3], sizes = [8, 1], strides = [1, 1]} : vector<8x27xf32> to vector<8x1xf32>
    %7 = vector.extract_strided_slice %2 {offsets = [0, 4], sizes = [8, 1], strides = [1, 1]} : vector<8x27xf32> to vector<8x1xf32>
    %8 = vector.extract_strided_slice %2 {offsets = [0, 5], sizes = [8, 1], strides = [1, 1]} : vector<8x27xf32> to vector<8x1xf32>
    %9 = vector.extract_strided_slice %2 {offsets = [0, 6], sizes = [8, 1], strides = [1, 1]} : vector<8x27xf32> to vector<8x1xf32>
    %10 = vector.extract_strided_slice %2 {offsets = [0, 7], sizes = [8, 1], strides = [1, 1]} : vector<8x27xf32> to vector<8x1xf32>
    %11 = vector.extract_strided_slice %2 {offsets = [0, 8], sizes = [8, 1], strides = [1, 1]} : vector<8x27xf32> to vector<8x1xf32>
    %12 = vector.extract_strided_slice %2 {offsets = [0, 9], sizes = [8, 1], strides = [1, 1]} : vector<8x27xf32> to vector<8x1xf32>
    %13 = vector.extract_strided_slice %2 {offsets = [0, 10], sizes = [8, 1], strides = [1, 1]} : vector<8x27xf32> to vector<8x1xf32>
    %14 = vector.extract_strided_slice %2 {offsets = [0, 11], sizes = [8, 1], strides = [1, 1]} : vector<8x27xf32> to vector<8x1xf32>
    %15 = vector.extract_strided_slice %2 {offsets = [0, 12], sizes = [8, 1], strides = [1, 1]} : vector<8x27xf32> to vector<8x1xf32>
    %16 = vector.extract_strided_slice %2 {offsets = [0, 13], sizes = [8, 1], strides = [1, 1]} : vector<8x27xf32> to vector<8x1xf32>
    %17 = vector.extract_strided_slice %2 {offsets = [0, 14], sizes = [8, 1], strides = [1, 1]} : vector<8x27xf32> to vector<8x1xf32>
    %18 = vector.extract_strided_slice %2 {offsets = [0, 15], sizes = [8, 1], strides = [1, 1]} : vector<8x27xf32> to vector<8x1xf32>
    %19 = vector.extract_strided_slice %2 {offsets = [0, 16], sizes = [8, 1], strides = [1, 1]} : vector<8x27xf32> to vector<8x1xf32>
    %20 = vector.extract_strided_slice %2 {offsets = [0, 17], sizes = [8, 1], strides = [1, 1]} : vector<8x27xf32> to vector<8x1xf32>
    %21 = vector.extract_strided_slice %2 {offsets = [0, 18], sizes = [8, 1], strides = [1, 1]} : vector<8x27xf32> to vector<8x1xf32>
    %22 = vector.extract_strided_slice %2 {offsets = [0, 19], sizes = [8, 1], strides = [1, 1]} : vector<8x27xf32> to vector<8x1xf32>
    %23 = vector.extract_strided_slice %2 {offsets = [0, 20], sizes = [8, 1], strides = [1, 1]} : vector<8x27xf32> to vector<8x1xf32>
    %24 = vector.extract_strided_slice %2 {offsets = [0, 21], sizes = [8, 1], strides = [1, 1]} : vector<8x27xf32> to vector<8x1xf32>
    %25 = vector.extract_strided_slice %2 {offsets = [0, 22], sizes = [8, 1], strides = [1, 1]} : vector<8x27xf32> to vector<8x1xf32>
    %26 = vector.extract_strided_slice %2 {offsets = [0, 23], sizes = [8, 1], strides = [1, 1]} : vector<8x27xf32> to vector<8x1xf32>
    %27 = vector.extract_strided_slice %2 {offsets = [0, 24], sizes = [8, 1], strides = [1, 1]} : vector<8x27xf32> to vector<8x1xf32>
    %28 = vector.extract_strided_slice %2 {offsets = [0, 25], sizes = [8, 1], strides = [1, 1]} : vector<8x27xf32> to vector<8x1xf32>
    %29 = vector.extract_strided_slice %2 {offsets = [0, 26], sizes = [8, 1], strides = [1, 1]} : vector<8x27xf32> to vector<8x1xf32>
    %30 = tpu.iota {dimensions = array<i32: 1>} : vector<1x512xi32>
    %c7_i32 = arith.constant 7 : i32
    %31 = vector.broadcast %c7_i32 : i32 to vector<1x512xi32>
    %32 = arith.andi %30, %31 : vector<1x512xi32>
    %c63_i32 = arith.constant 63 : i32
    %33 = vector.broadcast %c63_i32 : i32 to vector<1x512xi32>
    %34 = arith.andi %30, %33 : vector<1x512xi32>
    %c64_i32 = arith.constant 64 : i32
    %35 = vector.broadcast %c64_i32 : i32 to vector<1x512xi32>
    %36 = arith.cmpi sge, %30, %35 : vector<1x512xi32>
    %c448_i32 = arith.constant 448 : i32
    %37 = vector.broadcast %c448_i32 : i32 to vector<1x512xi32>
    %38 = arith.cmpi slt, %30, %37 : vector<1x512xi32>
    %c8_i32 = arith.constant 8 : i32
    %39 = vector.broadcast %c8_i32 : i32 to vector<1x512xi32>
    %40 = arith.cmpi sge, %34, %39 : vector<1x512xi32>
    %c56_i32 = arith.constant 56 : i32
    %41 = vector.broadcast %c56_i32 : i32 to vector<1x512xi32>
    %42 = arith.cmpi slt, %34, %41 : vector<1x512xi32>
    %c1_i32 = arith.constant 1 : i32
    %43 = vector.broadcast %c1_i32 : i32 to vector<1x512xi32>
    %44 = arith.cmpi sge, %32, %43 : vector<1x512xi32>
    %c7_i32_5 = arith.constant 7 : i32
    %45 = vector.broadcast %c7_i32_5 : i32 to vector<1x512xi32>
    %46 = arith.cmpi slt, %32, %45 : vector<1x512xi32>
    %c0_6 = arith.constant 0 : index
    %c0_7 = arith.constant 0 : index
    %c0_8 = arith.constant 0 : index
    %47 = vector.load %arg1[%c0_6, %c0_7, %c0_8] : memref<2x8x512xf32, #tpu.memory_space<vmem>>, vector<1x8x512xf32>
    %48 = vector.shape_cast %47 : vector<1x8x512xf32> to vector<8x512xf32>
    %cst = arith.constant dense<0.000000e+00> : vector<8x512xf32>
    %49 = tpu.matmul %0, %48, %cst {dimension_numbers = #tpu.dot_dimension_numbers<[1], [0], [0], [1], [0, 0, 1, 1], [], []>, precision = #tpu.contract_precision<fp32>} : vector<8x8xf32>, vector<8x512xf32>, vector<8x512xf32> -> vector<8x512xf32>
    %cst_9 = arith.constant dense<0.000000e+00> : vector<8xf32>
    %50 = vector.multi_reduction <add>, %49, %cst_9 [1] : vector<8x512xf32> to vector<8xf32>
    %51 = vector.shape_cast %50 : vector<8xf32> to vector<8x1xf32>
    %52 = arith.mulf %49, %49 : vector<8x512xf32>
    %cst_10 = arith.constant dense<0.000000e+00> : vector<8xf32>
    %53 = vector.multi_reduction <add>, %52, %cst_10 [1] : vector<8x512xf32> to vector<8xf32>
    %54 = vector.shape_cast %53 : vector<8xf32> to vector<8x1xf32>
    %cst_11 = arith.constant 0.001953125 : f32
    %55 = vector.broadcast %cst_11 : f32 to vector<8x1xf32>
    %56 = arith.mulf %51, %55 : vector<8x1xf32>
    %cst_12 = arith.constant 0.001953125 : f32
    %57 = vector.broadcast %cst_12 : f32 to vector<8x1xf32>
    %58 = arith.mulf %54, %57 : vector<8x1xf32>
    %59 = arith.mulf %56, %56 : vector<8x1xf32>
    %60 = arith.subf %58, %59 : vector<8x1xf32>
    %cst_13 = arith.constant 0.000000e+00 : f32
    %61 = vector.broadcast %cst_13 : f32 to vector<8x1xf32>
    %62 = arith.maximumf %60, %61 : vector<8x1xf32>
    %63 = vector.broadcast %56 : vector<8x1xf32> to vector<8x512xf32>
    %64 = arith.subf %49, %63 : vector<8x512xf32>
    %cst_14 = arith.constant 9.99999974E-6 : f32
    %65 = vector.broadcast %cst_14 : f32 to vector<8x1xf32>
    %66 = arith.addf %62, %65 : vector<8x1xf32>
    %67 = math.rsqrt %66 : vector<8x1xf32>
    %68 = vector.broadcast %67 : vector<8x1xf32> to vector<8x512xf32>
    %69 = arith.mulf %64, %68 : vector<8x512xf32>
    %cst_15 = arith.constant 0.000000e+00 : f32
    %70 = vector.broadcast %cst_15 : f32 to vector<8x512xf32>
    %71 = arith.cmpf oge, %69, %70 : vector<8x512xf32>
    %cst_16 = arith.constant 0.00999999977 : f32
    %72 = vector.broadcast %cst_16 : f32 to vector<8x512xf32>
    %73 = arith.mulf %72, %69 : vector<8x512xf32>
    %74 = arith.select %71, %69, %73 : vector<8x512xi1>, vector<8x512xf32>
    %c73_i32 = arith.constant 73 : i32
    %75 = tpu.dynamic_rotate %74 by %c73_i32 dim 1 : vector<8x512xf32>, i32 -> vector<8x512xf32>
    %cst_17 = arith.constant 0.000000e+00 : f32
    %76 = vector.shape_cast %44 : vector<1x512xi1> to vector<1x512xi1>
    %77 = vector.broadcast %76 : vector<1x512xi1> to vector<8x512xi1>
    %78 = vector.broadcast %cst_17 : f32 to vector<8x512xf32>
    %79 = arith.select %77, %75, %78 : vector<8x512xi1>, vector<8x512xf32>
    %80 = vector.broadcast %3 : vector<8x1xf32> to vector<8x512xf32>
    %81 = arith.mulf %80, %79 : vector<8x512xf32>
    %c72_i32 = arith.constant 72 : i32
    %82 = tpu.dynamic_rotate %74 by %c72_i32 dim 1 : vector<8x512xf32>, i32 -> vector<8x512xf32>
    %83 = vector.broadcast %4 : vector<8x1xf32> to vector<8x512xf32>
    %84 = arith.mulf %83, %82 : vector<8x512xf32>
    %85 = arith.addf %81, %84 : vector<8x512xf32>
    %c71_i32 = arith.constant 71 : i32
    %86 = tpu.dynamic_rotate %74 by %c71_i32 dim 1 : vector<8x512xf32>, i32 -> vector<8x512xf32>
    %cst_18 = arith.constant 0.000000e+00 : f32
    %87 = vector.shape_cast %46 : vector<1x512xi1> to vector<1x512xi1>
    %88 = vector.broadcast %87 : vector<1x512xi1> to vector<8x512xi1>
    %89 = vector.broadcast %cst_18 : f32 to vector<8x512xf32>
    %90 = arith.select %88, %86, %89 : vector<8x512xi1>, vector<8x512xf32>
    %91 = vector.broadcast %5 : vector<8x1xf32> to vector<8x512xf32>
    %92 = arith.mulf %91, %90 : vector<8x512xf32>
    %93 = arith.addf %85, %92 : vector<8x512xf32>
    %94 = arith.andi %36, %40 : vector<1x512xi1>
    %cst_19 = arith.constant 0.000000e+00 : f32
    %95 = vector.shape_cast %94 : vector<1x512xi1> to vector<1x512xi1>
    %96 = vector.broadcast %95 : vector<1x512xi1> to vector<8x512xi1>
    %97 = vector.broadcast %cst_19 : f32 to vector<8x512xf32>
    %98 = arith.select %96, %93, %97 : vector<8x512xi1>, vector<8x512xf32>
    %c65_i32 = arith.constant 65 : i32
    %99 = tpu.dynamic_rotate %74 by %c65_i32 dim 1 : vector<8x512xf32>, i32 -> vector<8x512xf32>
    %cst_20 = arith.constant 0.000000e+00 : f32
    %100 = vector.shape_cast %44 : vector<1x512xi1> to vector<1x512xi1>
    %101 = vector.broadcast %100 : vector<1x512xi1> to vector<8x512xi1>
    %102 = vector.broadcast %cst_20 : f32 to vector<8x512xf32>
    %103 = arith.select %101, %99, %102 : vector<8x512xi1>, vector<8x512xf32>
    %104 = vector.broadcast %6 : vector<8x1xf32> to vector<8x512xf32>
    %105 = arith.mulf %104, %103 : vector<8x512xf32>
    %c64_i32_21 = arith.constant 64 : i32
    %106 = tpu.dynamic_rotate %74 by %c64_i32_21 dim 1 : vector<8x512xf32>, i32 -> vector<8x512xf32>
    %107 = vector.broadcast %7 : vector<8x1xf32> to vector<8x512xf32>
    %108 = arith.mulf %107, %106 : vector<8x512xf32>
    %109 = arith.addf %105, %108 : vector<8x512xf32>
    %c63_i32_22 = arith.constant 63 : i32
    %110 = tpu.dynamic_rotate %74 by %c63_i32_22 dim 1 : vector<8x512xf32>, i32 -> vector<8x512xf32>
    %cst_23 = arith.constant 0.000000e+00 : f32
    %111 = vector.shape_cast %46 : vector<1x512xi1> to vector<1x512xi1>
    %112 = vector.broadcast %111 : vector<1x512xi1> to vector<8x512xi1>
    %113 = vector.broadcast %cst_23 : f32 to vector<8x512xf32>
    %114 = arith.select %112, %110, %113 : vector<8x512xi1>, vector<8x512xf32>
    %115 = vector.broadcast %8 : vector<8x1xf32> to vector<8x512xf32>
    %116 = arith.mulf %115, %114 : vector<8x512xf32>
    %117 = arith.addf %109, %116 : vector<8x512xf32>
    %cst_24 = arith.constant 0.000000e+00 : f32
    %118 = vector.shape_cast %36 : vector<1x512xi1> to vector<1x512xi1>
    %119 = vector.broadcast %118 : vector<1x512xi1> to vector<8x512xi1>
    %120 = vector.broadcast %cst_24 : f32 to vector<8x512xf32>
    %121 = arith.select %119, %117, %120 : vector<8x512xi1>, vector<8x512xf32>
    %c57_i32 = arith.constant 57 : i32
    %122 = tpu.dynamic_rotate %74 by %c57_i32 dim 1 : vector<8x512xf32>, i32 -> vector<8x512xf32>
    %cst_25 = arith.constant 0.000000e+00 : f32
    %123 = vector.shape_cast %44 : vector<1x512xi1> to vector<1x512xi1>
    %124 = vector.broadcast %123 : vector<1x512xi1> to vector<8x512xi1>
    %125 = vector.broadcast %cst_25 : f32 to vector<8x512xf32>
    %126 = arith.select %124, %122, %125 : vector<8x512xi1>, vector<8x512xf32>
    %127 = vector.broadcast %9 : vector<8x1xf32> to vector<8x512xf32>
    %128 = arith.mulf %127, %126 : vector<8x512xf32>
    %c56_i32_26 = arith.constant 56 : i32
    %129 = tpu.dynamic_rotate %74 by %c56_i32_26 dim 1 : vector<8x512xf32>, i32 -> vector<8x512xf32>
    %130 = vector.broadcast %10 : vector<8x1xf32> to vector<8x512xf32>
    %131 = arith.mulf %130, %129 : vector<8x512xf32>
    %132 = arith.addf %128, %131 : vector<8x512xf32>
    %c55_i32 = arith.constant 55 : i32
    %133 = tpu.dynamic_rotate %74 by %c55_i32 dim 1 : vector<8x512xf32>, i32 -> vector<8x512xf32>
    %cst_27 = arith.constant 0.000000e+00 : f32
    %134 = vector.shape_cast %46 : vector<1x512xi1> to vector<1x512xi1>
    %135 = vector.broadcast %134 : vector<1x512xi1> to vector<8x512xi1>
    %136 = vector.broadcast %cst_27 : f32 to vector<8x512xf32>
    %137 = arith.select %135, %133, %136 : vector<8x512xi1>, vector<8x512xf32>
    %138 = vector.broadcast %11 : vector<8x1xf32> to vector<8x512xf32>
    %139 = arith.mulf %138, %137 : vector<8x512xf32>
    %140 = arith.addf %132, %139 : vector<8x512xf32>
    %141 = arith.andi %36, %42 : vector<1x512xi1>
    %cst_28 = arith.constant 0.000000e+00 : f32
    %142 = vector.shape_cast %141 : vector<1x512xi1> to vector<1x512xi1>
    %143 = vector.broadcast %142 : vector<1x512xi1> to vector<8x512xi1>
    %144 = vector.broadcast %cst_28 : f32 to vector<8x512xf32>
    %145 = arith.select %143, %140, %144 : vector<8x512xi1>, vector<8x512xf32>
    %146 = arith.addf %98, %121 : vector<8x512xf32>
    %147 = arith.addf %146, %145 : vector<8x512xf32>
    %c9_i32 = arith.constant 9 : i32
    %148 = tpu.dynamic_rotate %74 by %c9_i32 dim 1 : vector<8x512xf32>, i32 -> vector<8x512xf32>
    %cst_29 = arith.constant 0.000000e+00 : f32
    %149 = vector.shape_cast %44 : vector<1x512xi1> to vector<1x512xi1>
    %150 = vector.broadcast %149 : vector<1x512xi1> to vector<8x512xi1>
    %151 = vector.broadcast %cst_29 : f32 to vector<8x512xf32>
    %152 = arith.select %150, %148, %151 : vector<8x512xi1>, vector<8x512xf32>
    %153 = vector.broadcast %12 : vector<8x1xf32> to vector<8x512xf32>
    %154 = arith.mulf %153, %152 : vector<8x512xf32>
    %c8_i32_30 = arith.constant 8 : i32
    %155 = tpu.dynamic_rotate %74 by %c8_i32_30 dim 1 : vector<8x512xf32>, i32 -> vector<8x512xf32>
    %156 = vector.broadcast %13 : vector<8x1xf32> to vector<8x512xf32>
    %157 = arith.mulf %156, %155 : vector<8x512xf32>
    %158 = arith.addf %154, %157 : vector<8x512xf32>
    %c7_i32_31 = arith.constant 7 : i32
    %159 = tpu.dynamic_rotate %74 by %c7_i32_31 dim 1 : vector<8x512xf32>, i32 -> vector<8x512xf32>
    %cst_32 = arith.constant 0.000000e+00 : f32
    %160 = vector.shape_cast %46 : vector<1x512xi1> to vector<1x512xi1>
    %161 = vector.broadcast %160 : vector<1x512xi1> to vector<8x512xi1>
    %162 = vector.broadcast %cst_32 : f32 to vector<8x512xf32>
    %163 = arith.select %161, %159, %162 : vector<8x512xi1>, vector<8x512xf32>
    %164 = vector.broadcast %14 : vector<8x1xf32> to vector<8x512xf32>
    %165 = arith.mulf %164, %163 : vector<8x512xf32>
    %166 = arith.addf %158, %165 : vector<8x512xf32>
    %cst_33 = arith.constant 0.000000e+00 : f32
    %167 = vector.shape_cast %40 : vector<1x512xi1> to vector<1x512xi1>
    %168 = vector.broadcast %167 : vector<1x512xi1> to vector<8x512xi1>
    %169 = vector.broadcast %cst_33 : f32 to vector<8x512xf32>
    %170 = arith.select %168, %166, %169 : vector<8x512xi1>, vector<8x512xf32>
    %c1_i32_34 = arith.constant 1 : i32
    %171 = tpu.dynamic_rotate %74 by %c1_i32_34 dim 1 : vector<8x512xf32>, i32 -> vector<8x512xf32>
    %cst_35 = arith.constant 0.000000e+00 : f32
    %172 = vector.shape_cast %44 : vector<1x512xi1> to vector<1x512xi1>
    %173 = vector.broadcast %172 : vector<1x512xi1> to vector<8x512xi1>
    %174 = vector.broadcast %cst_35 : f32 to vector<8x512xf32>
    %175 = arith.select %173, %171, %174 : vector<8x512xi1>, vector<8x512xf32>
    %176 = vector.broadcast %15 : vector<8x1xf32> to vector<8x512xf32>
    %177 = arith.mulf %176, %175 : vector<8x512xf32>
    %178 = vector.broadcast %16 : vector<8x1xf32> to vector<8x512xf32>
    %179 = arith.mulf %178, %74 : vector<8x512xf32>
    %180 = arith.addf %177, %179 : vector<8x512xf32>
    %c511_i32 = arith.constant 511 : i32
    %181 = tpu.dynamic_rotate %74 by %c511_i32 dim 1 : vector<8x512xf32>, i32 -> vector<8x512xf32>
    %cst_36 = arith.constant 0.000000e+00 : f32
    %182 = vector.shape_cast %46 : vector<1x512xi1> to vector<1x512xi1>
    %183 = vector.broadcast %182 : vector<1x512xi1> to vector<8x512xi1>
    %184 = vector.broadcast %cst_36 : f32 to vector<8x512xf32>
    %185 = arith.select %183, %181, %184 : vector<8x512xi1>, vector<8x512xf32>
    %186 = vector.broadcast %17 : vector<8x1xf32> to vector<8x512xf32>
    %187 = arith.mulf %186, %185 : vector<8x512xf32>
    %188 = arith.addf %180, %187 : vector<8x512xf32>
    %c505_i32 = arith.constant 505 : i32
    %189 = tpu.dynamic_rotate %74 by %c505_i32 dim 1 : vector<8x512xf32>, i32 -> vector<8x512xf32>
    %cst_37 = arith.constant 0.000000e+00 : f32
    %190 = vector.shape_cast %44 : vector<1x512xi1> to vector<1x512xi1>
    %191 = vector.broadcast %190 : vector<1x512xi1> to vector<8x512xi1>
    %192 = vector.broadcast %cst_37 : f32 to vector<8x512xf32>
    %193 = arith.select %191, %189, %192 : vector<8x512xi1>, vector<8x512xf32>
    %194 = vector.broadcast %18 : vector<8x1xf32> to vector<8x512xf32>
    %195 = arith.mulf %194, %193 : vector<8x512xf32>
    %c504_i32 = arith.constant 504 : i32
    %196 = tpu.dynamic_rotate %74 by %c504_i32 dim 1 : vector<8x512xf32>, i32 -> vector<8x512xf32>
    %197 = vector.broadcast %19 : vector<8x1xf32> to vector<8x512xf32>
    %198 = arith.mulf %197, %196 : vector<8x512xf32>
    %199 = arith.addf %195, %198 : vector<8x512xf32>
    %c503_i32 = arith.constant 503 : i32
    %200 = tpu.dynamic_rotate %74 by %c503_i32 dim 1 : vector<8x512xf32>, i32 -> vector<8x512xf32>
    %cst_38 = arith.constant 0.000000e+00 : f32
    %201 = vector.shape_cast %46 : vector<1x512xi1> to vector<1x512xi1>
    %202 = vector.broadcast %201 : vector<1x512xi1> to vector<8x512xi1>
    %203 = vector.broadcast %cst_38 : f32 to vector<8x512xf32>
    %204 = arith.select %202, %200, %203 : vector<8x512xi1>, vector<8x512xf32>
    %205 = vector.broadcast %20 : vector<8x1xf32> to vector<8x512xf32>
    %206 = arith.mulf %205, %204 : vector<8x512xf32>
    %207 = arith.addf %199, %206 : vector<8x512xf32>
    %cst_39 = arith.constant 0.000000e+00 : f32
    %208 = vector.shape_cast %42 : vector<1x512xi1> to vector<1x512xi1>
    %209 = vector.broadcast %208 : vector<1x512xi1> to vector<8x512xi1>
    %210 = vector.broadcast %cst_39 : f32 to vector<8x512xf32>
    %211 = arith.select %209, %207, %210 : vector<8x512xi1>, vector<8x512xf32>
    %212 = arith.addf %170, %188 : vector<8x512xf32>
    %213 = arith.addf %212, %211 : vector<8x512xf32>
    %c457_i32 = arith.constant 457 : i32
    %214 = tpu.dynamic_rotate %74 by %c457_i32 dim 1 : vector<8x512xf32>, i32 -> vector<8x512xf32>
    %cst_40 = arith.constant 0.000000e+00 : f32
    %215 = vector.shape_cast %44 : vector<1x512xi1> to vector<1x512xi1>
    %216 = vector.broadcast %215 : vector<1x512xi1> to vector<8x512xi1>
    %217 = vector.broadcast %cst_40 : f32 to vector<8x512xf32>
    %218 = arith.select %216, %214, %217 : vector<8x512xi1>, vector<8x512xf32>
    %219 = vector.broadcast %21 : vector<8x1xf32> to vector<8x512xf32>
    %220 = arith.mulf %219, %218 : vector<8x512xf32>
    %c456_i32 = arith.constant 456 : i32
    %221 = tpu.dynamic_rotate %74 by %c456_i32 dim 1 : vector<8x512xf32>, i32 -> vector<8x512xf32>
    %222 = vector.broadcast %22 : vector<8x1xf32> to vector<8x512xf32>
    %223 = arith.mulf %222, %221 : vector<8x512xf32>
    %224 = arith.addf %220, %223 : vector<8x512xf32>
    %c455_i32 = arith.constant 455 : i32
    %225 = tpu.dynamic_rotate %74 by %c455_i32 dim 1 : vector<8x512xf32>, i32 -> vector<8x512xf32>
    %cst_41 = arith.constant 0.000000e+00 : f32
    %226 = vector.shape_cast %46 : vector<1x512xi1> to vector<1x512xi1>
    %227 = vector.broadcast %226 : vector<1x512xi1> to vector<8x512xi1>
    %228 = vector.broadcast %cst_41 : f32 to vector<8x512xf32>
    %229 = arith.select %227, %225, %228 : vector<8x512xi1>, vector<8x512xf32>
    %230 = vector.broadcast %23 : vector<8x1xf32> to vector<8x512xf32>
    %231 = arith.mulf %230, %229 : vector<8x512xf32>
    %232 = arith.addf %224, %231 : vector<8x512xf32>
    %233 = arith.andi %38, %40 : vector<1x512xi1>
    %cst_42 = arith.constant 0.000000e+00 : f32
    %234 = vector.shape_cast %233 : vector<1x512xi1> to vector<1x512xi1>
    %235 = vector.broadcast %234 : vector<1x512xi1> to vector<8x512xi1>
    %236 = vector.broadcast %cst_42 : f32 to vector<8x512xf32>
    %237 = arith.select %235, %232, %236 : vector<8x512xi1>, vector<8x512xf32>
    %c449_i32 = arith.constant 449 : i32
    %238 = tpu.dynamic_rotate %74 by %c449_i32 dim 1 : vector<8x512xf32>, i32 -> vector<8x512xf32>
    %cst_43 = arith.constant 0.000000e+00 : f32
    %239 = vector.shape_cast %44 : vector<1x512xi1> to vector<1x512xi1>
    %240 = vector.broadcast %239 : vector<1x512xi1> to vector<8x512xi1>
    %241 = vector.broadcast %cst_43 : f32 to vector<8x512xf32>
    %242 = arith.select %240, %238, %241 : vector<8x512xi1>, vector<8x512xf32>
    %243 = vector.broadcast %24 : vector<8x1xf32> to vector<8x512xf32>
    %244 = arith.mulf %243, %242 : vector<8x512xf32>
    %c448_i32_44 = arith.constant 448 : i32
    %245 = tpu.dynamic_rotate %74 by %c448_i32_44 dim 1 : vector<8x512xf32>, i32 -> vector<8x512xf32>
    %246 = vector.broadcast %25 : vector<8x1xf32> to vector<8x512xf32>
    %247 = arith.mulf %246, %245 : vector<8x512xf32>
    %248 = arith.addf %244, %247 : vector<8x512xf32>
    %c447_i32 = arith.constant 447 : i32
    %249 = tpu.dynamic_rotate %74 by %c447_i32 dim 1 : vector<8x512xf32>, i32 -> vector<8x512xf32>
    %cst_45 = arith.constant 0.000000e+00 : f32
    %250 = vector.shape_cast %46 : vector<1x512xi1> to vector<1x512xi1>
    %251 = vector.broadcast %250 : vector<1x512xi1> to vector<8x512xi1>
    %252 = vector.broadcast %cst_45 : f32 to vector<8x512xf32>
    %253 = arith.select %251, %249, %252 : vector<8x512xi1>, vector<8x512xf32>
    %254 = vector.broadcast %26 : vector<8x1xf32> to vector<8x512xf32>
    %255 = arith.mulf %254, %253 : vector<8x512xf32>
    %256 = arith.addf %248, %255 : vector<8x512xf32>
    %cst_46 = arith.constant 0.000000e+00 : f32
    %257 = vector.shape_cast %38 : vector<1x512xi1> to vector<1x512xi1>
    %258 = vector.broadcast %257 : vector<1x512xi1> to vector<8x512xi1>
    %259 = vector.broadcast %cst_46 : f32 to vector<8x512xf32>
    %260 = arith.select %258, %256, %259 : vector<8x512xi1>, vector<8x512xf32>
    %c441_i32 = arith.constant 441 : i32
    %261 = tpu.dynamic_rotate %74 by %c441_i32 dim 1 : vector<8x512xf32>, i32 -> vector<8x512xf32>
    %cst_47 = arith.constant 0.000000e+00 : f32
    %262 = vector.shape_cast %44 : vector<1x512xi1> to vector<1x512xi1>
    %263 = vector.broadcast %262 : vector<1x512xi1> to vector<8x512xi1>
    %264 = vector.broadcast %cst_47 : f32 to vector<8x512xf32>
    %265 = arith.select %263, %261, %264 : vector<8x512xi1>, vector<8x512xf32>
    %266 = vector.broadcast %27 : vector<8x1xf32> to vector<8x512xf32>
    %267 = arith.mulf %266, %265 : vector<8x512xf32>
    %c440_i32 = arith.constant 440 : i32
    %268 = tpu.dynamic_rotate %74 by %c440_i32 dim 1 : vector<8x512xf32>, i32 -> vector<8x512xf32>
    %269 = vector.broadcast %28 : vector<8x1xf32> to vector<8x512xf32>
    %270 = arith.mulf %269, %268 : vector<8x512xf32>
    %271 = arith.addf %267, %270 : vector<8x512xf32>
    %c439_i32 = arith.constant 439 : i32
    %272 = tpu.dynamic_rotate %74 by %c439_i32 dim 1 : vector<8x512xf32>, i32 -> vector<8x512xf32>
    %cst_48 = arith.constant 0.000000e+00 : f32
    %273 = vector.shape_cast %46 : vector<1x512xi1> to vector<1x512xi1>
    %274 = vector.broadcast %273 : vector<1x512xi1> to vector<8x512xi1>
    %275 = vector.broadcast %cst_48 : f32 to vector<8x512xf32>
    %276 = arith.select %274, %272, %275 : vector<8x512xi1>, vector<8x512xf32>
    %277 = vector.broadcast %29 : vector<8x1xf32> to vector<8x512xf32>
    %278 = arith.mulf %277, %276 : vector<8x512xf32>
    %279 = arith.addf %271, %278 : vector<8x512xf32>
    %280 = arith.andi %38, %42 : vector<1x512xi1>
    %cst_49 = arith.constant 0.000000e+00 : f32
    %281 = vector.shape_cast %280 : vector<1x512xi1> to vector<1x512xi1>
    %282 = vector.broadcast %281 : vector<1x512xi1> to vector<8x512xi1>
    %283 = vector.broadcast %cst_49 : f32 to vector<8x512xf32>
    %284 = arith.select %282, %279, %283 : vector<8x512xi1>, vector<8x512xf32>
    %285 = arith.addf %237, %260 : vector<8x512xf32>
    %286 = arith.addf %285, %284 : vector<8x512xf32>
    %287 = arith.addf %147, %213 : vector<8x512xf32>
    %288 = arith.addf %287, %286 : vector<8x512xf32>
    %cst_50 = arith.constant dense<0.000000e+00> : vector<8xf32>
    %289 = vector.multi_reduction <add>, %288, %cst_50 [1] : vector<8x512xf32> to vector<8xf32>
    %290 = vector.shape_cast %289 : vector<8xf32> to vector<8x1xf32>
    %291 = arith.mulf %288, %288 : vector<8x512xf32>
    %cst_51 = arith.constant dense<0.000000e+00> : vector<8xf32>
    %292 = vector.multi_reduction <add>, %291, %cst_51 [1] : vector<8x512xf32> to vector<8xf32>
    %293 = vector.shape_cast %292 : vector<8xf32> to vector<8x1xf32>
    %cst_52 = arith.constant 0.001953125 : f32
    %294 = vector.broadcast %cst_52 : f32 to vector<8x1xf32>
    %295 = arith.mulf %290, %294 : vector<8x1xf32>
    %cst_53 = arith.constant 0.001953125 : f32
    %296 = vector.broadcast %cst_53 : f32 to vector<8x1xf32>
    %297 = arith.mulf %293, %296 : vector<8x1xf32>
    %298 = arith.mulf %295, %295 : vector<8x1xf32>
    %299 = arith.subf %297, %298 : vector<8x1xf32>
    %cst_54 = arith.constant 0.000000e+00 : f32
    %300 = vector.broadcast %cst_54 : f32 to vector<8x1xf32>
    %301 = arith.maximumf %299, %300 : vector<8x1xf32>
    %302 = vector.broadcast %295 : vector<8x1xf32> to vector<8x512xf32>
    %303 = arith.subf %288, %302 : vector<8x512xf32>
    %cst_55 = arith.constant 9.99999974E-6 : f32
    %304 = vector.broadcast %cst_55 : f32 to vector<8x1xf32>
    %305 = arith.addf %301, %304 : vector<8x1xf32>
    %306 = math.rsqrt %305 : vector<8x1xf32>
    %307 = vector.broadcast %306 : vector<8x1xf32> to vector<8x512xf32>
    %308 = arith.mulf %303, %307 : vector<8x512xf32>
    %cst_56 = arith.constant dense<0.000000e+00> : vector<8x512xf32>
    %309 = tpu.matmul %1, %308, %cst_56 {dimension_numbers = #tpu.dot_dimension_numbers<[1], [0], [0], [1], [0, 0, 1, 1], [], []>, precision = #tpu.contract_precision<fp32>} : vector<8x8xf32>, vector<8x512xf32>, vector<8x512xf32> -> vector<8x512xf32>
    %cst_57 = arith.constant dense<0.000000e+00> : vector<8xf32>
    %310 = vector.multi_reduction <add>, %309, %cst_57 [1] : vector<8x512xf32> to vector<8xf32>
    %311 = vector.shape_cast %310 : vector<8xf32> to vector<8x1xf32>
    %312 = arith.mulf %309, %309 : vector<8x512xf32>
    %cst_58 = arith.constant dense<0.000000e+00> : vector<8xf32>
    %313 = vector.multi_reduction <add>, %312, %cst_58 [1] : vector<8x512xf32> to vector<8xf32>
    %314 = vector.shape_cast %313 : vector<8xf32> to vector<8x1xf32>
    %cst_59 = arith.constant 0.001953125 : f32
    %315 = vector.broadcast %cst_59 : f32 to vector<8x1xf32>
    %316 = arith.mulf %311, %315 : vector<8x1xf32>
    %cst_60 = arith.constant 0.001953125 : f32
    %317 = vector.broadcast %cst_60 : f32 to vector<8x1xf32>
    %318 = arith.mulf %314, %317 : vector<8x1xf32>
    %319 = arith.mulf %316, %316 : vector<8x1xf32>
    %320 = arith.subf %318, %319 : vector<8x1xf32>
    %cst_61 = arith.constant 0.000000e+00 : f32
    %321 = vector.broadcast %cst_61 : f32 to vector<8x1xf32>
    %322 = arith.maximumf %320, %321 : vector<8x1xf32>
    %323 = vector.broadcast %316 : vector<8x1xf32> to vector<8x512xf32>
    %324 = arith.subf %309, %323 : vector<8x512xf32>
    %cst_62 = arith.constant 9.99999974E-6 : f32
    %325 = vector.broadcast %cst_62 : f32 to vector<8x1xf32>
    %326 = arith.addf %322, %325 : vector<8x1xf32>
    %327 = math.rsqrt %326 : vector<8x1xf32>
    %328 = vector.broadcast %327 : vector<8x1xf32> to vector<8x512xf32>
    %329 = arith.mulf %324, %328 : vector<8x512xf32>
    %cst_63 = arith.constant 0.000000e+00 : f32
    %330 = vector.broadcast %cst_63 : f32 to vector<8x512xf32>
    %331 = arith.cmpf oge, %329, %330 : vector<8x512xf32>
    %cst_64 = arith.constant 0.00999999977 : f32
    %332 = vector.broadcast %cst_64 : f32 to vector<8x512xf32>
    %333 = arith.mulf %332, %329 : vector<8x512xf32>
    %334 = arith.select %331, %329, %333 : vector<8x512xi1>, vector<8x512xf32>
    %335 = vector.extract_strided_slice %48 {offsets = [0, 0], sizes = [4, 512], strides = [1, 1]} : vector<8x512xf32> to vector<4x512xf32>
    %c0_65 = arith.constant 0 : index
    %c0_66 = arith.constant 0 : index
    %c0_67 = arith.constant 0 : index
    %c0_68 = arith.constant 0 : index
    %336 = vector.load %arg5[%c0_65, %c0_66, %c0_67, %c0_68] : memref<2x4x2x512xf32, #tpu.memory_space<vmem>>, vector<1x4x1x512xf32>
    %337 = vector.shape_cast %336 : vector<1x4x1x512xf32> to vector<4x512xf32>
    %338 = vector.shape_cast %335 : vector<4x512xf32> to vector<1x4x1x512xf32>
    tpu.vector_store %arg5[%c0_65, %c0_66, %c0_67, %c0_68], %338 {strides = array<i32>} : memref<2x4x2x512xf32, #tpu.memory_space<vmem>>, vector<1x4x1x512xf32>,
    %339 = vector.extract_strided_slice %334 {offsets = [0, 0], sizes = [4, 512], strides = [1, 1]} : vector<8x512xf32> to vector<4x512xf32>
    %c0_69 = arith.constant 0 : index
    %c0_70 = arith.constant 0 : index
    %c1 = arith.constant 1 : index
    %c0_71 = arith.constant 0 : index
    %340 = vector.load %arg5[%c0_69, %c0_70, %c1, %c0_71] : memref<2x4x2x512xf32, #tpu.memory_space<vmem>>, vector<1x4x1x512xf32>
    %341 = vector.shape_cast %340 : vector<1x4x1x512xf32> to vector<4x512xf32>
    %342 = vector.shape_cast %339 : vector<4x512xf32> to vector<1x4x1x512xf32>
    tpu.vector_store %arg5[%c0_69, %c0_70, %c1, %c0_71], %342 {strides = array<i32>} : memref<2x4x2x512xf32, #tpu.memory_space<vmem>>, vector<1x4x1x512xf32>,
    %c1_72 = arith.constant 1 : index
    %c0_73 = arith.constant 0 : index
    %c0_74 = arith.constant 0 : index
    %343 = vector.load %arg1[%c1_72, %c0_73, %c0_74] : memref<2x8x512xf32, #tpu.memory_space<vmem>>, vector<1x8x512xf32>
    %344 = vector.shape_cast %343 : vector<1x8x512xf32> to vector<8x512xf32>
    %cst_75 = arith.constant dense<0.000000e+00> : vector<8x512xf32>
    %345 = tpu.matmul %0, %344, %cst_75 {dimension_numbers = #tpu.dot_dimension_numbers<[1], [0], [0], [1], [0, 0, 1, 1], [], []>, precision = #tpu.contract_precision<fp32>} : vector<8x8xf32>, vector<8x512xf32>, vector<8x512xf32> -> vector<8x512xf32>
    %cst_76 = arith.constant dense<0.000000e+00> : vector<8xf32>
    %346 = vector.multi_reduction <add>, %345, %cst_76 [1] : vector<8x512xf32> to vector<8xf32>
    %347 = vector.shape_cast %346 : vector<8xf32> to vector<8x1xf32>
    %348 = arith.mulf %345, %345 : vector<8x512xf32>
    %cst_77 = arith.constant dense<0.000000e+00> : vector<8xf32>
    %349 = vector.multi_reduction <add>, %348, %cst_77 [1] : vector<8x512xf32> to vector<8xf32>
    %350 = vector.shape_cast %349 : vector<8xf32> to vector<8x1xf32>
    %cst_78 = arith.constant 0.001953125 : f32
    %351 = vector.broadcast %cst_78 : f32 to vector<8x1xf32>
    %352 = arith.mulf %347, %351 : vector<8x1xf32>
    %cst_79 = arith.constant 0.001953125 : f32
    %353 = vector.broadcast %cst_79 : f32 to vector<8x1xf32>
    %354 = arith.mulf %350, %353 : vector<8x1xf32>
    %355 = arith.mulf %352, %352 : vector<8x1xf32>
    %356 = arith.subf %354, %355 : vector<8x1xf32>
    %cst_80 = arith.constant 0.000000e+00 : f32
    %357 = vector.broadcast %cst_80 : f32 to vector<8x1xf32>
    %358 = arith.maximumf %356, %357 : vector<8x1xf32>
    %359 = vector.broadcast %352 : vector<8x1xf32> to vector<8x512xf32>
    %360 = arith.subf %345, %359 : vector<8x512xf32>
    %cst_81 = arith.constant 9.99999974E-6 : f32
    %361 = vector.broadcast %cst_81 : f32 to vector<8x1xf32>
    %362 = arith.addf %358, %361 : vector<8x1xf32>
    %363 = math.rsqrt %362 : vector<8x1xf32>
    %364 = vector.broadcast %363 : vector<8x1xf32> to vector<8x512xf32>
    %365 = arith.mulf %360, %364 : vector<8x512xf32>
    %cst_82 = arith.constant 0.000000e+00 : f32
    %366 = vector.broadcast %cst_82 : f32 to vector<8x512xf32>
    %367 = arith.cmpf oge, %365, %366 : vector<8x512xf32>
    %cst_83 = arith.constant 0.00999999977 : f32
    %368 = vector.broadcast %cst_83 : f32 to vector<8x512xf32>
    %369 = arith.mulf %368, %365 : vector<8x512xf32>
    %370 = arith.select %367, %365, %369 : vector<8x512xi1>, vector<8x512xf32>
    %c73_i32_84 = arith.constant 73 : i32
    %371 = tpu.dynamic_rotate %370 by %c73_i32_84 dim 1 : vector<8x512xf32>, i32 -> vector<8x512xf32>
    %cst_85 = arith.constant 0.000000e+00 : f32
    %372 = vector.shape_cast %44 : vector<1x512xi1> to vector<1x512xi1>
    %373 = vector.broadcast %372 : vector<1x512xi1> to vector<8x512xi1>
    %374 = vector.broadcast %cst_85 : f32 to vector<8x512xf32>
    %375 = arith.select %373, %371, %374 : vector<8x512xi1>, vector<8x512xf32>
    %376 = vector.broadcast %3 : vector<8x1xf32> to vector<8x512xf32>
    %377 = arith.mulf %376, %375 : vector<8x512xf32>
    %c72_i32_86 = arith.constant 72 : i32
    %378 = tpu.dynamic_rotate %370 by %c72_i32_86 dim 1 : vector<8x512xf32>, i32 -> vector<8x512xf32>
    %379 = vector.broadcast %4 : vector<8x1xf32> to vector<8x512xf32>
    %380 = arith.mulf %379, %378 : vector<8x512xf32>
    %381 = arith.addf %377, %380 : vector<8x512xf32>
    %c71_i32_87 = arith.constant 71 : i32
    %382 = tpu.dynamic_rotate %370 by %c71_i32_87 dim 1 : vector<8x512xf32>, i32 -> vector<8x512xf32>
    %cst_88 = arith.constant 0.000000e+00 : f32
    %383 = vector.shape_cast %46 : vector<1x512xi1> to vector<1x512xi1>
    %384 = vector.broadcast %383 : vector<1x512xi1> to vector<8x512xi1>
    %385 = vector.broadcast %cst_88 : f32 to vector<8x512xf32>
    %386 = arith.select %384, %382, %385 : vector<8x512xi1>, vector<8x512xf32>
    %387 = vector.broadcast %5 : vector<8x1xf32> to vector<8x512xf32>
    %388 = arith.mulf %387, %386 : vector<8x512xf32>
    %389 = arith.addf %381, %388 : vector<8x512xf32>
    %390 = arith.andi %36, %40 : vector<1x512xi1>
    %cst_89 = arith.constant 0.000000e+00 : f32
    %391 = vector.shape_cast %390 : vector<1x512xi1> to vector<1x512xi1>
    %392 = vector.broadcast %391 : vector<1x512xi1> to vector<8x512xi1>
    %393 = vector.broadcast %cst_89 : f32 to vector<8x512xf32>
    %394 = arith.select %392, %389, %393 : vector<8x512xi1>, vector<8x512xf32>
    %c65_i32_90 = arith.constant 65 : i32
    %395 = tpu.dynamic_rotate %370 by %c65_i32_90 dim 1 : vector<8x512xf32>, i32 -> vector<8x512xf32>
    %cst_91 = arith.constant 0.000000e+00 : f32
    %396 = vector.shape_cast %44 : vector<1x512xi1> to vector<1x512xi1>
    %397 = vector.broadcast %396 : vector<1x512xi1> to vector<8x512xi1>
    %398 = vector.broadcast %cst_91 : f32 to vector<8x512xf32>
    %399 = arith.select %397, %395, %398 : vector<8x512xi1>, vector<8x512xf32>
    %400 = vector.broadcast %6 : vector<8x1xf32> to vector<8x512xf32>
    %401 = arith.mulf %400, %399 : vector<8x512xf32>
    %c64_i32_92 = arith.constant 64 : i32
    %402 = tpu.dynamic_rotate %370 by %c64_i32_92 dim 1 : vector<8x512xf32>, i32 -> vector<8x512xf32>
    %403 = vector.broadcast %7 : vector<8x1xf32> to vector<8x512xf32>
    %404 = arith.mulf %403, %402 : vector<8x512xf32>
    %405 = arith.addf %401, %404 : vector<8x512xf32>
    %c63_i32_93 = arith.constant 63 : i32
    %406 = tpu.dynamic_rotate %370 by %c63_i32_93 dim 1 : vector<8x512xf32>, i32 -> vector<8x512xf32>
    %cst_94 = arith.constant 0.000000e+00 : f32
    %407 = vector.shape_cast %46 : vector<1x512xi1> to vector<1x512xi1>
    %408 = vector.broadcast %407 : vector<1x512xi1> to vector<8x512xi1>
    %409 = vector.broadcast %cst_94 : f32 to vector<8x512xf32>
    %410 = arith.select %408, %406, %409 : vector<8x512xi1>, vector<8x512xf32>
    %411 = vector.broadcast %8 : vector<8x1xf32> to vector<8x512xf32>
    %412 = arith.mulf %411, %410 : vector<8x512xf32>
    %413 = arith.addf %405, %412 : vector<8x512xf32>
    %cst_95 = arith.constant 0.000000e+00 : f32
    %414 = vector.shape_cast %36 : vector<1x512xi1> to vector<1x512xi1>
    %415 = vector.broadcast %414 : vector<1x512xi1> to vector<8x512xi1>
    %416 = vector.broadcast %cst_95 : f32 to vector<8x512xf32>
    %417 = arith.select %415, %413, %416 : vector<8x512xi1>, vector<8x512xf32>
    %c57_i32_96 = arith.constant 57 : i32
    %418 = tpu.dynamic_rotate %370 by %c57_i32_96 dim 1 : vector<8x512xf32>, i32 -> vector<8x512xf32>
    %cst_97 = arith.constant 0.000000e+00 : f32
    %419 = vector.shape_cast %44 : vector<1x512xi1> to vector<1x512xi1>
    %420 = vector.broadcast %419 : vector<1x512xi1> to vector<8x512xi1>
    %421 = vector.broadcast %cst_97 : f32 to vector<8x512xf32>
    %422 = arith.select %420, %418, %421 : vector<8x512xi1>, vector<8x512xf32>
    %423 = vector.broadcast %9 : vector<8x1xf32> to vector<8x512xf32>
    %424 = arith.mulf %423, %422 : vector<8x512xf32>
    %c56_i32_98 = arith.constant 56 : i32
    %425 = tpu.dynamic_rotate %370 by %c56_i32_98 dim 1 : vector<8x512xf32>, i32 -> vector<8x512xf32>
    %426 = vector.broadcast %10 : vector<8x1xf32> to vector<8x512xf32>
    %427 = arith.mulf %426, %425 : vector<8x512xf32>
    %428 = arith.addf %424, %427 : vector<8x512xf32>
    %c55_i32_99 = arith.constant 55 : i32
    %429 = tpu.dynamic_rotate %370 by %c55_i32_99 dim 1 : vector<8x512xf32>, i32 -> vector<8x512xf32>
    %cst_100 = arith.constant 0.000000e+00 : f32
    %430 = vector.shape_cast %46 : vector<1x512xi1> to vector<1x512xi1>
    %431 = vector.broadcast %430 : vector<1x512xi1> to vector<8x512xi1>
    %432 = vector.broadcast %cst_100 : f32 to vector<8x512xf32>
    %433 = arith.select %431, %429, %432 : vector<8x512xi1>, vector<8x512xf32>
    %434 = vector.broadcast %11 : vector<8x1xf32> to vector<8x512xf32>
    %435 = arith.mulf %434, %433 : vector<8x512xf32>
    %436 = arith.addf %428, %435 : vector<8x512xf32>
    %437 = arith.andi %36, %42 : vector<1x512xi1>
    %cst_101 = arith.constant 0.000000e+00 : f32
    %438 = vector.shape_cast %437 : vector<1x512xi1> to vector<1x512xi1>
    %439 = vector.broadcast %438 : vector<1x512xi1> to vector<8x512xi1>
    %440 = vector.broadcast %cst_101 : f32 to vector<8x512xf32>
    %441 = arith.select %439, %436, %440 : vector<8x512xi1>, vector<8x512xf32>
    %442 = arith.addf %394, %417 : vector<8x512xf32>
    %443 = arith.addf %442, %441 : vector<8x512xf32>
    %c9_i32_102 = arith.constant 9 : i32
    %444 = tpu.dynamic_rotate %370 by %c9_i32_102 dim 1 : vector<8x512xf32>, i32 -> vector<8x512xf32>
    %cst_103 = arith.constant 0.000000e+00 : f32
    %445 = vector.shape_cast %44 : vector<1x512xi1> to vector<1x512xi1>
    %446 = vector.broadcast %445 : vector<1x512xi1> to vector<8x512xi1>
    %447 = vector.broadcast %cst_103 : f32 to vector<8x512xf32>
    %448 = arith.select %446, %444, %447 : vector<8x512xi1>, vector<8x512xf32>
    %449 = vector.broadcast %12 : vector<8x1xf32> to vector<8x512xf32>
    %450 = arith.mulf %449, %448 : vector<8x512xf32>
    %c8_i32_104 = arith.constant 8 : i32
    %451 = tpu.dynamic_rotate %370 by %c8_i32_104 dim 1 : vector<8x512xf32>, i32 -> vector<8x512xf32>
    %452 = vector.broadcast %13 : vector<8x1xf32> to vector<8x512xf32>
    %453 = arith.mulf %452, %451 : vector<8x512xf32>
    %454 = arith.addf %450, %453 : vector<8x512xf32>
    %c7_i32_105 = arith.constant 7 : i32
    %455 = tpu.dynamic_rotate %370 by %c7_i32_105 dim 1 : vector<8x512xf32>, i32 -> vector<8x512xf32>
    %cst_106 = arith.constant 0.000000e+00 : f32
    %456 = vector.shape_cast %46 : vector<1x512xi1> to vector<1x512xi1>
    %457 = vector.broadcast %456 : vector<1x512xi1> to vector<8x512xi1>
    %458 = vector.broadcast %cst_106 : f32 to vector<8x512xf32>
    %459 = arith.select %457, %455, %458 : vector<8x512xi1>, vector<8x512xf32>
    %460 = vector.broadcast %14 : vector<8x1xf32> to vector<8x512xf32>
    %461 = arith.mulf %460, %459 : vector<8x512xf32>
    %462 = arith.addf %454, %461 : vector<8x512xf32>
    %cst_107 = arith.constant 0.000000e+00 : f32
    %463 = vector.shape_cast %40 : vector<1x512xi1> to vector<1x512xi1>
    %464 = vector.broadcast %463 : vector<1x512xi1> to vector<8x512xi1>
    %465 = vector.broadcast %cst_107 : f32 to vector<8x512xf32>
    %466 = arith.select %464, %462, %465 : vector<8x512xi1>, vector<8x512xf32>
    %c1_i32_108 = arith.constant 1 : i32
    %467 = tpu.dynamic_rotate %370 by %c1_i32_108 dim 1 : vector<8x512xf32>, i32 -> vector<8x512xf32>
    %cst_109 = arith.constant 0.000000e+00 : f32
    %468 = vector.shape_cast %44 : vector<1x512xi1> to vector<1x512xi1>
    %469 = vector.broadcast %468 : vector<1x512xi1> to vector<8x512xi1>
    %470 = vector.broadcast %cst_109 : f32 to vector<8x512xf32>
    %471 = arith.select %469, %467, %470 : vector<8x512xi1>, vector<8x512xf32>
    %472 = vector.broadcast %15 : vector<8x1xf32> to vector<8x512xf32>
    %473 = arith.mulf %472, %471 : vector<8x512xf32>
    %474 = vector.broadcast %16 : vector<8x1xf32> to vector<8x512xf32>
    %475 = arith.mulf %474, %370 : vector<8x512xf32>
    %476 = arith.addf %473, %475 : vector<8x512xf32>
    %c511_i32_110 = arith.constant 511 : i32
    %477 = tpu.dynamic_rotate %370 by %c511_i32_110 dim 1 : vector<8x512xf32>, i32 -> vector<8x512xf32>
    %cst_111 = arith.constant 0.000000e+00 : f32
    %478 = vector.shape_cast %46 : vector<1x512xi1> to vector<1x512xi1>
    %479 = vector.broadcast %478 : vector<1x512xi1> to vector<8x512xi1>
    %480 = vector.broadcast %cst_111 : f32 to vector<8x512xf32>
    %481 = arith.select %479, %477, %480 : vector<8x512xi1>, vector<8x512xf32>
    %482 = vector.broadcast %17 : vector<8x1xf32> to vector<8x512xf32>
    %483 = arith.mulf %482, %481 : vector<8x512xf32>
    %484 = arith.addf %476, %483 : vector<8x512xf32>
    %c505_i32_112 = arith.constant 505 : i32
    %485 = tpu.dynamic_rotate %370 by %c505_i32_112 dim 1 : vector<8x512xf32>, i32 -> vector<8x512xf32>
    %cst_113 = arith.constant 0.000000e+00 : f32
    %486 = vector.shape_cast %44 : vector<1x512xi1> to vector<1x512xi1>
    %487 = vector.broadcast %486 : vector<1x512xi1> to vector<8x512xi1>
    %488 = vector.broadcast %cst_113 : f32 to vector<8x512xf32>
    %489 = arith.select %487, %485, %488 : vector<8x512xi1>, vector<8x512xf32>
    %490 = vector.broadcast %18 : vector<8x1xf32> to vector<8x512xf32>
    %491 = arith.mulf %490, %489 : vector<8x512xf32>
    %c504_i32_114 = arith.constant 504 : i32
    %492 = tpu.dynamic_rotate %370 by %c504_i32_114 dim 1 : vector<8x512xf32>, i32 -> vector<8x512xf32>
    %493 = vector.broadcast %19 : vector<8x1xf32> to vector<8x512xf32>
    %494 = arith.mulf %493, %492 : vector<8x512xf32>
    %495 = arith.addf %491, %494 : vector<8x512xf32>
    %c503_i32_115 = arith.constant 503 : i32
    %496 = tpu.dynamic_rotate %370 by %c503_i32_115 dim 1 : vector<8x512xf32>, i32 -> vector<8x512xf32>
    %cst_116 = arith.constant 0.000000e+00 : f32
    %497 = vector.shape_cast %46 : vector<1x512xi1> to vector<1x512xi1>
    %498 = vector.broadcast %497 : vector<1x512xi1> to vector<8x512xi1>
    %499 = vector.broadcast %cst_116 : f32 to vector<8x512xf32>
    %500 = arith.select %498, %496, %499 : vector<8x512xi1>, vector<8x512xf32>
    %501 = vector.broadcast %20 : vector<8x1xf32> to vector<8x512xf32>
    %502 = arith.mulf %501, %500 : vector<8x512xf32>
    %503 = arith.addf %495, %502 : vector<8x512xf32>
    %cst_117 = arith.constant 0.000000e+00 : f32
    %504 = vector.shape_cast %42 : vector<1x512xi1> to vector<1x512xi1>
    %505 = vector.broadcast %504 : vector<1x512xi1> to vector<8x512xi1>
    %506 = vector.broadcast %cst_117 : f32 to vector<8x512xf32>
    %507 = arith.select %505, %503, %506 : vector<8x512xi1>, vector<8x512xf32>
    %508 = arith.addf %466, %484 : vector<8x512xf32>
    %509 = arith.addf %508, %507 : vector<8x512xf32>
    %c457_i32_118 = arith.constant 457 : i32
    %510 = tpu.dynamic_rotate %370 by %c457_i32_118 dim 1 : vector<8x512xf32>, i32 -> vector<8x512xf32>
    %cst_119 = arith.constant 0.000000e+00 : f32
    %511 = vector.shape_cast %44 : vector<1x512xi1> to vector<1x512xi1>
    %512 = vector.broadcast %511 : vector<1x512xi1> to vector<8x512xi1>
    %513 = vector.broadcast %cst_119 : f32 to vector<8x512xf32>
    %514 = arith.select %512, %510, %513 : vector<8x512xi1>, vector<8x512xf32>
    %515 = vector.broadcast %21 : vector<8x1xf32> to vector<8x512xf32>
    %516 = arith.mulf %515, %514 : vector<8x512xf32>
    %c456_i32_120 = arith.constant 456 : i32
    %517 = tpu.dynamic_rotate %370 by %c456_i32_120 dim 1 : vector<8x512xf32>, i32 -> vector<8x512xf32>
    %518 = vector.broadcast %22 : vector<8x1xf32> to vector<8x512xf32>
    %519 = arith.mulf %518, %517 : vector<8x512xf32>
    %520 = arith.addf %516, %519 : vector<8x512xf32>
    %c455_i32_121 = arith.constant 455 : i32
    %521 = tpu.dynamic_rotate %370 by %c455_i32_121 dim 1 : vector<8x512xf32>, i32 -> vector<8x512xf32>
    %cst_122 = arith.constant 0.000000e+00 : f32
    %522 = vector.shape_cast %46 : vector<1x512xi1> to vector<1x512xi1>
    %523 = vector.broadcast %522 : vector<1x512xi1> to vector<8x512xi1>
    %524 = vector.broadcast %cst_122 : f32 to vector<8x512xf32>
    %525 = arith.select %523, %521, %524 : vector<8x512xi1>, vector<8x512xf32>
    %526 = vector.broadcast %23 : vector<8x1xf32> to vector<8x512xf32>
    %527 = arith.mulf %526, %525 : vector<8x512xf32>
    %528 = arith.addf %520, %527 : vector<8x512xf32>
    %529 = arith.andi %38, %40 : vector<1x512xi1>
    %cst_123 = arith.constant 0.000000e+00 : f32
    %530 = vector.shape_cast %529 : vector<1x512xi1> to vector<1x512xi1>
    %531 = vector.broadcast %530 : vector<1x512xi1> to vector<8x512xi1>
    %532 = vector.broadcast %cst_123 : f32 to vector<8x512xf32>
    %533 = arith.select %531, %528, %532 : vector<8x512xi1>, vector<8x512xf32>
    %c449_i32_124 = arith.constant 449 : i32
    %534 = tpu.dynamic_rotate %370 by %c449_i32_124 dim 1 : vector<8x512xf32>, i32 -> vector<8x512xf32>
    %cst_125 = arith.constant 0.000000e+00 : f32
    %535 = vector.shape_cast %44 : vector<1x512xi1> to vector<1x512xi1>
    %536 = vector.broadcast %535 : vector<1x512xi1> to vector<8x512xi1>
    %537 = vector.broadcast %cst_125 : f32 to vector<8x512xf32>
    %538 = arith.select %536, %534, %537 : vector<8x512xi1>, vector<8x512xf32>
    %539 = vector.broadcast %24 : vector<8x1xf32> to vector<8x512xf32>
    %540 = arith.mulf %539, %538 : vector<8x512xf32>
    %c448_i32_126 = arith.constant 448 : i32
    %541 = tpu.dynamic_rotate %370 by %c448_i32_126 dim 1 : vector<8x512xf32>, i32 -> vector<8x512xf32>
    %542 = vector.broadcast %25 : vector<8x1xf32> to vector<8x512xf32>
    %543 = arith.mulf %542, %541 : vector<8x512xf32>
    %544 = arith.addf %540, %543 : vector<8x512xf32>
    %c447_i32_127 = arith.constant 447 : i32
    %545 = tpu.dynamic_rotate %370 by %c447_i32_127 dim 1 : vector<8x512xf32>, i32 -> vector<8x512xf32>
    %cst_128 = arith.constant 0.000000e+00 : f32
    %546 = vector.shape_cast %46 : vector<1x512xi1> to vector<1x512xi1>
    %547 = vector.broadcast %546 : vector<1x512xi1> to vector<8x512xi1>
    %548 = vector.broadcast %cst_128 : f32 to vector<8x512xf32>
    %549 = arith.select %547, %545, %548 : vector<8x512xi1>, vector<8x512xf32>
    %550 = vector.broadcast %26 : vector<8x1xf32> to vector<8x512xf32>
    %551 = arith.mulf %550, %549 : vector<8x512xf32>
    %552 = arith.addf %544, %551 : vector<8x512xf32>
    %cst_129 = arith.constant 0.000000e+00 : f32
    %553 = vector.shape_cast %38 : vector<1x512xi1> to vector<1x512xi1>
    %554 = vector.broadcast %553 : vector<1x512xi1> to vector<8x512xi1>
    %555 = vector.broadcast %cst_129 : f32 to vector<8x512xf32>
    %556 = arith.select %554, %552, %555 : vector<8x512xi1>, vector<8x512xf32>
    %c441_i32_130 = arith.constant 441 : i32
    %557 = tpu.dynamic_rotate %370 by %c441_i32_130 dim 1 : vector<8x512xf32>, i32 -> vector<8x512xf32>
    %cst_131 = arith.constant 0.000000e+00 : f32
    %558 = vector.shape_cast %44 : vector<1x512xi1> to vector<1x512xi1>
    %559 = vector.broadcast %558 : vector<1x512xi1> to vector<8x512xi1>
    %560 = vector.broadcast %cst_131 : f32 to vector<8x512xf32>
    %561 = arith.select %559, %557, %560 : vector<8x512xi1>, vector<8x512xf32>
    %562 = vector.broadcast %27 : vector<8x1xf32> to vector<8x512xf32>
    %563 = arith.mulf %562, %561 : vector<8x512xf32>
    %c440_i32_132 = arith.constant 440 : i32
    %564 = tpu.dynamic_rotate %370 by %c440_i32_132 dim 1 : vector<8x512xf32>, i32 -> vector<8x512xf32>
    %565 = vector.broadcast %28 : vector<8x1xf32> to vector<8x512xf32>
    %566 = arith.mulf %565, %564 : vector<8x512xf32>
    %567 = arith.addf %563, %566 : vector<8x512xf32>
    %c439_i32_133 = arith.constant 439 : i32
    %568 = tpu.dynamic_rotate %370 by %c439_i32_133 dim 1 : vector<8x512xf32>, i32 -> vector<8x512xf32>
    %cst_134 = arith.constant 0.000000e+00 : f32
    %569 = vector.shape_cast %46 : vector<1x512xi1> to vector<1x512xi1>
    %570 = vector.broadcast %569 : vector<1x512xi1> to vector<8x512xi1>
    %571 = vector.broadcast %cst_134 : f32 to vector<8x512xf32>
    %572 = arith.select %570, %568, %571 : vector<8x512xi1>, vector<8x512xf32>
    %573 = vector.broadcast %29 : vector<8x1xf32> to vector<8x512xf32>
    %574 = arith.mulf %573, %572 : vector<8x512xf32>
    %575 = arith.addf %567, %574 : vector<8x512xf32>
    %576 = arith.andi %38, %42 : vector<1x512xi1>
    %cst_135 = arith.constant 0.000000e+00 : f32
    %577 = vector.shape_cast %576 : vector<1x512xi1> to vector<1x512xi1>
    %578 = vector.broadcast %577 : vector<1x512xi1> to vector<8x512xi1>
    %579 = vector.broadcast %cst_135 : f32 to vector<8x512xf32>
    %580 = arith.select %578, %575, %579 : vector<8x512xi1>, vector<8x512xf32>
    %581 = arith.addf %533, %556 : vector<8x512xf32>
    %582 = arith.addf %581, %580 : vector<8x512xf32>
    %583 = arith.addf %443, %509 : vector<8x512xf32>
    %584 = arith.addf %583, %582 : vector<8x512xf32>
    %cst_136 = arith.constant dense<0.000000e+00> : vector<8xf32>
    %585 = vector.multi_reduction <add>, %584, %cst_136 [1] : vector<8x512xf32> to vector<8xf32>
    %586 = vector.shape_cast %585 : vector<8xf32> to vector<8x1xf32>
    %587 = arith.mulf %584, %584 : vector<8x512xf32>
    %cst_137 = arith.constant dense<0.000000e+00> : vector<8xf32>
    %588 = vector.multi_reduction <add>, %587, %cst_137 [1] : vector<8x512xf32> to vector<8xf32>
    %589 = vector.shape_cast %588 : vector<8xf32> to vector<8x1xf32>
    %cst_138 = arith.constant 0.001953125 : f32
    %590 = vector.broadcast %cst_138 : f32 to vector<8x1xf32>
    %591 = arith.mulf %586, %590 : vector<8x1xf32>
    %cst_139 = arith.constant 0.001953125 : f32
    %592 = vector.broadcast %cst_139 : f32 to vector<8x1xf32>
    %593 = arith.mulf %589, %592 : vector<8x1xf32>
    %594 = arith.mulf %591, %591 : vector<8x1xf32>
    %595 = arith.subf %593, %594 : vector<8x1xf32>
    %cst_140 = arith.constant 0.000000e+00 : f32
    %596 = vector.broadcast %cst_140 : f32 to vector<8x1xf32>
    %597 = arith.maximumf %595, %596 : vector<8x1xf32>
    %598 = vector.broadcast %591 : vector<8x1xf32> to vector<8x512xf32>
    %599 = arith.subf %584, %598 : vector<8x512xf32>
    %cst_141 = arith.constant 9.99999974E-6 : f32
    %600 = vector.broadcast %cst_141 : f32 to vector<8x1xf32>
    %601 = arith.addf %597, %600 : vector<8x1xf32>
    %602 = math.rsqrt %601 : vector<8x1xf32>
    %603 = vector.broadcast %602 : vector<8x1xf32> to vector<8x512xf32>
    %604 = arith.mulf %599, %603 : vector<8x512xf32>
    %cst_142 = arith.constant dense<0.000000e+00> : vector<8x512xf32>
    %605 = tpu.matmul %1, %604, %cst_142 {dimension_numbers = #tpu.dot_dimension_numbers<[1], [0], [0], [1], [0, 0, 1, 1], [], []>, precision = #tpu.contract_precision<fp32>} : vector<8x8xf32>, vector<8x512xf32>, vector<8x512xf32> -> vector<8x512xf32>
    %cst_143 = arith.constant dense<0.000000e+00> : vector<8xf32>
    %606 = vector.multi_reduction <add>, %605, %cst_143 [1] : vector<8x512xf32> to vector<8xf32>
    %607 = vector.shape_cast %606 : vector<8xf32> to vector<8x1xf32>
    %608 = arith.mulf %605, %605 : vector<8x512xf32>
    %cst_144 = arith.constant dense<0.000000e+00> : vector<8xf32>
    %609 = vector.multi_reduction <add>, %608, %cst_144 [1] : vector<8x512xf32> to vector<8xf32>
    %610 = vector.shape_cast %609 : vector<8xf32> to vector<8x1xf32>
    %cst_145 = arith.constant 0.001953125 : f32
    %611 = vector.broadcast %cst_145 : f32 to vector<8x1xf32>
    %612 = arith.mulf %607, %611 : vector<8x1xf32>
    %cst_146 = arith.constant 0.001953125 : f32
    %613 = vector.broadcast %cst_146 : f32 to vector<8x1xf32>
    %614 = arith.mulf %610, %613 : vector<8x1xf32>
    %615 = arith.mulf %612, %612 : vector<8x1xf32>
    %616 = arith.subf %614, %615 : vector<8x1xf32>
    %cst_147 = arith.constant 0.000000e+00 : f32
    %617 = vector.broadcast %cst_147 : f32 to vector<8x1xf32>
    %618 = arith.maximumf %616, %617 : vector<8x1xf32>
    %619 = vector.broadcast %612 : vector<8x1xf32> to vector<8x512xf32>
    %620 = arith.subf %605, %619 : vector<8x512xf32>
    %cst_148 = arith.constant 9.99999974E-6 : f32
    %621 = vector.broadcast %cst_148 : f32 to vector<8x1xf32>
    %622 = arith.addf %618, %621 : vector<8x1xf32>
    %623 = math.rsqrt %622 : vector<8x1xf32>
    %624 = vector.broadcast %623 : vector<8x1xf32> to vector<8x512xf32>
    %625 = arith.mulf %620, %624 : vector<8x512xf32>
    %cst_149 = arith.constant 0.000000e+00 : f32
    %626 = vector.broadcast %cst_149 : f32 to vector<8x512xf32>
    %627 = arith.cmpf oge, %625, %626 : vector<8x512xf32>
    %cst_150 = arith.constant 0.00999999977 : f32
    %628 = vector.broadcast %cst_150 : f32 to vector<8x512xf32>
    %629 = arith.mulf %628, %625 : vector<8x512xf32>
    %630 = arith.select %627, %625, %629 : vector<8x512xi1>, vector<8x512xf32>
    %631 = vector.extract_strided_slice %344 {offsets = [0, 0], sizes = [4, 512], strides = [1, 1]} : vector<8x512xf32> to vector<4x512xf32>
    %c1_151 = arith.constant 1 : index
    %c0_152 = arith.constant 0 : index
    %c0_153 = arith.constant 0 : index
    %c0_154 = arith.constant 0 : index
    %632 = vector.load %arg5[%c1_151, %c0_152, %c0_153, %c0_154] : memref<2x4x2x512xf32, #tpu.memory_space<vmem>>, vector<1x4x1x512xf32>
    %633 = vector.shape_cast %632 : vector<1x4x1x512xf32> to vector<4x512xf32>
    %634 = vector.shape_cast %631 : vector<4x512xf32> to vector<1x4x1x512xf32>
    tpu.vector_store %arg5[%c1_151, %c0_152, %c0_153, %c0_154], %634 {strides = array<i32>} : memref<2x4x2x512xf32, #tpu.memory_space<vmem>>, vector<1x4x1x512xf32>,
    %635 = vector.extract_strided_slice %630 {offsets = [0, 0], sizes = [4, 512], strides = [1, 1]} : vector<8x512xf32> to vector<4x512xf32>
    %c1_155 = arith.constant 1 : index
    %c0_156 = arith.constant 0 : index
    %c1_157 = arith.constant 1 : index
    %c0_158 = arith.constant 0 : index
    %636 = vector.load %arg5[%c1_155, %c0_156, %c1_157, %c0_158] : memref<2x4x2x512xf32, #tpu.memory_space<vmem>>, vector<1x4x1x512xf32>
    %637 = vector.shape_cast %636 : vector<1x4x1x512xf32> to vector<4x512xf32>
    %638 = vector.shape_cast %635 : vector<4x512xf32> to vector<1x4x1x512xf32>
    tpu.vector_store %arg5[%c1_155, %c0_156, %c1_157, %c0_158], %638 {strides = array<i32>} : memref<2x4x2x512xf32, #tpu.memory_space<vmem>>, vector<1x4x1x512xf32>,
    return
  }
  func.func @transform_0(%arg0: i32) -> (i32, i32, i32) {
    %c0_i32 = arith.constant 0 : i32
    %c0_i32_0 = arith.constant 0 : i32
    %c0_i32_1 = arith.constant 0 : i32
    return %arg0, %c0_i32, %c0_i32_0 : i32, i32, i32
  }
  func.func @transform_1(%arg0: i32) -> (i32, i32) {
    %c0_i32 = arith.constant 0 : i32
    %c0_i32_0 = arith.constant 0 : i32
    %c0_i32_1 = arith.constant 0 : i32
    return %c0_i32, %c0_i32_0 : i32, i32
  }
  func.func @transform_2(%arg0: i32) -> (i32, i32) {
    %c0_i32 = arith.constant 0 : i32
    %c0_i32_0 = arith.constant 0 : i32
    %c0_i32_1 = arith.constant 0 : i32
    return %c0_i32, %c0_i32_0 : i32, i32
  }
  func.func @transform_3(%arg0: i32) -> (i32, i32) {
    %c0_i32 = arith.constant 0 : i32
    %c0_i32_0 = arith.constant 0 : i32
    %c0_i32_1 = arith.constant 0 : i32
    return %c0_i32, %c0_i32_0 : i32, i32
  }
  func.func @transform_4(%arg0: i32) -> (i32, i32, i32, i32) {
    %c0_i32 = arith.constant 0 : i32
    %c0_i32_0 = arith.constant 0 : i32
    %c0_i32_1 = arith.constant 0 : i32
    %c0_i32_2 = arith.constant 0 : i32
    return %arg0, %c0_i32, %c0_i32_0, %c0_i32_1 : i32, i32, i32, i32
  }
}

</mosaic_0001>

<bundles_post_ra>
// kernel: shuffle_inverted_residual_stride1.1
= control target key start
LH: loop header
LB: loop body
LE: loop exit
PB: predicated region body
PF: predicated region fallthrough
CT: control target
= control target key end

     0   :  { %s4552_s15 = smov 0   ;;  %s7119_s0 = inlined_call_operand.vmem [shape: f32[4,8,512], index: 0, kind: input, shape index: {}]   ;;  %s7120_s1 = inlined_call_operand.vmem [shape: f32[8,8], index: 1, kind: input, shape index: {}]   ;;  %s7121_s2 = inlined_call_operand.vmem [shape: f32[8,27], index: 2, kind: input, shape index: {}]   ;;  %s7122_s3 = inlined_call_operand.vmem [shape: f32[8,8], index: 3, kind: input, shape index: {}]   ;;  %s7123_s4 = inlined_call_operand.vmem [shape: f32[4,4,2,512], index: 4, kind: output, shape index: {}]  }
   0x1 LB: > { %s4350_s16 = sadd.s32 4294967295, %s4481_s15   ;;  %p4354_p0 = scmp.ge.s32.totalorder %s4481_s15, 1  ;;  %s4481_s15 = sphi %s4552_s15, %s14_s15  }
   0x2   : > { %p164_p1 = scmp.lt.s32.totalorder %s4481_s15, 3 }
   0x4   : > { %p165_p2 = pnand %p4354_p0, %p164_p1 }
   0x6   : > { %168 = sbr.rel (%p165_p2) target bundleno = 2045 (0x7fd), region = 36 }
   0xb   : > { %s4355_s17 = sshll.u32 %s4350_s16, 1  ;;  %v206_v0 = vld [vmem:[%s7120_s1] sm:$0xff]  ;;  %vm7165_vm0 = vcmask 64512   ;;  %vm7164_vm1 = vcmask 1040384   ;;  %vm7151_vm2 = vcmask 1042434   ;;  %vm7163_vm3 = vcmask 1041409  }
   0xc   : > { %p193_p3 = scmp.lt.s32.totalorder %s4355_s17, 3  ;;  %v252_v1 = vsel %vm7165_vm0, %v206_v0, 0  ;;  %vm7150_vm4 = vcmask 1043459   ;;  %v209_v27 = vlaneseq  ;;  %vm7144_vm5 = vcmask 1041408   ;;  %v4664_v51 = vld [vmem:[%s7121_s2] sm:$0xff]  ;;  %s4507_s29 = smov 73  }
   0xd   : > { %v4564_v2 = vand.u32 4294901760, %v252_v1  ;;  %vm7137_vm6 = vcmask 1042433   ;;  %vm7147_vm7 = vcmask 1044484   ;;  %vm7130_vm8 = vcmask 1043458   ;;  %s4508_s30 = smov 65   ;;  %s4509_s5 = smov 9  }
   0xe   : > { %s7843_s17 = smov (!%p193_p3, %s4355_s17), 3  ;;  %vm7127_vm9 = vcmask 1045509   ;;  %vm4628_vm10 = vcmp.lt.s32.totalorder %v209_v27, 512  ;;  %v7363_v42 = vmov 0  ;;  %vm7124_vm11 = vcmask 1044483   ;;  %s4510_s6 = smov 8  }
   0xf   : > { %7359 = vst [vmem:[#allocation2_spill] sm:$0xff] %v4564_v2  ;;  %v4569_v3 = vsub.f32 %v252_v1, %v4564_v2  ;;  %s4382_s20 = sshll.u32 %s7843_s17, 5  ;;  %v7364_v42 = vsel %vm4628_vm10, 4294967295, %v7363_v42  ;;  %v4483_v52 = vmov 3   ;;  %v4484_v53 = vmov 13   ;;  %s4511_s7 = smov 1  }
  0x10   : > { %s4577_s23 = scalar_lea.vmem %s7119_s0, %s4382_s20  ;;  %s4625_s26 = scalar_lea.vmem %s7123_s4, %s4382_s20  ;;  %7365 = vst [vmem:[#allocation6_spill] sm:$0xff] %v7364_v42  ;;  %4438 = vset.pattern.permute.xlu0 %v4483_v52  ;;  %v4485_v54 = vmov 2   ;;  %v4486_v55 = vmov 7   ;;  %v4487_v56 = vmov 11   ;;  %v4488_v57 = vmov 19  }
  0x11   : > { %7360 = vst [vmem:[#allocation3_spill] sm:$0xff] %v4569_v3  ;;  %v4580_v4 = vand.u32 4294901760, %v4569_v3  ;;  %v246_v5 = vld [vmem:[%s4577_s23] sm:$0xff]  ;;  %v247_v6 = vld [vmem:[%s4577_s23 + $0x8] sm:$0xff]  ;;  %v248_v7 = vld [vmem:[%s4577_s23 + $0x10] sm:$0xff]  ;;  %1018 = vperm.xlu0 %4438, %v4664_v51   ;;  %v4489_v58 = vmov 17  }
  0x12   : > { %v4585_v8 = vand.u32 4294901760, %v246_v5  ;;  %v4589_v10 = vand.u32 4294901760, %v247_v6  ;;  %v2309_v11 = vrot.slane %v247_v6, 7  ;;  %v249_v12 = vld [vmem:[%s4577_s23 + $0x18] sm:$0xff]  ;;  %v4592_v13 = vand.u32 4294901760, %v248_v7  ;;  %s4512_s8 = smov 72  }
  0x13   : > { %7361 = vst [vmem:[#allocation4_spill] sm:$0xff] %v4580_v4  ;;  %v274_v9 = vsub.f32 %v4569_v3, %v4580_v4  ;;  %v4594_v14 = vand.u32 4294901760, %v249_v12  ;;  %v2310_v17 = vrot.slane %v248_v7, 6  ;;  %v2311_v24 = vrot.slane %v249_v12, 5  ;;  %s4513_s9 = smov 64   ;;  %s4514_s10 = smov 71  }
  0x14   : > { %270 = vmatpush.msra.mxu0 %v4585_v8  ;;  %v296_v15 = vsub.f32 %v246_v5, %v4585_v8  ;;  %346 = vmatpush.msra.mxu3 %v4585_v8  ;;  %v2313_v18 = vsel %vm7164_vm1, %v246_v5, %v2309_v11  ;;  %v2319_v19 = vsel %vm7163_vm3, %v246_v5, %v2309_v11  ;;  %s4515_s11 = smov 57   ;;  %s4516_s12 = smov 7   ;;  %v7405_v42 = vmov 0 }
  0x15   : > { %v4599_v16 = vand.u32 4294901760, %v274_v9  ;;  %350 = vmatmul.f32.vlgmr.msra.gmra.mxu3 %v4580_v4  ;;  %v442_v20 = vsub.f32 %v247_v6, %v4589_v10  ;;  %v2325_v22 = vsel %vm7151_vm2, %v246_v5, %v2309_v11  ;;  %v2331_v23 = vsel %vm7150_vm4, %v246_v5, %v2309_v11  ;;  %s4517_s13 = smov 121   ;;  %s4518_s14 = smov 63  }
  0x16   : > { %323 = vmatpush.msra.mxu2 %v296_v15  ;;  %v297_v21 = vand.u32 4294901760, %v296_v15  ;;  %v588_v26 = vsub.f32 %v248_v7, %v4592_v13  ;;  %v4611_v28 = vsub.f32 %v249_v12, %v4594_v14  ;;  %v2315_v30 = vsel %vm7151_vm2, %v2310_v17, %v2311_v24  ;;  %s4519_s16 = smov 56   ;;  %s4521_s17 = smov 120  }
  0x17   : > { %7362 = vst [vmem:[#allocation5_spill] sm:$0xff] %v4599_v16  ;;  %276 = vmatmul.f32.vlgmr.msra.gmra.mxu0 %v4599_v16  ;;  %326 = vmatmul.f32.vlgmr.msra.gmra.mxu2 %v4569_v3  ;;  %v443_v25 = vand.u32 4294901760, %v442_v20  ;;  %v2321_v31 = vsel %vm7150_vm4, %v2310_v17, %v2311_v24  ;;  %v2317_v33 = vsel %vm7144_vm5, %v2313_v18, %v2315_v30  ;;  %s4522_s18 = smov 119   ;;  %s4523_s19 = smov 127  }
  0x18   : > { %v298_v29 = vsub.f32 %v296_v15, %v297_v21  ;;  %372 = vmatpush.msrb.mxu0 %v297_v21  ;;  %416 = vmatpush.msrb.mxu2 %v4589_v10  ;;  %v2323_v35 = vsel %vm7137_vm6, %v2319_v19, %v2321_v31  ;;  %v2327_v36 = vsel %vm7147_vm7, %v2310_v17, %v2311_v24  ;;  %v589_v38 = vand.u32 4294901760, %v588_v26  ;;  %s4524_s20 = smov 55  }
  0x19   : > { %v444_v32 = vsub.f32 %v442_v20, %v443_v25  ;;  %v2324_v39 = vrot.slane %v2323_v35, 1  ;;  %v2329_v40 = vsel %vm7130_vm8, %v2325_v22, %v2327_v36  ;;  %v2333_v43 = vsel %vm7127_vm9, %v2310_v17, %v2311_v24  ;;  %2345 = vst.msk [vmem:[%s4625_s26] ss:$2 sm:$0xf] %vm4628_vm10, %v2317_v33  ;;  %4443 = vset.pattern.permute.xlu0 %v4484_v53 }
  0x1a   : > { %469 = vmatpush.msra.mxu0 %v442_v20  ;;  %518 = vmatpush.msra.mxu2 %v443_v25  ;;  %v299_v34 = vand.u32 4294901760, %v298_v29  ;;  %v2330_v41 = vrot.slane %v2329_v40, 2  ;;  %v735_v44 = vand.u32 4294901760, %v4611_v28  ;;  %v2335_v45 = vsel %vm7124_vm11, %v2331_v23, %v2333_v43 }
  0x1b   : > { %v445_v37 = vand.u32 4294901760, %v444_v32  ;;  %4361 = vst.msk [vmem:[%s4625_s26 + $0x8] ss:$2 sm:$0xf] %vm4628_vm10, %v2324_v39  ;;  %v590_v46 = vsub.f32 %v588_v26, %v589_v38  ;;  %v2336_v47 = vrot.slane %v2335_v45, 3  ;;  %1311 = vperm.xlu0 %4443, %v4664_v51   ;;  %v4490_v19 = vmov 1  }
  0x1c   : > { %300 = vmatpush.msra.mxu1 %v299_v34  ;;  %4362 = vst.msk [vmem:[%s4625_s26 + $0x10] ss:$2 sm:$0xf] %vm4628_vm10, %v2330_v41  ;;  %v736_v48 = vsub.f32 %v4611_v28, %v735_v44  ;;  %4437 = vset.pattern.permute.xlu2 %v4490_v19  ;;  %v4505_v19 = vmov 24  }
  0x1d   : > { %302 = vmatmul.f32.vlgmr.msra.gmra.mxu1 %v4564_v2  ;;  %446 = vmatpush.msrb.mxu3 %v445_v37  ;;  %4363 = vst.msk [vmem:[%s4625_s26 + $0x18] ss:$2 sm:$0xf] %vm4628_vm10, %v2336_v47  ;;  %v591_v49 = vand.u32 4294901760, %v590_v46 }
  0x1e   : > { %448 = vmatmul.f32.vlgmr.msrb.gmra.mxu3 %v4564_v2  ;;  %394 = vmatpush.msrb.mxu1 %v4585_v8  ;;  %v737_v50 = vand.u32 4294901760, %v736_v48  ;;  %v4491_v48 = vmov 4  }
  0x1f   : > { %374 = vmatmul.f32.vlgmr.msrb.gmra.mxu0 %v4564_v2  ;;  %422 = vmatmul.f32.vlgmr.msrb.gmra.mxu2 %v4599_v16 }
  0x20   : > { %540 = vmatpush.msra.mxu3 %v4589_v10  ;;  %492 = vmatpush.msra.mxu1 %v4589_v10 }
  0x21   : > { %562 = vmatpush.msrb.mxu0 %v4592_v13  ;;  %615 = vmatpush.msrb.mxu2 %v588_v26 }
  0x22   : > { %638 = vmatpush.msrb.mxu3 %v4592_v13  ;;  %936 = vperm.xlu2 %4437, %v4664_v51  }
  0x23   : > { %4444 = vset.pattern.permute.xlu0 %v4485_v54 }
  0x24   : > { %973 = vperm.xlu0 %4444, %v4664_v51  }
  0x25   : > { %396 = vmatmul.f32.vlgmr.msrb.gmra.mxu1 %v4564_v2 }
  0x26   : > { %542 = vmatmul.f32.vlgmr.msra.gmra.mxu3 %v4564_v2  ;;  %592 = vmatpush.msrb.mxu1 %v591_v49 }
  0x27   : > { %472 = vmatmul.f32.vlgmr.msra.gmra.mxu0 %v4569_v3  ;;  %520 = vmatmul.f32.vlgmr.msra.gmra.mxu2 %v4564_v2 }
  0x28   : > { %664 = vmatpush.msra.mxu0 %v589_v38  ;;  %708 = vmatpush.msra.mxu2 %v4594_v14 }
  0x29   : > { %738 = vmatpush.msra.mxu3 %v737_v50 }
  0x2a   : > { %4439 = vset.pattern.permute.xlu2 %v4491_v48 }
  0x2b   : > { %1039 = vperm.xlu2 %4439, %v4664_v51  }
  0x2c   : > { %4447 = vset.pattern.permute.xlu0 %v4486_v55 }
  0x2d   : > { %496 = vmatmul.f32.vlgmr.msra.gmra.mxu1 %v4580_v4  ;;  %1130 = vperm.xlu0 %4447, %v4664_v51  }
  0x2e   : > { %642 = vmatmul.f32.vlgmr.msrb.gmra.mxu3 %v4580_v4  ;;  %686 = vmatpush.msra.mxu1 %v4592_v13 }
  0x2f   : > { %568 = vmatmul.f32.vlgmr.msrb.gmra.mxu0 %v4599_v16  ;;  %618 = vmatmul.f32.vlgmr.msrb.gmra.mxu2 %v4569_v3 }
  0x30   : > { %761 = vmatpush.msrb.mxu0 %v4611_v28  ;;  %810 = vmatpush.msrb.mxu2 %v735_v44 }
  0x31   : > { %832 = vmatpush.msrb.mxu3 %v4594_v14 }
  0x35   : > { %594 = vmatmul.f32.vlgmr.msrb.gmra.mxu1 %v4564_v2  ;;  %4448 = vset.pattern.permute.xlu0 %v4487_v56 }
  0x36   : > { %740 = vmatmul.f32.vlgmr.msra.gmra.mxu3 %v4564_v2  ;;  %784 = vmatpush.msrb.mxu1 %v4594_v14 }
  0x37   : > { %666 = vmatmul.f32.vlgmr.msra.gmra.mxu0 %v4564_v2  ;;  %714 = vmatmul.f32.vlgmr.msra.gmra.mxu2 %v4599_v16 }
  0x38   : > { %1262 = vperm.xlu0 %4448, %v4664_v51  }
  0x3d   : > { %688 = vmatmul.f32.vlgmr.msra.gmra.mxu1 %v4564_v2 }
  0x3e   : > { %834 = vmatmul.f32.vlgmr.msrb.gmra.mxu3 %v4564_v2 }
  0x3f   : > { %764 = vmatmul.f32.vlgmr.msrb.gmra.mxu0 %v4569_v3  ;;  %812 = vmatmul.f32.vlgmr.msrb.gmra.mxu2 %v4564_v2  ;;  %v7408_v3 = vmov 0 }
  0x40   : > { %4452 = vset.pattern.permute.xlu0 %v4488_v57 }
  0x41   : > { %1463 = vperm.xlu0 %4452, %v4664_v51  }
  0x45   : > { %788 = vmatmul.f32.vlgmr.msrb.gmra.mxu1 %v4580_v4 }
  0x49   : > { %4457 = vset.pattern.permute.xlu0 %v4489_v58  ;;  %v4492_v58 = vmov 10  }
  0x4a   : > { %1419 = vperm.xlu0 %4457, %v4664_v51   ;;  %4441 = vset.pattern.permute.xlu2 %v4492_v58 }
  0x4b   : > { %1233 = vperm.xlu2 %4441, %v4664_v51  }
  0x94   : > { %v277_v59 = vpop.f32.mrf.mxu0 }
  0x98   : > { %v351_v60 = vpop.f32.mrf.mxu3 }
  0x9a   : > { %v303_v61 = vpop.f32.mrf.mxu1  ;;  %v327_v62 = vpop.f32.mrf.mxu2 }
  0x9b   : > { %v304_v14 = vadd.f32 %v303_v61, %v277_v59  ;;  %v4493_v59 = vmov 0   ;;  %v4495_v61 = vmov 9  }
  0x9c   : > { %v375_v63 = vpop.f32.mrf.mxu0  ;;  %4436 = vset.pattern.permute.xlu1 %v4493_v59 }
  0x9d   : > { %v328_v20 = vadd.f32 %v327_v62, %v304_v14  ;;  %915 = vperm.xlu1 %4436, %v4664_v51   ;;  %v4496_v62 = vmov 5  }
  0x9f   : > { %v352_v28 = vadd.f32 %v351_v60, %v328_v20  ;;  %v4494_v60 = vmov 12   ;;  %v4506_v20 = vmov 20  }
  0xa0   : > { %4442 = vset.pattern.permute.xlu2 %v4494_v60 }
  0xa1   : > { %v449_v0 = vpop.f32.mrf.mxu3  ;;  %v376_v33 = vadd.f32 %v375_v63, %v352_v28  ;;  %1303 = vperm.xlu2 %4442, %v4664_v51   ;;  %v4497_v63 = vmov 6  }
  0xa2   : > { %v397_v1 = vpop.f32.mrf.mxu1  ;;  %v423_v5 = vpop.f32.mrf.mxu2 }
  0xa3   : > { %v450_v15 = vadd.f32 %v449_v0, %v423_v5  ;;  %v4694_v39 = vadd.f32 %v397_v1, %v376_v33  ;;  %v4498_v0 = vmov 15   ;;  %v4720_v1 = vpop.permute.xlu0 %1018 }
  0xa4   : > { %v473_v6 = vpop.f32.mrf.mxu0  ;;  %7366 = vst [vmem:[#allocation7_spill] sm:$0xff] %v4720_v1 }
  0xa5   : > { %v474_v21 = vadd.f32 %v473_v6, %v450_v15  ;;  %v843_v52 = vmul.f32 %v4694_v39, %v4694_v39  ;;  %4440 = vset.pattern.permute.xlu1 %v4495_v61  ;;  %v4503_v15 = vmov 22  }
  0xa6   : > { %1212 = vperm.xlu1 %4440, %v4664_v51  }
  0xa9   : > { %v543_v7 = vpop.f32.mrf.mxu3  ;;  %4445 = vset.pattern.permute.xlu2 %v4496_v62 }
  0xaa   : > { %v497_v8 = vpop.f32.mrf.mxu1  ;;  %v521_v9 = vpop.f32.mrf.mxu2  ;;  %1068 = vperm.xlu2 %4445, %v4664_v51  }
  0xab   : > { %v498_v23 = vadd.f32 %v497_v8, %v474_v21  ;;  %v4722_v5 = vpop.permute.xlu0 %1311 }
  0xac   : > { %v569_v10 = vpop.f32.mrf.mxu0  ;;  %7367 = vst [vmem:[#allocation8_spill] sm:$0xff] %v4722_v5 }
  0xad   : > { %v522_v30 = vadd.f32 %v521_v9, %v498_v23  ;;  %v4499_v9 = vmov 18  }
  0xaf   : > { %v4692_v35 = vadd.f32 %v543_v7, %v522_v30 }
  0xb1   : > { %v643_v11 = vpop.f32.mrf.mxu3  ;;  %v838_v44 = vadd.f32 %v4692_v35, %v4694_v39  ;;  %v844_v49 = vmul.f32 %v4692_v35, %v4692_v35 }
  0xb2   : > { %v595_v12 = vpop.f32.mrf.mxu1  ;;  %v619_v13 = vpop.f32.mrf.mxu2  ;;  %4446 = vset.pattern.permute.xlu2 %v4497_v63 }
  0xb3   : > { %v596_v17 = vadd.f32 %v595_v12, %v569_v10  ;;  %v847_v55 = vadd.f32 %v844_v49, %v843_v52  ;;  %1109 = vperm.xlu2 %4446, %v4664_v51   ;;  %v4724_v6 = vpop.permute.xlu0 %973  ;;  %v4500_v10 = vmov 16   ;;  %v4501_v12 = vmov 14  }
  0xb4   : > { %v667_v18 = vpop.f32.mrf.mxu0  ;;  %7368 = vst [vmem:[#allocation9_spill] sm:$0xff] %v4724_v6  ;;  %4450 = vset.pattern.permute.xlu1 %v4500_v10 }
  0xb5   : > { %v620_v22 = vadd.f32 %v619_v13, %v596_v17  ;;  %1390 = vperm.xlu1 %4450, %v4664_v51   ;;  %v4502_v13 = vmov 21   ;;  %v4504_v17 = vmov 8  }
  0xb7   : > { %v644_v29 = vadd.f32 %v643_v11, %v620_v22 }
  0xb9   : > { %v741_v24 = vpop.f32.mrf.mxu3  ;;  %v668_v34 = vadd.f32 %v667_v18, %v644_v29  ;;  %v4742_v29 = vpop.permute.xlu2 %936 }
  0xba   : > { %v689_v25 = vpop.f32.mrf.mxu1  ;;  %v715_v26 = vpop.f32.mrf.mxu2  ;;  %7373 = vst [vmem:[#allocation14_spill] sm:$0xff] %v4742_v29 }
  0xbb   : > { %v742_v31 = vadd.f32 %v741_v24, %v715_v26  ;;  %v4696_v40 = vadd.f32 %v689_v25, %v668_v34  ;;  %4449 = vset.pattern.permute.xlu2 %v4498_v0  ;;  %v4726_v7 = vpop.permute.xlu0 %1130 }
  0xbc   : > { %v765_v32 = vpop.f32.mrf.mxu0  ;;  %1369 = vperm.xlu2 %4449, %v4664_v51   ;;  %7369 = vst [vmem:[#allocation10_spill] sm:$0xff] %v4726_v7 }
  0xbd   : > { %v766_v36 = vadd.f32 %v765_v32, %v742_v31  ;;  %v839_v47 = vadd.f32 %v838_v44, %v4696_v40  ;;  %v845_v53 = vmul.f32 %v4696_v40, %v4696_v40  ;;  %4454 = vset.pattern.permute.xlu1 %v4502_v13 }
  0xbe   : > { %1511 = vperm.xlu1 %4454, %v4664_v51  }
  0xbf   : > { %v848_v56 = vadd.f32 %v847_v55, %v845_v53 }
  0xc1   : > { %v835_v43 = vpop.f32.mrf.mxu3 }
  0xc2   : > { %v789_v37 = vpop.f32.mrf.mxu1  ;;  %v813_v38 = vpop.f32.mrf.mxu2 }
  0xc3   : > { %v790_v41 = vadd.f32 %v789_v37, %v766_v36  ;;  %v4728_v8 = vpop.permute.xlu0 %1262  ;;  %v4744_v37 = vpop.permute.xlu2 %1039 }
  0xc4   : > { %7370 = vst [vmem:[#allocation11_spill] sm:$0xff] %v4728_v8  ;;  %4451 = vset.pattern.permute.xlu2 %v4499_v9 }
  0xc5   : > { %v814_v45 = vadd.f32 %v813_v38, %v790_v41  ;;  %1455 = vperm.xlu2 %4451, %v4664_v51   ;;  %7374 = vst [vmem:[#allocation15_spill] sm:$0xff] %v4744_v37 }
  0xc6   : > { %4456 = vset.pattern.permute.xlu1 %v4504_v17 }
  0xc7   : > { %v4700_v46 = vadd.f32 %v835_v43, %v814_v45  ;;  %1159 = vperm.xlu1 %4456, %v4664_v51  }
  0xc9   : > { %v840_v50 = vadd.f32 %v839_v47, %v4700_v46  ;;  %v846_v54 = vmul.f32 %v4700_v46, %v4700_v46 }
  0xcb   : > { %841 = vadd.xlane.f32.xlu0 %v840_v50  ;;  %v849_v57 = vadd.f32 %v848_v56, %v846_v54  ;;  %v4732_v11 = vpop.permute.xlu0 %1463 }
  0xcc   : > { %7371 = vst [vmem:[#allocation12_spill] sm:$0xff] %v4732_v11 }
  0xcd   : > { %4453 = vset.pattern.permute.xlu2 %v4501_v12 }
  0xce   : > { %1340 = vperm.xlu2 %4453, %v4664_v51  }
  0xcf   : > { %4458 = vset.pattern.permute.xlu1 %v4506_v20 }
  0xd0   : > { %1479 = vperm.xlu1 %4458, %v4664_v51  }
  0xd3   : > { %850 = vadd.xlane.f32.xlu0 %v849_v57  ;;  %v4736_v14 = vpop.permute.xlu0 %1419 }
  0xd4   : > { %7372 = vst [vmem:[#allocation13_spill] sm:$0xff] %v4736_v14 }
  0xd6   : > { %4455 = vset.pattern.permute.xlu2 %v4503_v15 }
  0xd7   : > { %1519 = vperm.xlu2 %4455, %v4664_v51  }
  0xdf   : > { %4459 = vset.pattern.permute.xlu2 %v4505_v19  ;;  %v4520_v19 = vmov 26  }
  0xe0   : > { %1563 = vperm.xlu2 %4459, %v4664_v51   ;;  %4462 = vset.pattern.permute.xlu0 %v4520_v19 }
 0x10f   : > { %v4812_v62 = vpop.permute.xlu1 %915 }
 0x110   : > { %7385 = vst [vmem:[#allocation26_spill] sm:$0xff] %v4812_v62 }
 0x118   : > { %v4824_v0 = vpop.permute.xlu1 %1212 }
 0x119   : > { %7387 = vst [vmem:[#allocation28_spill] sm:$0xff] %v4824_v0 }
 0x127   : > { %v4838_v10 = vpop.permute.xlu1 %1390 }
 0x128   : > { %7389 = vst [vmem:[#allocation30_spill] sm:$0xff] %v4838_v10 }
 0x130   : > { %v4848_v13 = vpop.permute.xlu1 %1511 }
 0x131   : > { %7391 = vst [vmem:[#allocation32_spill] sm:$0xff] %v4848_v13 }
 0x139   : > { %v4858_v17 = vpop.permute.xlu1 %1159 }
 0x13a   : > { %7393 = vst [vmem:[#allocation34_spill] sm:$0xff] %v4858_v17 }
 0x13e   : > { %v842_v18 = vpop.xlane.xlu0 %841 }
 0x13f   : > { %v852_v21 = vmul.f32 0.001953125, %v842_v18 }
 0x141   : > { %v854_v23 = vmul.f32 %v852_v21, %v852_v21  ;;  %v857_v38 = vsub.f32 %v4694_v39, %v852_v21  ;;  %v860_v41 = vsub.f32 %v4700_v46, %v852_v21  ;;  %v858_v47 = vsub.f32 %v4692_v35, %v852_v21  ;;  %v4759_v35 = vpop.permute.xlu2 %1233 }
 0x142   : > { %7377 = vst [vmem:[#allocation18_spill] sm:$0xff] %v4759_v35  ;;  %v859_v56 = vsub.f32 %v4696_v40, %v852_v21  ;;  %v4870_v20 = vpop.permute.xlu1 %1479 }
 0x143   : > { %7394 = vst [vmem:[#allocation35_spill] sm:$0xff] %v4870_v20 }
 0x146   : > { %v851_v22 = vpop.xlane.xlu0 %850 }
 0x147   : > { %v853_v24 = vmul.f32 0.001953125, %v851_v22 }
 0x149   : > { %v855_v25 = vsub.f32 %v853_v24, %v854_v23  ;;  %v4769_v54 = vpop.permute.xlu2 %1303 }
 0x14a   : > { %7379 = vst [vmem:[#allocation20_spill] sm:$0xff] %v4769_v54 }
 0x14b   : > { %v856_v26 = vmax.f32 %v855_v25, 0.0 }
 0x14d   : > { %v861_v28 = vadd.f32 1e-05, %v856_v26 }
 0x14f   : > { %4463 = vrsqrt.f32 %v861_v28  ;;  %vm868_vm13 = vweird.f32 %v861_v28 }
 0x151   : > { %v4777_v55 = vpop.permute.xlu2 %1068 }
 0x152   : > { %7380 = vst [vmem:[#allocation21_spill] sm:$0xff] %v4777_v55 }
 0x155   : > { %v4464_v30 = vpop.eup %4463 }
 0x156   : > { %v863_v31 = vmul.f32 %v4464_v30, %v861_v28  ;;  %vm869_vm12 = vweird.f32 %v4464_v30 }
 0x157   : > { %vm870_vm14 = vmor %vm868_vm13, %vm869_vm12 }
 0x158   : > { %v864_v32 = vmul.f32 %v4464_v30, %v863_v31 }
 0x159   : > { %v4786_v59 = vpop.permute.xlu2 %1109 }
 0x15a   : > { %v865_v33 = vmul.f32 0.5, %v864_v32  ;;  %7381 = vst [vmem:[#allocation22_spill] sm:$0xff] %v4786_v59 }
 0x15c   : > { %v866_v34 = vsub.f32 1.5, %v865_v33  ;;  %v4920_v33 = vand.u32 127, %v209_v27 }
 0x15e   : > { %v867_v36 = vmul.f32 %v4464_v30, %v866_v34  ;;  %vm7202_vm13 = vcmp.lt.s32.totalorder %v4920_v33, 73  ;;  %vm7166_vm6 = vcmp.lt.s32.totalorder %v4920_v33, 9  ;;  %vm7195_vm7 = vcmp.lt.s32.totalorder %v4920_v33, 8 }
 0x15f   : > { %vm7194_vm4 = vcmp.lt.s32.totalorder %v4920_v33, 7  ;;  %vm7167_vm3 = vcmp.lt.s32.totalorder %v4920_v33, 65  ;;  %vm7168_vm1 = vcmp.lt.s32.totalorder %v4920_v33, 64  ;;  %vm7175_vm0 = vcmp.lt.s32.totalorder %v4920_v33, 63 }
 0x160   : > { %v871_v43 = vsel %vm870_vm14, %v4464_v30, %v867_v36  ;;  %vm7181_vm14 = vcmp.lt.s32.totalorder %v4920_v33, 72  ;;  %vm7534_vm10 = vcmp.lt.s32.totalorder %v4920_v33, 55 }
 0x161   : > { %v872_v44 = vmul.f32 %v871_v43, %v857_v38  ;;  %v875_v45 = vmul.f32 %v871_v43, %v860_v41  ;;  %v873_v50 = vmul.f32 %v871_v43, %v858_v47  ;;  %v874_v57 = vmul.f32 %v871_v43, %v859_v56  ;;  %v4802_v40 = vpop.permute.xlu2 %1369 }
 0x162   : > { %7383 = vst [vmem:[#allocation24_spill] sm:$0xff] %v4802_v40  ;;  %v4929_v41 = vadd.s32 384, %v4920_v33  ;;  %v214_v43 = vand.u32 7, %v4920_v33 }
 0x163   : > { %vm876_vm15 = vcmp.ge.f32.partialorder %v872_v44, 0.0  ;;  %vm879_vm11 = vcmp.ge.f32.partialorder %v875_v45, 0.0  ;;  %v880_v48 = vmul.f32 0.01, %v872_v44  ;;  %v883_v49 = vmul.f32 0.01, %v875_v45 }
 0x164   : > { %v881_v39 = vmul.f32 0.01, %v873_v50  ;;  %vm877_vm12 = vcmp.ge.f32.partialorder %v873_v50, 0.0  ;;  %v882_v58 = vmul.f32 0.01, %v874_v57  ;;  %7398 = vst [vmem:[#allocation39_spill] sm:$0xff] %v4929_v41 }
 0x165   : > { %v4749_v52 = vsel %vm876_vm15, %v872_v44, %v880_v48  ;;  %v4751_v53 = vsel %vm879_vm11, %v875_v45, %v883_v49  ;;  %vm878_vm11 = vcmp.ge.f32.partialorder %v874_v57, 0.0  ;;  %v217_v27 = vand.u32 7, %v4929_v41 }
 0x166   : > { %7375 = vst [vmem:[#allocation16_spill] sm:$0xff] %v4749_v52  ;;  %888 = vrot.lane.b32.xlu1 %v4749_v52, %s4507_s29  ;;  %1006 = vrot.lane.b32.xlu0 %v4751_v53, %s4508_s30  ;;  %v4761_v46 = vsel %vm877_vm12, %v873_v50, %v881_v39  ;;  %v4788_v60 = vsel %vm878_vm11, %v874_v57, %v882_v58  ;;  %vm4945_vm15 = vcmp.ge.s32.totalorder %v214_v43, 1  ;;  %v4964_v57 = vadd.s32 128, %v4920_v33 }
 0x167   : > { %7376 = vst [vmem:[#allocation17_spill] sm:$0xff] %v4751_v53  ;;  %894 = vrot.lane.b32.xlu2 %v4751_v53, %s4507_s29  ;;  %vm4953_vm12 = vcmp.ge.s32.totalorder %v217_v27, 1  ;;  %vm7174_vm11 = vcmp.lt.s32.totalorder %v4920_v33, 71  ;;  %vm4975_vm9 = vcmp.lt.s32.totalorder %v214_v43, 7  ;;  %vm4979_vm8 = vcmp.lt.s32.totalorder %v217_v27, 7 }
 0x168   : > { %7378 = vst [vmem:[#allocation19_spill] sm:$0xff] %v4761_v46  ;;  %v7406_v42 = vsel %vm4975_vm9, 4294967295, %v7405_v42  ;;  %v7409_v3 = vsel %vm4979_vm8, 4294967295, %v7408_v3 }
 0x169   : > { %7382 = vst [vmem:[#allocation23_spill] sm:$0xff] %v4788_v60  ;;  %v4810_v61 = vpop.permute.xlu2 %1455 }
 0x16a   : > { %7384 = vst [vmem:[#allocation25_spill] sm:$0xff] %v4810_v61 }
 0x16b   : > { %7404 = vst [vmem:[#allocation41_spill] sm:$0xff] %v4964_v57 }
 0x16c   : > { %7407 = vst [vmem:[#allocation42_spill] sm:$0xff] %v7406_v42 }
 0x16d   : > { %7410 = vst [vmem:[#allocation43_spill] sm:$0xff] %v7409_v3 }
 0x16e   : > { %890 = vrot.lane.b32.xlu1 %v4761_v46, %s4507_s29  ;;  %1002 = vrot.lane.b32.xlu0 %v4761_v46, %s4508_s30 }
 0x16f   : > { %1000 = vrot.lane.b32.xlu2 %v4749_v52, %s4508_s30 }
 0x171   : > { %v4820_v63 = vpop.permute.xlu2 %1340 }
 0x172   : > { %7386 = vst [vmem:[#allocation27_spill] sm:$0xff] %v4820_v63 }
 0x176   : > { %1194 = vrot.lane.b32.xlu1 %v4749_v52, %s4509_s5  ;;  %1219 = vrot.lane.b32.xlu0 %v4749_v52, %s4510_s6 }
 0x177   : > { %1196 = vrot.lane.b32.xlu2 %v4761_v46, %s4509_s5 }
 0x179   : > { %v4830_v9 = vpop.permute.xlu2 %1519 }
 0x17a   : > { %7388 = vst [vmem:[#allocation29_spill] sm:$0xff] %v4830_v9 }
 0x17e   : > { %1200 = vrot.lane.b32.xlu1 %v4751_v53, %s4509_s5  ;;  %1285 = vrot.lane.b32.xlu0 %v4749_v52, %s4511_s7 }
 0x17f   : > { %922 = vrot.lane.b32.xlu2 %v4749_v52, %s4512_s8 }
 0x181   : > { %v4846_v12 = vpop.permute.xlu2 %1563 }
 0x182   : > { %7390 = vst [vmem:[#allocation31_spill] sm:$0xff] %v4846_v12 }
 0x186   : > { %924 = vrot.lane.b32.xlu1 %v4761_v46, %s4512_s8  ;;  %892 = vrot.lane.b32.xlu0 %v4788_v60, %s4507_s29 }
 0x187   : > { %928 = vrot.lane.b32.xlu2 %v4751_v53, %s4512_s8 }
 0x18e   : > { %1025 = vrot.lane.b32.xlu1 %v4749_v52, %s4513_s9  ;;  %947 = vrot.lane.b32.xlu0 %v4749_v52, %s4514_s10 }
 0x18f   : > { %1031 = vrot.lane.b32.xlu2 %v4751_v53, %s4513_s9 }
 0x196   : > { %1221 = vrot.lane.b32.xlu1 %v4761_v46, %s4510_s6  ;;  %1091 = vrot.lane.b32.xlu0 %v4749_v52, %s4515_s11 }
 0x197   : > { %1225 = vrot.lane.b32.xlu2 %v4751_v53, %s4510_s6 }
 0x19e   : > { %1287 = vrot.lane.b32.xlu1 %v4761_v46, %s4511_s7  ;;  %1198 = vrot.lane.b32.xlu0 %v4788_v60, %s4509_s5 }
 0x19f   : > { %1291 = vrot.lane.b32.xlu2 %v4751_v53, %s4511_s7 }
 0x1a6   : > { %949 = vrot.lane.b32.xlu1 %v4761_v46, %s4514_s10  ;;  %1244 = vrot.lane.b32.xlu0 %v4749_v52, %s4516_s12 }
 0x1a7   : > { %953 = vrot.lane.b32.xlu2 %v4751_v53, %s4514_s10 }
 0x1ae   : > { %1027 = vrot.lane.b32.xlu1 %v4761_v46, %s4513_s9  ;;  %1351 = vrot.lane.b32.xlu0 %v4749_v52, %s4517_s13 }
 0x1af   : > { %1056 = vrot.lane.b32.xlu2 %v4751_v53, %s4518_s14 }
 0x1b6   : > { %1050 = vrot.lane.b32.xlu1 %v4749_v52, %s4518_s14  ;;  %926 = vrot.lane.b32.xlu0 %v4788_v60, %s4512_s8 }
 0x1b7   : > { %1097 = vrot.lane.b32.xlu2 %v4751_v53, %s4515_s11 }
 0x1be   : > { %1093 = vrot.lane.b32.xlu1 %v4761_v46, %s4515_s11  ;;  %1116 = vrot.lane.b32.xlu0 %v4749_v52, %s4519_s16 }
 0x1bf   : > { %1250 = vrot.lane.b32.xlu2 %v4751_v53, %s4516_s12 }
 0x1c1   : > { %v4856_v15 = vpop.permute.xlu2 %894 }
 0x1c2   : > { %7392 = vst [vmem:[#allocation33_spill] sm:$0xff] %v4856_v15 }
 0x1c6   : > { %1246 = vrot.lane.b32.xlu1 %v4761_v46, %s4516_s12  ;;  %1223 = vrot.lane.b32.xlu0 %v4788_v60, %s4510_s6 }
 0x1c7   : > { %1355 = vrot.lane.b32.xlu2 %v4788_v60, %s4517_s13 }
 0x1c9   : > { %v4866_v18 = vpop.permute.xlu2 %1000 }
 0x1ce   : > { %1353 = vrot.lane.b32.xlu1 %v4761_v46, %s4517_s13  ;;  %1378 = vrot.lane.b32.xlu0 %v4761_v46, %s4521_s17 }
 0x1cf   : > { %1052 = vrot.lane.b32.xlu2 %v4761_v46, %s4518_s14 }
 0x1d1   : > { %v4876_v21 = vpop.permute.xlu2 %1196 }
 0x1d6   : > { %1004 = vrot.lane.b32.xlu1 %v4788_v60, %s4508_s30  ;;  %1403 = vrot.lane.b32.xlu0 %v4761_v46, %s4522_s18 }
 0x1d7   : > { %1122 = vrot.lane.b32.xlu2 %v4751_v53, %s4519_s16 }
 0x1d8   : > { %v4884_v22 = vpop.permute.xlu1 %888  ;;  %v4886_v23 = vpop.permute.xlu0 %1006 }
 0x1d9   : > { %v4888_v24 = vpop.permute.xlu2 %922  ;;  %v900_v49 = vsel %vm7202_vm13, %v4856_v15, %v4884_v22 }
 0x1da   : > { %v909_v56 = vsel %vm4945_vm15, %v900_v49, 0.0  ;;  %v1453_v58 = vsel %vm4953_vm12, %v900_v49, 0.0  ;;  %v4525_v49 = vmov 23  }
 0x1db   : > { %4461 = vset.pattern.permute.xlu2 %v4525_v49  ;;  %v918_v16 = vmul.f32 %v4812_v62, %v909_v56  ;;  %v1461_v43 = vmul.f32 %v4810_v61, %v1453_v58 }
 0x1de   : > { %1118 = vrot.lane.b32.xlu1 %v4761_v46, %s4519_s16  ;;  %1382 = vrot.lane.b32.xlu0 %v4751_v53, %s4521_s17 }
 0x1df   : > { %1324 = vrot.lane.b32.xlu2 %v4761_v46, %s4523_s19 }
 0x1e0   : > { %v4896_v25 = vpop.permute.xlu1 %890  ;;  %v4898_v26 = vpop.permute.xlu0 %1002 }
 0x1e1   : > { %7395 = vst [vmem:[#allocation36_spill] sm:$0xff] %v4898_v26  ;;  %v4900_v28 = vpop.permute.xlu2 %928 }
 0x1e2   : > { %7396 = vst [vmem:[#allocation37_spill] sm:$0xff] %v4900_v28  ;;  %v934_v39 = vsel %vm7181_vm14, %v4900_v28, %v4888_v24 }
 0x1e3   : > { %v939_v19 = vmul.f32 %v4742_v29, %v934_v39  ;;  %v1469_v2 = vmul.f32 %v4732_v11, %v934_v39  ;;  %v215_v39 = vand.u32 7, %v4964_v57 }
 0x1e5   : > { %v943_v15 = vadd.f32 %v939_v19, %v918_v16  ;;  %v1473_v49 = vadd.f32 %v1469_v2, %v1461_v43  ;;  %vm5004_vm5 = vcmp.ge.s32.totalorder %v215_v39, 1  ;;  %vm5078_vm2 = vcmp.lt.s32.totalorder %v215_v39, 7 }
 0x1e6   : > { %1289 = vrot.lane.b32.xlu1 %v4788_v60, %s4511_s7  ;;  %1145 = vrot.lane.b32.xlu0 %v4788_v60, %s4524_s20 }
 0x1e7   : > { %1376 = vrot.lane.b32.xlu2 %v4749_v52, %s4521_s17 }
 0x1e8   : > { %v4908_v30 = vpop.permute.xlu1 %1194  ;;  %v4910_v31 = vpop.permute.xlu0 %1219 }
 0x1e9   : > { %v4912_v32 = vpop.permute.xlu2 %1031  ;;  %v1205_v13 = vsel %vm7166_vm6, %v4908_v30, %v4876_v21 }
 0x1ea   : > { %7397 = vst [vmem:[#allocation38_spill] sm:$0xff] %v4912_v32  ;;  %v1208_v2 = vsel %vm5004_vm5, %v1205_v13, 0.0 }
 0x1ee   : > { %1322 = vrot.lane.b32.xlu1 %v4749_v52, %s4523_s19  ;;  %1587 = vperm.xlu0 %4462, %v4664_v51  }
 0x1ef   : > { %951 = vrot.lane.b32.xlu2 %v4788_v60, %s4514_s10 }
 0x1f0   : > { %v4922_v34 = vpop.permute.xlu1 %1200  ;;  %v4924_v36 = vpop.permute.xlu0 %1285 }
 0x1f1   : > { %v4926_v38 = vpop.permute.xlu2 %1225 }
 0x1f6   : > { %1326 = vrot.lane.b32.xlu1 %v4788_v60, %s4523_s19 }
 0x1f7   : > { %1143 = vrot.lane.b32.xlu2 %v4761_v46, %s4524_s20 }
 0x1f8   : > { %v4938_v44 = vpop.permute.xlu1 %924  ;;  %v4941_v45 = vpop.permute.xlu0 %892 }
 0x1f9   : > { %v4943_v47 = vpop.permute.xlu2 %1291 }
 0x1fa   : > { %7399 = vst [vmem:[#allocation40_spill] sm:$0xff] %v4943_v47 }
 0x1fe   : > { %1380 = vrot.lane.b32.xlu1 %v4788_v60, %s4521_s17 }
 0x1ff   : > { %1248 = vrot.lane.b32.xlu2 %v4788_v60, %s4516_s12 }
 0x200   : > { %v4983_v4 = vpop.permute.xlu1 %1025  ;;  %v948_v12 = vpop.permute.xlu0 %947 }
 0x201   : > { %v4987_v28 = vpop.permute.xlu2 %953 }
 0x202   : > { %7411 = vst [vmem:[#allocation44_spill] sm:$0xff] %v4987_v28  ;;  %v959_v27 = vsel %vm7174_vm11, %v4987_v28, %v948_v12 }
 0x203   : > { %v968_v17 = vsel %vm4975_vm9, %v959_v27, 0.0  ;;  %v1477_v56 = vsel %vm4979_vm8, %v959_v27, 0.0 }
 0x204   : > { %v976_v58 = vmul.f32 %v4724_v6, %v968_v17  ;;  %v1485_v9 = vmul.f32 %v4870_v20, %v1477_v56 }
 0x206   : > { %v5008_v16 = vadd.f32 %v976_v58, %v943_v15  ;;  %v5010_v19 = vadd.f32 %v1485_v9, %v1473_v49  ;;  %1029 = vrot.lane.b32.xlu1 %v4788_v60, %s4513_s9  ;;  %v1216_v15 = vmul.f32 %v4824_v0, %v1208_v2  ;;  %v899_v2 = vsel %vm7202_vm13, %v4884_v22, %v4896_v25 }
 0x207   : > { %1401 = vrot.lane.b32.xlu2 %v4749_v52, %s4522_s18  ;;  %v1231_v22 = vsel %vm7195_vm7, %v4926_v38, %v4910_v31 }
 0x208   : > { %7414 = vst [vmem:[#allocation45_spill] sm:$0xff] %v5010_v19  ;;  %v5019_v17 = vpop.permute.xlu1 %1221  ;;  %v5021_v43 = vpop.permute.xlu0 %1091  ;;  %v910_v19 = vsel %vm5004_vm5, %v899_v2, 0.0 }
 0x209   : > { %v5023_v27 = vpop.permute.xlu2 %1056  ;;  %v1230_v9 = vsel %vm7195_vm7, %v4910_v31, %v5019_v17 }
 0x20a   : > { %7415 = vst [vmem:[#allocation46_spill] sm:$0xff] %v5023_v27  ;;  %v1237_v13 = vmul.f32 %v4759_v35, %v1230_v9  ;;  %v1206_v9 = vsel %vm7166_vm6, %v4922_v34, %v4908_v30 }
 0x20b   : > { %v1207_v30 = vsel %vm4945_vm15, %v1206_v9, 0.0  ;;  %v919_v9 = vmul.f32 %v4812_v62, %v910_v19 }
 0x20c   : > { %v5031_v56 = vadd.f32 %v1237_v13, %v1216_v15  ;;  %v933_v13 = vsel %vm7181_vm14, %v4888_v24, %v4938_v44  ;;  %v1215_v14 = vmul.f32 %v4824_v0, %v1207_v30  ;;  %vm7203_vm14 = vcmp.lt.s32.totalorder %v4920_v33, 56 }
 0x20d   : > { %v940_v46 = vmul.f32 %v4742_v29, %v933_v13  ;;  %v1466_v24 = vmul.f32 %v4732_v11, %v933_v13 }
 0x20e   : > { %1095 = vrot.lane.b32.xlu1 %v4788_v60, %s4515_s11 }
 0x20f   : > { %1120 = vrot.lane.b32.xlu2 %v4788_v60, %s4519_s16 }
 0x210   : > { %v5037_v49 = vpop.permute.xlu1 %1287  ;;  %v5039_v58 = vpop.permute.xlu0 %1198 }
 0x211   : > { %7416 = vst [vmem:[#allocation47_spill] sm:$0xff] %v5037_v49  ;;  %v5041_v28 = vpop.permute.xlu2 %1097  ;;  %v5055_v15 = vsel %vm7166_vm6, %v4876_v21, %v5039_v58  ;;  %v1450_v21 = vsel %vm4945_vm15, %v899_v2, 0.0  ;;  %v1236_v2 = vmul.f32 %v4759_v35, %v1231_v22  ;;  %vm7187_vm6 = vcmp.ge.s32.totalorder %v4920_v33, 64 }
 0x212   : > { %7417 = vst [vmem:[#allocation48_spill] sm:$0xff] %v5041_v28  ;;  %v1458_v49 = vmul.f32 %v4810_v61, %v1450_v21 }
 0x214   : > { %v1470_v21 = vadd.f32 %v1466_v24, %v1458_v49 }
 0x216   : > { %1141 = vrot.lane.b32.xlu1 %v4749_v52, %s4524_s20  ;;  %v944_v52 = vadd.f32 %v940_v46, %v919_v9  ;;  %v1240_v46 = vadd.f32 %v1236_v2, %v1215_v14  ;;  %v5126_v14 = vsel %vm7167_vm3, %v4886_v23, %v4866_v18  ;;  %v5143_v2 = vsel %vm7167_vm3, %v4866_v18, %v4898_v26 }
 0x217   : > { %1407 = vrot.lane.b32.xlu2 %v4751_v53, %s4522_s18 }
 0x218   : > { %v5085_v63 = vpop.permute.xlu1 %949  ;;  %v5088_v13 = vpop.permute.xlu0 %1244 }
 0x219   : > { %v5090_v5 = vpop.permute.xlu2 %1250  ;;  %v958_v39 = vsel %vm7174_vm11, %v948_v12, %v5085_v63 }
 0x21a   : > { %7420 = vst [vmem:[#allocation49_spill] sm:$0xff] %v5090_v5  ;;  %v1256_v19 = vsel %vm7194_vm4, %v5090_v5, %v5088_v13  ;;  %v969_v22 = vsel %vm5078_vm2, %v958_v39, 0.0  ;;  %v1474_v30 = vsel %vm4975_vm9, %v958_v39, 0.0 }
 0x21b   : > { %v1257_v40 = vsel %vm4975_vm9, %v1256_v19, 0.0  ;;  %v977_v10 = vmul.f32 %v4724_v6, %v969_v22  ;;  %v1482_v12 = vmul.f32 %v4870_v20, %v1474_v30  ;;  %v4526_v22 = vmov 25  }
 0x21c   : > { %v1265_v9 = vmul.f32 %v4728_v8, %v1257_v40  ;;  %v7170_v40 = vand.u32 63, %v4920_v33  ;;  %4460 = vset.pattern.permute.xlu1 %v4526_v22 }
 0x21d   : > { %v981_v54 = vadd.f32 %v977_v10, %v944_v52  ;;  %v5108_v3 = vadd.f32 %v1482_v12, %v1470_v21  ;;  %v1013_v52 = vsel %vm4945_vm15, %v5126_v14, 0.0  ;;  %v5137_v10 = vsel %vm7168_vm1, %v4912_v32, %v4983_v4 }
 0x21e   : > { %v5110_v5 = vadd.f32 %v1265_v9, %v1240_v46  ;;  %1147 = vrot.lane.b32.xlu1 %v4751_v53, %s4524_s20  ;;  %v1021_v30 = vmul.f32 %v4720_v1, %v1013_v52  ;;  %v1042_v18 = vmul.f32 %v4744_v37, %v5137_v10  ;;  %v1014_v12 = vsel %vm5004_vm5, %v5143_v2, 0.0 }
 0x21f   : > { %7421 = vst [vmem:[#allocation50_spill] sm:$0xff] %v5108_v3  ;;  %1535 = vperm.xlu2 %4461, %v4664_v51   ;;  %vm5163_vm3 = vcmp.ge.s32.totalorder %v7170_v40, 8  ;;  %v7424_v46 = vmov 0  ;;  %v1022_v3 = vmul.f32 %v4720_v1, %v1014_v12  ;;  %v5217_v1 = vadd.s32 256, %v4920_v33 }
 0x220   : > { %v5116_v49 = vpop.permute.xlu1 %1027  ;;  %v5118_v24 = vpop.permute.xlu0 %1351  ;;  %v7425_v46 = vsel %vm5163_vm3, 4294967295, %v7424_v46  ;;  %v1046_v32 = vadd.f32 %v1042_v18, %v1021_v30  ;;  %vm5197_vm11 = vmand %vm7187_vm6, %vm5163_vm3  ;;  %v7432_v30 = vand.u32 63, %v4964_v57  ;;  %v7433_v18 = vmov 0 }
 0x221   : > { %7422 = vst [vmem:[#allocation51_spill] sm:$0xff] %v5116_v49  ;;  %v5120_v39 = vpop.permute.xlu2 %1355  ;;  %v5152_v19 = vsel %vm7168_vm1, %v4983_v4, %v5116_v49  ;;  %vm7201_vm1 = vcmp.lt.s32.totalorder %v4920_v33, 57 }
 0x222   : > { %7423 = vst [vmem:[#allocation52_spill] sm:$0xff] %v5118_v24  ;;  %v1043_v49 = vmul.f32 %v4744_v37, %v5152_v19  ;;  %v5205_v12 = vsel %vm7201_vm1, %v5041_v28, %v5021_v43  ;;  %v996_v28 = vsel %vm5197_vm11, %v5008_v16, 0.0 }
 0x223   : > { %7426 = vst [vmem:[#allocation53_spill] sm:$0xff] %v7425_v46 }
 0x224   : > { %7431 = vst [vmem:[#allocation56_spill] sm:$0xff] %v5205_v12 }
 0x225   : > { %7436 = vst [vmem:[#allocation58_spill] sm:$0xff] %v5217_v1 }
 0x226   : > { %1357 = vrot.lane.b32.xlu1 %v4751_v53, %s4517_s13 }
 0x228   : > { %v1051_v21 = vpop.permute.xlu1 %1050  ;;  %v5168_v4 = vpop.permute.xlu0 %926 }
 0x229   : > { %v5170_v9 = vpop.permute.xlu2 %1052  ;;  %v5175_v52 = vsel %vm7175_vm0, %v5023_v27, %v1051_v21 }
 0x22a   : > { %7427 = vst [vmem:[#allocation54_spill] sm:$0xff] %v5170_v9  ;;  %v5183_v40 = vsel %vm7175_vm0, %v1051_v21, %v5170_v9  ;;  %v1063_v26 = vsel %vm4975_vm9, %v5175_v52, 0.0  ;;  %v7428_v21 = vmov 0  ;;  %vm5209_vm0 = vcmp.ge.s32.totalorder %v7432_v30, 8 }
 0x22b   : > { %v1064_v27 = vsel %vm5078_vm2, %v5183_v40, 0.0  ;;  %v1071_v22 = vmul.f32 %v4777_v55, %v1063_v26  ;;  %v7429_v21 = vsel %vm5197_vm11, 4294967295, %v7428_v21  ;;  %v7434_v18 = vsel %vm5209_vm0, 4294967295, %v7433_v18 }
 0x22c   : > { %7430 = vst [vmem:[#allocation55_spill] sm:$0xff] %v7429_v21  ;;  %v1047_v26 = vadd.f32 %v1043_v49, %v1022_v3  ;;  %v1072_v9 = vmul.f32 %v4777_v55, %v1064_v27  ;;  %v1104_v30 = vsel %vm4945_vm15, %v5205_v12, 0.0  ;;  %v997_v49 = vsel %vm5209_vm0, %v981_v54, 0.0 }
 0x22d   : > { %7435 = vst [vmem:[#allocation57_spill] sm:$0xff] %v7434_v18  ;;  %v1075_v37 = vadd.f32 %v1071_v22, %v1046_v32 }
 0x22e   : > { %1405 = vrot.lane.b32.xlu1 %v4788_v60, %s4522_s18  ;;  %v1076_v3 = vadd.f32 %v1072_v9, %v1047_v26  ;;  %v216_v9 = vand.u32 7, %v5217_v1 }
 0x22f   : > { %v1087_v32 = vsel %vm7187_vm6, %v1075_v37, 0.0  ;;  %v1112_v37 = vmul.f32 %v4786_v59, %v1104_v30 }
 0x230   : > { %v5228_v27 = vpop.permute.xlu1 %1093  ;;  %v5232_v22 = vadd.f32 %v1087_v32, %v996_v28  ;;  %v1117_v55 = vpop.permute.xlu0 %1116  ;;  %v5236_v21 = vadd.f32 %v1076_v3, %v997_v49  ;;  %vm5251_vm6 = vcmp.ge.s32.totalorder %v216_v9, 1 }
 0x231   : > { %v5234_v57 = vpop.permute.xlu2 %1122  ;;  %v1209_v3 = vsel %vm5251_vm6, %v5055_v15, 0.0 }
 0x232   : > { %7437 = vst [vmem:[#allocation59_spill] sm:$0xff] %v5232_v22  ;;  %v5241_v16 = vsel %vm7203_vm14, %v5234_v57, %v1117_v55 }
 0x233   : > { %7438 = vst [vmem:[#allocation60_spill] sm:$0xff] %v5234_v57  ;;  %v1133_v26 = vmul.f32 %v4726_v7, %v5241_v16 }
 0x234   : > { %7439 = vst [vmem:[#allocation61_spill] sm:$0xff] %v5241_v16  ;;  %v1217_v16 = vmul.f32 %v4824_v0, %v1209_v3 }
 0x235   : > { %v5247_v54 = vadd.f32 %v1133_v26, %v1112_v37 }
 0x236   : > { %1054 = vrot.lane.b32.xlu1 %v4788_v60, %s4518_s14 }
 0x238   : > { %v1247_v32 = vpop.permute.xlu1 %1246  ;;  %v1224_v49 = vpop.permute.xlu0 %1223 }
 0x239   : > { %v5258_v57 = vpop.permute.xlu2 %1324  ;;  %v1255_v30 = vsel %vm7194_vm4, %v5088_v13, %v1247_v32  ;;  %v1229_v37 = vsel %vm7195_vm7, %v5019_v17, %v1224_v49  ;;  %v898_v17 = vsel %vm7202_vm13, %v4896_v25, %v4941_v45  ;;  %vm7442_vm4 = vcmp.lt.s32.totalorder %v4920_v33, 72 }
 0x23a   : > { %v1258_v26 = vsel %vm5078_vm2, %v1255_v30, 0.0  ;;  %v1238_v12 = vmul.f32 %v4759_v35, %v1229_v37  ;;  %vm5295_vm7 = vcmp.lt.s32.totalorder %v216_v9, 7  ;;  %v7443_v37 = vmov 0 }
 0x23b   : > { %v1266_v15 = vmul.f32 %v4728_v8, %v1258_v26  ;;  %v7444_v37 = vsel %vm5295_vm7, 4294967295, %v7443_v37  ;;  %vm7221_vm13 = vcmp.lt.s32.totalorder %v4920_v33, 1 }
 0x23c   : > { %v1242_v60 = vadd.f32 %v1238_v12, %v1217_v16  ;;  %v932_v12 = vsel %vm7442_vm4, %v4938_v44, %v5168_v4  ;;  %v1451_v16 = vsel %vm5004_vm5, %v898_v17, 0.0  ;;  %7445 = vst [vmem:[#allocation62_spill] sm:$0xff] %v7444_v37  ;;  %vm7446_vm4 = vcmp.lt.s32.totalorder %v4920_v33, 71 }
 0x23d   : > { %v5272_v22 = vadd.f32 %v1266_v15, %v5031_v56  ;;  %v911_v56 = vsel %vm5251_vm6, %v898_v17, 0.0  ;;  %v941_v3 = vmul.f32 %v4742_v29, %v932_v12  ;;  %v1467_v30 = vmul.f32 %v4732_v11, %v932_v12 }
 0x23e   : > { %1328 = vrot.lane.b32.xlu1 %v4751_v53, %s4523_s19  ;;  %v920_v44 = vmul.f32 %v4812_v62, %v911_v56  ;;  %v1459_v15 = vmul.f32 %v4810_v61, %v1451_v16  ;;  %v5317_v56 = vsel %vm7201_vm1, %v5021_v43, %v5228_v27  ;;  %vm7451_vm1 = vcmp.lt.s32.totalorder %v4920_v33, 8 }
 0x240   : > { %v5276_v13 = vpop.permute.xlu1 %1353  ;;  %v945_v17 = vadd.f32 %v941_v3, %v920_v44  ;;  %v1471_v53 = vadd.f32 %v1467_v30, %v1459_v15  ;;  %v1105_v3 = vsel %vm5004_vm5, %v5317_v56, 0.0 }
 0x241   : > { %v5278_v1 = vpop.permute.xlu2 %1376  ;;  %v1113_v15 = vmul.f32 %v4786_v59, %v1105_v3  ;;  %v7453_v3 = vld [vmem:[#allocation49_spill] sm:$0xff]  ;;  %v7464_v59 = vld [vmem:[#allocation8_spill] sm:$0xff] }
 0x246   : > { %1571 = vperm.xlu1 %4460, %v4664_v51  }
 0x248   : > { %v5299_v25 = vpop.permute.xlu1 %1004 }
 0x249   : > { %v5302_v26 = vpop.permute.xlu2 %951 }
 0x24a   : > { %v957_v51 = vsel %vm7446_vm4, %v5085_v63, %v5302_v26  ;;  %vm7450_vm4 = vcmp.lt.s32.totalorder %v4920_v33, 9 }
 0x24b   : > { %v970_v9 = vsel %vm5295_vm7, %v957_v51, 0.0  ;;  %v1475_v12 = vsel %vm5078_vm2, %v957_v51, 0.0 }
 0x24c   : > { %v978_v16 = vmul.f32 %v4724_v6, %v970_v9  ;;  %v1483_v61 = vmul.f32 %v4870_v20, %v1475_v12  ;;  %v5352_v9 = vpop.permute.xlu0 %1378 }
 0x24e   : > { %v5321_v62 = vadd.f32 %v978_v16, %v945_v17  ;;  %v5323_v63 = vadd.f32 %v1483_v61, %v1471_v53  ;;  %v1203_v53 = vsel %vm7450_vm4, %v5039_v58, %v4922_v34  ;;  %v1228_v17 = vsel %vm7451_vm1, %v1224_v49, %v4926_v38 }
 0x24f   : > { %v1239_v12 = vmul.f32 %v4759_v35, %v1228_v17  ;;  %v1297_v34 = vsel %vm7221_vm13, %v4943_v47, %v4924_v36  ;;  %vm7232_vm1 = vcmp.lt.s32.totalorder %v4920_v33, 120  ;;  %vm7454_vm4 = vcmp.lt.s32.totalorder %v4920_v33, 7  ;;  %v7677_v17 = vld [vmem:[#allocation55_spill] sm:$0xff] }
 0x250   : > { %7447 = vst [vmem:[#allocation63_spill] sm:$0xff] %v5323_v63  ;;  %v5328_v44 = vpop.permute.xlu1 %1118  ;;  %vm7455_vm11 = vmmov %vm7454_vm4  ;;  %v1298_v35 = vsel %vm4945_vm15, %v1297_v34, 0.0  ;;  %v7459_v34 = vld [vmem:[#allocation20_spill] sm:$0xff]  ;;  %v7470_v47 = vmov 0 }
 0x251   : > { %7448 = vst [vmem:[#allocation64_spill] sm:$0xff] %v5328_v44  ;;  %v5330_v30 = vpop.permute.xlu2 %1143  ;;  %v5335_v43 = vsel %vm7203_vm14, %v1117_v55, %v5328_v44  ;;  %v1210_v55 = vsel %vm4953_vm12, %v1203_v53, 0.0  ;;  %vm7225_vm14 = vcmp.lt.s32.totalorder %v4920_v33, 121 }
 0x252   : > { %7449 = vst [vmem:[#allocation65_spill] sm:$0xff] %v5335_v43  ;;  %v1134_v51 = vmul.f32 %v4726_v7, %v5335_v43  ;;  %v1218_v38 = vmul.f32 %v4824_v0, %v1210_v55  ;;  %v1362_v49 = vsel %vm7225_vm14, %v5118_v24, %v5276_v13  ;;  %v7463_v7 = vld [vmem:[#allocation16_spill] sm:$0xff] }
 0x253   : > { %v1314_v44 = vmul.f32 %v7464_v59, %v7463_v7 }
 0x254   : > { %v5344_v61 = vadd.f32 %v1134_v51, %v1113_v15  ;;  %v1243_v0 = vadd.f32 %v1239_v12, %v1218_v38  ;;  %v1306_v12 = vmul.f32 %v7459_v34, %v1298_v35  ;;  %v7460_v38 = vld [vmem:[#allocation30_spill] sm:$0xff] }
 0x258   : > { %v5356_v16 = vpop.permute.xlu1 %1289 }
 0x259   : > { %7452 = vst [vmem:[#allocation66_spill] sm:$0xff] %v5356_v16  ;;  %v1249_v58 = vpop.permute.xlu2 %1248  ;;  %v7469_v16 = vand.u32 63, %v4920_v33 }
 0x25a   : > { %v1253_v15 = vsel %vm7454_vm4, %v1249_v58, %v7453_v3  ;;  %v1254_v51 = vsel %vm7455_vm11, %v1247_v32, %v1249_v58  ;;  %v1387_v3 = vsel %vm7232_vm1, %v5278_v1, %v5352_v9  ;;  %v1364_v32 = vsel %vm4945_vm15, %v1362_v49, 0.0  ;;  %v7465_v49 = vld [vmem:[#allocation47_spill] sm:$0xff] }
 0x25b   : > { %v1259_v53 = vsel %vm5295_vm7, %v1254_v51, 0.0  ;;  %v1260_v55 = vsel %vm4979_vm8, %v1253_v15, 0.0  ;;  %vm7224_vm11 = vcmp.lt.s32.totalorder %v4920_v33, 127  ;;  %vm7226_vm4 = vcmp.lt.s32.totalorder %v4920_v33, 119 }
 0x25c   : > { %v1267_v43 = vmul.f32 %v4728_v8, %v1259_v53  ;;  %v1268_v24 = vmul.f32 %v4728_v8, %v1260_v55  ;;  %v1393_v15 = vmul.f32 %v7460_v38, %v1387_v3  ;;  %v7461_v53 = vld [vmem:[#allocation24_spill] sm:$0xff]  ;;  %v1318_v3 = vadd.f32 %v1314_v44, %v1306_v12 }
 0x25d   : > { %v1372_v55 = vmul.f32 %v7461_v53, %v1364_v32  ;;  %v7467_v32 = vld [vmem:[#allocation27_spill] sm:$0xff]  ;;  %v1281_v44 = vsel %vm5163_vm3, %v5110_v5, 0.0 }
 0x25e   : > { %v5387_v58 = vadd.f32 %v1267_v43, %v1242_v60  ;;  %v5389_v51 = vadd.f32 %v1268_v24, %v1243_v0  ;;  %v1296_v60 = vsel %vm7221_vm13, %v4924_v36, %v7465_v49  ;;  %v5404_v0 = vpop.permute.xlu0 %1403  ;;  %v7468_v49 = vld [vmem:[#allocation13_spill] sm:$0xff]  ;;  %vm5426_vm13 = vcmp.lt.s32.totalorder %v7469_v16, 56 }
 0x25f   : > { %v1397_v63 = vadd.f32 %v1393_v15, %v1372_v55  ;;  %v7471_v47 = vsel %vm5426_vm13, 4294967295, %v7470_v47 }
 0x260   : > { %7457 = vst [vmem:[#allocation49_spill] sm:$0xff] %v5387_v58  ;;  %v5396_v8 = vpop.permute.xlu1 %1322  ;;  %v1299_v58 = vsel %vm5004_vm5, %v1296_v60, 0.0  ;;  %v7474_v60 = vld [vmem:[#allocation19_spill] sm:$0xff] }
 0x261   : > { %7458 = vst [vmem:[#allocation67_spill] sm:$0xff] %v5389_v51  ;;  %v5406_v24 = vpop.permute.xlu2 %1401  ;;  %v1333_v35 = vsel %vm7224_vm11, %v5396_v8, %v5258_v57  ;;  %v1315_v16 = vmul.f32 %v7464_v59, %v7474_v60 }
 0x262   : > { %7462 = vst [vmem:[#allocation68_spill] sm:$0xff] %v5396_v8  ;;  %v1412_v43 = vsel %vm7226_vm4, %v5406_v24, %v5404_v0  ;;  %v1335_v7 = vsel %vm4975_vm9, %v1333_v35, 0.0  ;;  %v1307_v35 = vmul.f32 %v7459_v34, %v1299_v58  ;;  %vm7487_vm4 = vcmp.lt.s32.totalorder %v4920_v33, 64 }
 0x263   : > { %7466 = vst [vmem:[#allocation16_spill] sm:$0xff] %v5406_v24  ;;  %v1414_v36 = vsel %vm4975_vm9, %v1412_v43, 0.0  ;;  %v1343_v51 = vmul.f32 %v7467_v32, %v1335_v7 }
 0x264   : > { %v1422_v8 = vmul.f32 %v7468_v49, %v1414_v36  ;;  %7472 = vst [vmem:[#allocation69_spill] sm:$0xff] %v7471_v47  ;;  %v7520_v47 = vld [vmem:[#allocation58_spill] sm:$0xff] }
 0x265   : > { %v1347_v24 = vadd.f32 %v1343_v51, %v1318_v3  ;;  %v1361_v51 = vsel %vm7225_vm14, %v5276_v13, %v5120_v39  ;;  %v1282_v3 = vsel %vm5209_vm0, %v5272_v22, 0.0 }
 0x266   : > { %v1426_v12 = vadd.f32 %v1422_v8, %v1397_v63  ;;  %v1319_v63 = vadd.f32 %v1315_v16, %v1307_v35  ;;  %v1509_v16 = vsel %vm4953_vm12, %v5126_v14, 0.0 }
 0x267   : > { %v1442_v43 = vadd.f32 %v1347_v24, %v1281_v44  ;;  %v1365_v44 = vsel %vm5004_vm5, %v1361_v51, 0.0 }
 0x268   : > { %v1438_v15 = vsel %vm5426_vm13, %v1426_v12, 0.0  ;;  %v5436_v55 = vpop.permute.xlu1 %1326  ;;  %v1373_v13 = vmul.f32 %v7461_v53, %v1365_v44 }
 0x269   : > { %7473 = vst [vmem:[#allocation70_spill] sm:$0xff] %v5436_v55  ;;  %v5440_v7 = vadd.f32 %v1442_v43, %v1438_v15  ;;  %v5442_v36 = vpop.permute.xlu2 %1120  ;;  %v1332_v5 = vsel %vm7224_vm11, %v5258_v57, %v5436_v55  ;;  %vm7478_vm11 = vcmp.lt.s32.totalorder %v4920_v33, 65 }
 0x26a   : > { %v1336_v8 = vsel %vm5078_vm2, %v1332_v5, 0.0  ;;  %v1009_v22 = vsel %vm7478_vm11, %v5299_v25, %v4886_v23  ;;  %v1506_v5 = vsel %vm4945_vm15, %v5143_v2, 0.0 }
 0x26b   : > { %v1344_v58 = vmul.f32 %v7467_v32, %v1336_v8  ;;  %v1016_v23 = vsel %vm4953_vm12, %v1009_v22, 0.0  ;;  %v7489_v32 = vld [vmem:[#allocation15_spill] sm:$0xff] }
 0x26d   : > { %v1348_v24 = vadd.f32 %v1344_v58, %v1319_v63  ;;  %v7480_v63 = vld [vmem:[#allocation29_spill] sm:$0xff] }
 0x26e   : > { %v1525_v58 = vmul.f32 %v7480_v63, %v5137_v10  ;;  %v1522_v51 = vmul.f32 %v7480_v63, %v5152_v19  ;;  %v7482_v10 = vmov 0  ;;  %v1530_v19 = vsel %vm4975_vm9, %v5183_v40, 0.0 }
 0x26f   : > { %v5460_v57 = vadd.f32 %v1348_v24, %v1282_v3  ;;  %v1508_v24 = vsel %vm5251_vm6, %v1009_v22, 0.0  ;;  %v7481_v3 = vld [vmem:[#allocation32_spill] sm:$0xff] }
 0x270   : > { %v5462_v12 = vpop.permute.xlu1 %1380  ;;  %v1517_v14 = vmul.f32 %v7481_v3, %v1509_v16  ;;  %v1514_v44 = vmul.f32 %v7481_v3, %v1506_v5  ;;  %v7488_v16 = vld [vmem:[#allocation7_spill] sm:$0xff] }
 0x271   : > { %7475 = vst [vmem:[#allocation19_spill] sm:$0xff] %v5460_v57  ;;  %v5464_v35 = vpop.permute.xlu2 %1407  ;;  %v1386_v43 = vsel %vm7232_vm1, %v5352_v9, %v5462_v12  ;;  %v7479_v9 = vld [vmem:[#allocation39_spill] sm:$0xff]  ;;  %v1024_v5 = vmul.f32 %v7488_v16, %v1016_v23 }
 0x272   : > { %7476 = vst [vmem:[#allocation71_spill] sm:$0xff] %v5462_v12  ;;  %v1394_v15 = vmul.f32 %v7460_v38, %v1386_v43  ;;  %v7227_v8 = vand.u32 63, %v7479_v9  ;;  %vm7236_vm11 = vcmp.lt.s32.totalorder %v7479_v9, 448  ;;  %v1533_v43 = vsel %vm4979_vm8, %v5175_v52, 0.0 }
 0x273   : > { %7477 = vst [vmem:[#allocation72_spill] sm:$0xff] %v5464_v35  ;;  %v1529_v40 = vadd.f32 %v1525_v58, %v1517_v14  ;;  %v1526_v57 = vadd.f32 %v1522_v51, %v1514_v44  ;;  %v7493_v58 = vld [vmem:[#allocation50_spill] sm:$0xff]  ;;  %v7494_v14 = vld [vmem:[#allocation45_spill] sm:$0xff] }
 0x274   : > { %v5476_v60 = vadd.f32 %v1394_v15, %v1373_v13  ;;  %vm5500_vm14 = vcmp.ge.s32.totalorder %v7227_v8, 8  ;;  %v7486_v15 = vld [vmem:[#allocation38_spill] sm:$0xff]  ;;  %v1516_v8 = vmul.f32 %v7481_v3, %v1508_v24  ;;  %v1502_v51 = vsel %vm5163_vm3, %v7493_v58, 0.0 }
 0x275   : > { %v7483_v10 = vsel %vm5500_vm14, 4294967295, %v7482_v10  ;;  %vm5526_vm1 = vmand %vm7236_vm11, %vm5500_vm14  ;;  %vm7507_vm3 = vcmp.lt.s32.totalorder %v4920_v33, 71 }
 0x276   : > { %7484 = vst [vmem:[#allocation39_spill] sm:$0xff] %v7483_v10  ;;  %v1505_v44 = vsel %vm5526_vm1, %v7494_v14, 0.0 }
 0x278   : > { %v5496_v2 = vpop.permute.xlu1 %1029 }
 0x279   : > { %v5510_v13 = vpop.permute.xlu2 %1535  ;;  %v1034_v22 = vsel %vm7487_vm4, %v5496_v2, %v7486_v15  ;;  %v7490_v15 = vmov 0  ;;  %vm7237_vm4 = vcmp.lt.s32.totalorder %v4920_v33, 55 }
 0x27a   : > { %7485 = vst [vmem:[#allocation73_spill] sm:$0xff] %v5510_v13  ;;  %v1045_v55 = vmul.f32 %v7489_v32, %v1034_v22  ;;  %v1524_v53 = vmul.f32 %v7480_v63, %v1034_v22  ;;  %v1538_v12 = vmul.f32 %v5510_v13, %v1530_v19  ;;  %v1541_v52 = vmul.f32 %v5510_v13, %v1533_v43 }
 0x27b   : > { %v7491_v15 = vsel %vm5526_vm1, 4294967295, %v7490_v15  ;;  %vm7508_vm1 = vcmp.lt.s32.totalorder %v4920_v33, 55 }
 0x27c   : > { %7492 = vst [vmem:[#allocation38_spill] sm:$0xff] %v7491_v15  ;;  %v5530_v23 = vadd.f32 %v1045_v55, %v1024_v5  ;;  %v5532_v24 = vadd.f32 %v1524_v53, %v1516_v8  ;;  %v1542_v35 = vadd.f32 %v1538_v12, %v1526_v57  ;;  %v1545_v22 = vadd.f32 %v1541_v52, %v1529_v40  ;;  %v7498_v8 = vld [vmem:[#allocation34_spill] sm:$0xff]  ;;  %v7499_v40 = vld [vmem:[#allocation41_spill] sm:$0xff] }
 0x27d   : > { %v7501_v52 = vmov 0  ;;  %v7517_v15 = vld [vmem:[#allocation25_spill] sm:$0xff] }
 0x27e   : > { %v1557_v19 = vsel %vm7236_vm11, %v1545_v22, 0.0  ;;  %v5542_v43 = vadd.f32 %v1542_v35, %v1502_v51  ;;  %v7500_v35 = vand.u32 63, %v7499_v40  ;;  %v7504_v51 = vld [vmem:[#allocation33_spill] sm:$0xff] }
 0x27f   : > { %v5544_v55 = vadd.f32 %v1557_v19, %v1505_v44 }
 0x280   : > { %7495 = vst [vmem:[#allocation50_spill] sm:$0xff] %v5542_v43  ;;  %v1096_v13 = vpop.permute.xlu1 %1095  ;;  %vm5558_vm11 = vcmp.lt.s32.totalorder %v7500_v35, 56  ;;  %v5578_v35 = vpop.permute.xlu0 %1382 }
 0x281   : > { %7496 = vst [vmem:[#allocation45_spill] sm:$0xff] %v5544_v55  ;;  %v7502_v52 = vsel %vm5558_vm11, 4294967295, %v7501_v52 }
 0x282   : > { %7503 = vst [vmem:[#allocation41_spill] sm:$0xff] %v7502_v52  ;;  %v7662_v52 = vld [vmem:[#allocation29_spill] sm:$0xff] }
 0x288   : > { %v1142_v53 = vpop.permute.xlu1 %1141 }
 0x289   : > { %v5550_v57 = vsel %vm7237_vm4, %v1142_v53, %v5330_v30  ;;  %vm7505_vm4 = vcmp.lt.s32.totalorder %v4920_v33, 73 }
 0x28a   : > { %7497 = vst [vmem:[#allocation74_spill] sm:$0xff] %v5550_v57  ;;  %v1155_v12 = vsel %vm5078_vm2, %v5550_v57, 0.0  ;;  %v897_v14 = vsel %vm7505_vm4, %v4941_v45, %v7504_v51  ;;  %vm7511_vm4 = vcmp.lt.s32.totalorder %v4920_v33, 72 }
 0x28b   : > { %v1163_v5 = vmul.f32 %v7498_v8, %v1155_v12  ;;  %v7506_v12 = vld [vmem:[#allocation44_spill] sm:$0xff] }
 0x28c   : > { %v956_v40 = vsel %vm7507_vm3, %v5302_v26, %v7506_v12  ;;  %v1452_v26 = vsel %vm5251_vm6, %v897_v14, 0.0  ;;  %vm7512_vm3 = vcmp.ge.s32.totalorder %v4920_v33, 64 }
 0x28d   : > { %v1167_v22 = vadd.f32 %v1163_v5, %v5344_v61  ;;  %v7510_v5 = vld [vmem:[#allocation37_spill] sm:$0xff]  ;;  %v1476_v51 = vsel %vm5295_vm7, %v956_v40, 0.0  ;;  %v1460_v55 = vmul.f32 %v7517_v15, %v1452_v26 }
 0x28e   : > { %v931_v45 = vsel %vm7511_vm4, %v5168_v4, %v7510_v5  ;;  %v7513_v4 = vmov 0  ;;  %vm7519_vm4 = vcmp.lt.s32.totalorder %v4920_v33, 65  ;;  %v1484_v57 = vmul.f32 %v4870_v20, %v1476_v51 }
 0x28f   : > { %v1183_v58 = vsel %vm5558_vm11, %v1167_v22, 0.0  ;;  %v912_v22 = vsel %vm4953_vm12, %v897_v14, 0.0  ;;  %v942_v12 = vmul.f32 %v4742_v29, %v931_v45  ;;  %v1468_v14 = vmul.f32 %v4732_v11, %v931_v45  ;;  %v7521_v11 = vld [vmem:[#allocation59_spill] sm:$0xff] }
 0x290   : > { %v5570_v44 = vadd.f32 %v5236_v21, %v1183_v58  ;;  %v5572_v19 = vpop.permute.xlu1 %1147  ;;  %v7524_v51 = vmov 0 }
 0x291   : > { %v5583_v61 = vsel %vm7508_vm1, %v5572_v19, %v1142_v53  ;;  %v971_v53 = vsel %vm4979_vm8, %v956_v40, 0.0  ;;  %vm5605_vm1 = vmand %vm7512_vm3, %vm5426_vm13  ;;  %v7518_v40 = vld [vmem:[#allocation36_spill] sm:$0xff]  ;;  %v1472_v29 = vadd.f32 %v1468_v14, %v1460_v55  ;;  %vm7522_vm3 = vcmp.lt.s32.totalorder %v4920_v33, 57  ;;  %v1146_v55 = vpop.permute.xlu0 %1145 }
 0x292   : > { %7509 = vst [vmem:[#allocation33_spill] sm:$0xff] %v5583_v61  ;;  %v1154_v21 = vsel %vm4975_vm9, %v5583_v61, 0.0  ;;  %v7514_v4 = vsel %vm5605_vm1, 4294967295, %v7513_v4  ;;  %v1010_v43 = vsel %vm7519_vm4, %v7518_v40, %v5299_v25  ;;  %v220_v61 = vand.u32 63, %v7520_v47  ;;  %v7528_v14 = vld [vmem:[#allocation56_spill] sm:$0xff]  ;;  %v7529_v40 = vld [vmem:[#allocation17_spill] sm:$0xff] }
 0x293   : > { %v1162_v58 = vmul.f32 %v7498_v8, %v1154_v21  ;;  %7515 = vst [vmem:[#allocation44_spill] sm:$0xff] %v7514_v4  ;;  %v7516_v21 = vld [vmem:[#allocation26_spill] sm:$0xff]  ;;  %v979_v42 = vmul.f32 %v4724_v6, %v971_v53  ;;  %v1015_v26 = vsel %vm5251_vm6, %v1010_v43, 0.0  ;;  %v1507_v25 = vsel %vm5004_vm5, %v1010_v43, 0.0  ;;  %v7541_v4 = vld [vmem:[#allocation64_spill] sm:$0xff] }
 0x294   : > { %v921_v46 = vmul.f32 %v7516_v21, %v912_v22  ;;  %v5631_v47 = vsel %vm7522_vm3, %v5228_v27, %v1096_v13  ;;  %vm5636_vm4 = vcmp.ge.s32.totalorder %v220_v61, 8  ;;  %vm7530_vm3 = vcmp.lt.s32.totalorder %v4920_v33, 120  ;;  %v7540_v27 = vld [vmem:[#allocation63_spill] sm:$0xff] }
 0x295   : > { %v1166_v5 = vadd.f32 %v1162_v58, %v5247_v54  ;;  %v7525_v51 = vsel %vm5636_vm4, 4294967295, %v7524_v51  ;;  %vm5763_vm13 = vcmp.lt.s32.totalorder %v220_v61, 56  ;;  %v7562_v61 = vld [vmem:[#allocation19_spill] sm:$0xff] }
 0x296   : > { %v946_v22 = vadd.f32 %v942_v12, %v921_v46  ;;  %7526 = vst [vmem:[#allocation36_spill] sm:$0xff] %v7525_v51  ;;  %v5642_v46 = vadd.f32 %v1484_v57, %v1472_v29  ;;  %v7527_v12 = vld [vmem:[#allocation23_spill] sm:$0xff]  ;;  %v1515_v29 = vmul.f32 %v7481_v3, %v1507_v25  ;;  %v1388_v57 = vsel %vm7530_vm3, %v5578_v35, %v5278_v1  ;;  %v7536_v1 = vld [vmem:[#allocation66_spill] sm:$0xff]  ;;  %v7659_v51 = vld [vmem:[#allocation32_spill] sm:$0xff] }
 0x297   : > { %v1182_v45 = vsel %vm5605_vm1, %v1166_v5, 0.0  ;;  %v5646_v43 = vmul.f32 %v7464_v59, %v7527_v12  ;;  %v1023_v5 = vmul.f32 %v7488_v16, %v1015_v26  ;;  %vm7532_vm1 = vcmp.lt.s32.totalorder %v4920_v33, 57  ;;  %v7535_v12 = vld [vmem:[#allocation40_spill] sm:$0xff]  ;;  %v7549_v3 = vld [vmem:[#allocation10_spill] sm:$0xff] }
 0x298   : > { %v1190_v54 = vadd.f32 %v7521_v11, %v1182_v45  ;;  %v1358_v58 = vpop.permute.xlu1 %1357  ;;  %v5640_v11 = vadd.f32 %v979_v42, %v946_v22  ;;  %v5657_v42 = vmul.f32 %v7464_v59, %v7529_v40  ;;  %v7531_v45 = vld [vmem:[#allocation48_spill] sm:$0xff]  ;;  %v1106_v22 = vsel %vm5251_vm6, %v5631_v47, 0.0  ;;  %v7546_v59 = vld [vmem:[#allocation22_spill] sm:$0xff] }
 0x299   : > { %v5678_v25 = vsel %vm7534_vm10, %v5330_v30, %v1146_v55  ;;  %vm7537_vm3 = vcmp.lt.s32.totalorder %v4920_v33, 1  ;;  %vm7542_vm10 = vcmp.lt.s32.totalorder %v4920_v33, 56  ;;  %v1114_v30 = vmul.f32 %v7546_v59, %v1106_v22 }
 0x29a   : > { %v5634_v53 = vadd.f32 %v5440_v7, %v1190_v54  ;;  %v5667_v54 = vsel %vm7532_vm1, %v1096_v13, %v7531_v45  ;;  %v1294_v40 = vsel %vm7537_vm3, %v7536_v1, %v7535_v12  ;;  %v7538_v13 = vld [vmem:[#allocation47_spill] sm:$0xff]  ;;  %vm7539_vm1 = vmmov %vm7537_vm3  ;;  %v5701_v12 = vsel %vm7542_vm10, %v7541_v4, %v5442_v36  ;;  %v7758_v28 = vld [vmem:[#allocation44_spill] sm:$0xff] }
 0x29b   : > { %7533 = vst [vmem:[#allocation58_spill] sm:$0xff] %v5667_v54  ;;  %v1295_v45 = vsel %vm7539_vm1, %v7538_v13, %v7536_v1  ;;  %v5704_v1 = vmul.f32 %v7460_v38, %v1388_v57  ;;  %v7544_v13 = vld [vmem:[#allocation51_spill] sm:$0xff]  ;;  %vm7545_vm3 = vcmp.lt.s32.totalorder %v4920_v33, 64  ;;  %v1107_v26 = vsel %vm4953_vm12, %v5667_v54, 0.0 }
 0x29c   : > { %7523 = vst [vmem:[#allocation37_spill] sm:$0xff] %v5634_v53  ;;  %v1035_v7 = vsel %vm7545_vm3, %v7544_v13, %v5496_v2  ;;  %v1156_v4 = vsel %vm5295_vm7, %v5678_v25, 0.0  ;;  %v1300_v57 = vsel %vm5251_vm6, %v1295_v45, 0.0  ;;  %v1301_v6 = vsel %vm4953_vm12, %v1294_v40, 0.0  ;;  %v7548_v13 = vld [vmem:[#allocation60_spill] sm:$0xff] }
 0x29d   : > { %7543 = vst [vmem:[#allocation59_spill] sm:$0xff] %v5701_v12  ;;  %vm7547_vm1 = vcmp.lt.s32.totalorder %v4920_v33, 119  ;;  %v5728_v22 = vsel %vm7542_vm10, %v5442_v36, %v7548_v13  ;;  %v1135_v16 = vmul.f32 %v7549_v3, %v5701_v12  ;;  %vm7550_vm3 = vcmp.lt.s32.totalorder %v4920_v33, 55 }
 0x29e   : > { %v5735_v45 = vsel %vm7550_vm3, %v1146_v55, %v5572_v19  ;;  %v1044_v15 = vmul.f32 %v7489_v32, %v1035_v7  ;;  %v1115_v21 = vmul.f32 %v7546_v59, %v1107_v26  ;;  %v1164_v13 = vmul.f32 %v7498_v8, %v1156_v4  ;;  %v7553_v4 = vld [vmem:[#allocation72_spill] sm:$0xff] }
 0x29f   : > { %v1308_v53 = vmul.f32 %v7459_v34, %v1300_v57  ;;  %v1309_v12 = vmul.f32 %v7459_v34, %v1301_v6  ;;  %v1139_v54 = vadd.f32 %v1135_v16, %v1114_v30  ;;  %v1136_v19 = vmul.f32 %v7549_v3, %v5728_v22  ;;  %v7555_v6 = vld [vmem:[#allocation71_spill] sm:$0xff] }
 0x2a0   : > { %v1406_v20 = vpop.permute.xlu1 %1405  ;;  %v1157_v55 = vsel %vm4979_vm8, %v5735_v45, 0.0  ;;  %vm7554_vm10 = vcmp.lt.s32.totalorder %v4920_v33, 119  ;;  %vm7556_vm3 = vcmp.lt.s32.totalorder %v4920_v33, 120  ;;  %v7557_v30 = vmov 0 }
 0x2a1   : > { %v1411_v2 = vsel %vm7547_vm1, %v5404_v0, %v1406_v20  ;;  %v1523_v0 = vmul.f32 %v7480_v63, %v1035_v7  ;;  %vm7551_vm1 = vcmp.lt.s32.totalorder %v4920_v33, 121  ;;  %v1385_v16 = vsel %vm7556_vm3, %v7555_v6, %v5578_v35 }
 0x2a2   : > { %v1415_v40 = vsel %vm5078_vm2, %v1411_v2, 0.0  ;;  %v1360_v7 = vsel %vm7551_vm1, %v5120_v39, %v1358_v58  ;;  %v7552_v2 = vld [vmem:[#allocation16_spill] sm:$0xff]  ;;  %v7558_v30 = vsel %vm5763_vm13, 4294967295, %v7557_v30  ;;  %vm7561_vm9 = vmmov %vm7551_vm1  ;;  %v1048_v34 = vadd.f32 %v1044_v15, %v1023_v5  ;;  %v7566_v5 = vld [vmem:[#allocation54_spill] sm:$0xff] }
 0x2a3   : > { %v1423_v36 = vmul.f32 %v7468_v49, %v1415_v40  ;;  %v1413_v57 = vsel %vm7554_vm10, %v7553_v4, %v7552_v2  ;;  %7559 = vst [vmem:[#allocation23_spill] sm:$0xff] %v7558_v30  ;;  %v7560_v40 = vld [vmem:[#allocation52_spill] sm:$0xff]  ;;  %v1168_v2 = vadd.f32 %v1164_v13, %v1139_v54  ;;  %v1165_v59 = vmul.f32 %v7498_v8, %v1157_v55  ;;  %v7568_v13 = vld [vmem:[#allocation21_spill] sm:$0xff] }
 0x2a4   : > { %v1363_v39 = vsel %vm7561_vm9, %v1358_v58, %v7560_v40  ;;  %v1366_v35 = vsel %vm5251_vm6, %v1360_v7, 0.0  ;;  %vm7563_vm9 = vmmov %vm7554_vm10  ;;  %vm7565_vm1 = vcmp.lt.s32.totalorder %v4920_v33, 63  ;;  %v7663_v8 = vld [vmem:[#allocation28_spill] sm:$0xff] }
 0x2a5   : > { %v1427_v26 = vadd.f32 %v1423_v36, %v5476_v60  ;;  %v1527_v60 = vadd.f32 %v1523_v0, %v1515_v29  ;;  %v1140_v36 = vadd.f32 %v1136_v19, %v1115_v21  ;;  %v1367_v32 = vsel %vm4953_vm12, %v1363_v39, 0.0  ;;  %v7564_v21 = vld [vmem:[#allocation46_spill] sm:$0xff]  ;;  %vm7567_vm10 = vmmov %vm7565_vm1  ;;  %v7574_v39 = vld [vmem:[#allocation24_spill] sm:$0xff] }
 0x2a6   : > { %v1410_v15 = vsel %vm7563_vm9, %v1406_v20, %v7553_v4  ;;  %v7571_v4 = vmov 0  ;;  %vm7580_vm9 = vcmp.lt.s32.totalorder %v4920_v33, 127 }
 0x2a7   : > { %v1439_v3 = vsel %vm5558_vm11, %v1427_v26, 0.0  ;;  %v1169_v40 = vadd.f32 %v1165_v59, %v1140_v36  ;;  %v7575_v36 = vsel %vm5636_vm4, %v5321_v62, 0.0  ;;  %v7578_v62 = vsel %vm5636_vm4, %v5642_v46, 0.0 }
 0x2a8   : > { %v1447_v6 = vadd.f32 %v7562_v61, %v1439_v3  ;;  %v1055_v63 = vpop.permute.xlu1 %1054  ;;  %v1375_v61 = vmul.f32 %v7574_v39, %v1367_v32  ;;  %v1184_v32 = vsel %vm5763_vm13, %v1168_v2, 0.0 }
 0x2a9   : > { %v1059_v58 = vsel %vm7565_vm1, %v1055_v63, %v7564_v21  ;;  %v1060_v29 = vsel %vm7567_vm10, %v7566_v5, %v1055_v63  ;;  %v7569_v63 = vld [vmem:[#allocation73_spill] sm:$0xff]  ;;  %v1416_v21 = vsel %vm5295_vm7, %v1410_v15, 0.0  ;;  %vm7582_vm1 = vmmov %vm7580_vm9 }
 0x2aa   : > { %v5788_v54 = vadd.f32 %v1447_v6, %v5570_v44  ;;  %v1065_v3 = vsel %vm5295_vm7, %v1060_v29, 0.0  ;;  %v1066_v0 = vsel %vm4979_vm8, %v1059_v58, 0.0  ;;  %v1531_v20 = vsel %vm5078_vm2, %v1060_v29, 0.0 }
 0x2ab   : > { %v1073_v19 = vmul.f32 %v7568_v13, %v1065_v3  ;;  %v1074_v55 = vmul.f32 %v7568_v13, %v1066_v0  ;;  %v1532_v7 = vsel %vm5295_vm7, %v1059_v58, 0.0  ;;  %v1539_v26 = vmul.f32 %v7569_v63, %v1531_v20 }
 0x2ac   : > { %v7570_v44 = vand.u32 63, %v7479_v9  ;;  %v1540_v6 = vmul.f32 %v7569_v63, %v1532_v7  ;;  %v1417_v3 = vsel %vm4979_vm8, %v1413_v57, 0.0  ;;  %v1395_v0 = vmul.f32 %v7460_v38, %v1385_v16  ;;  %v7579_v7 = vld [vmem:[#allocation70_spill] sm:$0xff] }
 0x2ad   : > { %v1077_v5 = vadd.f32 %v1073_v19, %v1048_v34  ;;  %v1078_v29 = vadd.f32 %v1074_v55, %v5530_v23  ;;  %v1543_v58 = vadd.f32 %v1539_v26, %v1527_v60  ;;  %v1374_v20 = vmul.f32 %v7574_v39, %v1366_v35  ;;  %v7581_v26 = vld [vmem:[#allocation68_spill] sm:$0xff]  ;;  %v7664_v39 = vld [vmem:[#allocation18_spill] sm:$0xff] }
 0x2ae   : > { %vm5803_vm3 = vcmp.lt.s32.totalorder %v7570_v44, 56  ;;  %v1544_v59 = vadd.f32 %v1540_v6, %v5532_v24  ;;  %v7576_v23 = vsel %vm5500_vm14, %v5640_v11, 0.0  ;;  %v7577_v57 = vsel %vm5209_vm0, %v7540_v27, 0.0 }
 0x2af   : > { %v7572_v4 = vsel %vm5803_vm3, 4294967295, %v7571_v4  ;;  %v1188_v34 = vadd.f32 %v1077_v5, %v7575_v36  ;;  %v1189_v60 = vadd.f32 %v1078_v29, %v7576_v23  ;;  %v5831_v16 = vadd.f32 %v1543_v58, %v7577_v57  ;;  %v5856_v5 = vpop.permute.xlu0 %1587  ;;  %v7584_v29 = vld [vmem:[#allocation27_spill] sm:$0xff]  ;;  %v7588_v23 = vld [vmem:[#allocation49_spill] sm:$0xff] }
 0x2b0   : > { %7573 = vst [vmem:[#allocation56_spill] sm:$0xff] %v7572_v4  ;;  %v1185_v24 = vsel %vm5803_vm3, %v1169_v40, 0.0  ;;  %v1400_v2 = vadd.f32 %v5704_v1, %v1375_v61  ;;  %v1424_v35 = vmul.f32 %v7468_v49, %v1416_v21  ;;  %v5841_v15 = vadd.f32 %v1544_v59, %v7578_v62  ;;  %v1329_v11 = vpop.permute.xlu1 %1328  ;;  %v7589_v57 = vld [vmem:[#allocation67_spill] sm:$0xff]  ;;  %v7591_v62 = vld [vmem:[#allocation74_spill] sm:$0xff] }
 0x2b1   : > { %v1192_v19 = vadd.f32 %v1188_v34, %v1184_v32  ;;  %v1193_v55 = vadd.f32 %v1189_v60, %v1185_v24  ;;  %v1331_v27 = vsel %vm7580_vm9, %v7579_v7, %v1329_v11  ;;  %v1334_v44 = vsel %vm7582_vm1, %v1329_v11, %v7581_v26  ;;  %7583 = vst [vmem:[#allocation17_spill] sm:$0xff] %v5856_v5  ;;  %v7590_v24 = vld [vmem:[#allocation58_spill] sm:$0xff] }
 0x2b2   : > { %v1425_v1 = vmul.f32 %v7468_v49, %v1417_v3  ;;  %v1399_v40 = vadd.f32 %v1395_v0, %v1374_v20  ;;  %v1337_v61 = vsel %vm5295_vm7, %v1331_v27, 0.0  ;;  %v1338_v46 = vsel %vm4979_vm8, %v1334_v44, 0.0  ;;  %v7586_v0 = vld [vmem:[#allocation31_spill] sm:$0xff]  ;;  %v7594_v44 = vld [vmem:[#allocation33_spill] sm:$0xff] }
 0x2b3   : > { %v1320_v6 = vadd.f32 %v5646_v43, %v1308_v53  ;;  %v1321_v21 = vadd.f32 %v5657_v42, %v1309_v12  ;;  %v1345_v58 = vmul.f32 %v7584_v29, %v1337_v61  ;;  %v1346_v59 = vmul.f32 %v7584_v29, %v1338_v46 }
 0x2b4   : > { %v7585_v3 = vsel %vm4953_vm12, %v7528_v14, 0.0  ;;  %v1559_v32 = vsel %vm5004_vm5, %v5631_v47, 0.0  ;;  %v1429_v36 = vadd.f32 %v1425_v1, %v1400_v2  ;;  %v1428_v53 = vadd.f32 %v1424_v35, %v1399_v40 }
 0x2b5   : > { %v1569_v20 = vmul.f32 %v7586_v0, %v7585_v3  ;;  %v7587_v43 = vsel %vm4945_vm15, %v5317_v56, 0.0  ;;  %v1583_v12 = vsel %vm5078_vm2, %v5678_v25, 0.0  ;;  %v1349_v34 = vadd.f32 %v1345_v58, %v1320_v6  ;;  %v7592_v25 = vld [vmem:[#allocation42_spill] sm:$0xff]  ;;  %v7596_v58 = vld [vmem:[#allocation65_spill] sm:$0xff]  ;;  %v7597_v3 = vld [vmem:[#allocation59_spill] sm:$0xff] }
 0x2b6   : > { %v1566_v42 = vmul.f32 %v7586_v0, %v7587_v43  ;;  %v1350_v14 = vadd.f32 %v1346_v59, %v1321_v21  ;;  %v1283_v60 = vsel %vm5636_vm4, %v7588_v23, 0.0  ;;  %v1284_v47 = vsel %vm5500_vm14, %v7589_v57, 0.0 }
 0x2b7   : > { %v1560_v56 = vsel %vm5251_vm6, %v7590_v24, 0.0  ;;  %v1591_v2 = vmul.f32 %v5856_v5, %v1583_v12  ;;  %v1567_v35 = vmul.f32 %v7586_v0, %v1559_v32  ;;  %vm7593_vm10 = vnez %v7592_v25  ;;  %v7598_v12 = vld [vmem:[#allocation61_spill] sm:$0xff] }
 0x2b8   : > { %v1582_v11 = vsel %vm7593_vm10, %v7591_v62, 0.0  ;;  %v1444_v7 = vadd.f32 %v1349_v34, %v1283_v60  ;;  %v1445_v27 = vadd.f32 %v1350_v14, %v1284_v47  ;;  %v1584_v26 = vsel %vm5295_vm7, %v5735_v45, 0.0  ;;  %v5900_v46 = vpop.permute.xlu1 %1571 }
 0x2b9   : > { %v1585_v1 = vsel %vm4979_vm8, %v7594_v44, 0.0  ;;  %v1441_v40 = vsel %vm5803_vm3, %v1429_v36, 0.0  ;;  %v1440_v61 = vsel %vm5763_vm13, %v1428_v53, 0.0  ;;  %7595 = vst [vmem:[#allocation48_spill] sm:$0xff] %v5900_v46  ;;  %v1574_v59 = vmul.f32 %v5900_v46, %v7596_v58 }
 0x2ba   : > { %v1448_v6 = vadd.f32 %v1444_v7, %v1440_v61  ;;  %v1449_v21 = vadd.f32 %v1445_v27, %v1441_v40  ;;  %v1575_v45 = vmul.f32 %v5900_v46, %v7597_v3  ;;  %v1568_v32 = vmul.f32 %v7586_v0, %v1560_v56  ;;  %v7605_v27 = vld [vmem:[#allocation50_spill] sm:$0xff]  ;;  %v7606_v40 = vld [vmem:[#allocation45_spill] sm:$0xff] }
 0x2bb   : > { %v1590_v43 = vmul.f32 %v5856_v5, %v1582_v11  ;;  %v1576_v36 = vmul.f32 %v5900_v46, %v5728_v22  ;;  %v1577_v53 = vmul.f32 %v5900_v46, %v7598_v12  ;;  %v1578_v34 = vadd.f32 %v1574_v59, %v1566_v42 }
 0x2bc   : > { %v1579_v14 = vadd.f32 %v1575_v45, %v1567_v35  ;;  %v1624_v23 = vadd.f32 %v1448_v6, %v1192_v19  ;;  %v1625_v60 = vadd.f32 %v1449_v21, %v1193_v55  ;;  %v1592_v57 = vmul.f32 %v5856_v5, %v1584_v26  ;;  %v7603_v19 = vld [vmem:[#allocation69_spill] sm:$0xff] }
 0x2bd   : > { %v1593_v47 = vmul.f32 %v5856_v5, %v1585_v1  ;;  %v1580_v24 = vadd.f32 %v1576_v36, %v1568_v32  ;;  %v1581_v62 = vadd.f32 %v1577_v53, %v1569_v20  ;;  %v1594_v7 = vadd.f32 %v1590_v43, %v1578_v34  ;;  %v7607_v6 = vld [vmem:[#allocation37_spill] sm:$0xff] }
 0x2be   : > { %v1595_v56 = vadd.f32 %v1591_v2, %v1579_v14  ;;  %vm7599_vm9 = vcmp.lt.s32.totalorder %v7479_v9, 448  ;;  %v7600_v22 = vmov 0  ;;  %vm7604_vm14 = vnez %v7603_v19  ;;  %v7661_v19 = vld [vmem:[#allocation15_spill] sm:$0xff] }
 0x2bf   : > { %vm5918_vm1 = vmand %vm7599_vm9, %vm5803_vm3  ;;  %v1596_v42 = vadd.f32 %v1592_v57, %v1580_v24  ;;  %v1597_v35 = vadd.f32 %v1593_v47, %v1581_v62  ;;  %v1610_v55 = vsel %vm7604_vm14, %v1594_v7, 0.0  ;;  %vm7608_vm9 = vcmask 64512  }
 0x2c0   : > { %v7601_v22 = vsel %vm5918_vm1, 4294967295, %v7600_v22  ;;  %v1611_v11 = vsel %vm5558_vm11, %v1595_v56, 0.0  ;;  %v1618_v26 = vadd.f32 %v7605_v27, %v1610_v55  ;;  %vm7618_vm4 = vcmask 1043459  }
 0x2c1   : > { %7602 = vst [vmem:[#allocation40_spill] sm:$0xff] %v7601_v22  ;;  %v1612_v20 = vsel %vm5763_vm13, %v1596_v42, 0.0  ;;  %v1613_v2 = vsel %vm5918_vm1, %v1597_v35, 0.0  ;;  %v1619_v44 = vadd.f32 %v5831_v16, %v1611_v11  ;;  %vm7623_vm14 = vcmask 1042433  }
 0x2c2   : > { %v1620_v1 = vadd.f32 %v5841_v15, %v1612_v20  ;;  %v1621_v61 = vadd.f32 %v7606_v40, %v1613_v2  ;;  %v1626_v21 = vadd.f32 %v7607_v6, %v1618_v26  ;;  %vm7625_vm11 = vcmask 1045509  }
 0x2c3   : > { %v1627_v58 = vadd.f32 %v5788_v54, %v1619_v44  ;;  %vm7627_vm7 = vcmask 1044483  }
 0x2c4   : > { %v1628_v59 = vadd.f32 %v1624_v23, %v1620_v1  ;;  %v1629_v3 = vadd.f32 %v1625_v60, %v1621_v61  ;;  %v1635_v32 = vmul.f32 %v1626_v21, %v1626_v21  ;;  %v207_v60 = vld [vmem:[%s7122_s3] sm:$0xff] }
 0x2c5   : > { %v1630_v45 = vadd.f32 %v1627_v58, %v1626_v21  ;;  %v1636_v43 = vmul.f32 %v1627_v58, %v1627_v58  ;;  %v1669_v42 = vsel %vm7608_vm9, %v207_v60, 0 }
 0x2c6   : > { %v1637_v12 = vmul.f32 %v1628_v59, %v1628_v59  ;;  %v1638_v14 = vmul.f32 %v1629_v3, %v1629_v3  ;;  %v5940_v35 = vand.u32 4294901760, %v1669_v42 }
 0x2c7   : > { %v1631_v36 = vadd.f32 %v1630_v45, %v1628_v59  ;;  %v1639_v53 = vadd.f32 %v1636_v43, %v1635_v32 }
 0x2c8   : > { %7609 = vst [vmem:[#allocation66_spill] sm:$0xff] %v5940_v35  ;;  %v5943_v20 = vsub.f32 %v1669_v42, %v5940_v35 }
 0x2c9   : > { %v1632_v34 = vadd.f32 %v1631_v36, %v1629_v3  ;;  %v1640_v57 = vadd.f32 %v1639_v53, %v1637_v12 }
 0x2ca   : > { %7610 = vst [vmem:[#allocation47_spill] sm:$0xff] %v5943_v20  ;;  %v5946_v26 = vand.u32 4294901760, %v5943_v20 }
 0x2cb   : > { %1633 = vadd.xlane.f32.xlu1 %v1632_v34  ;;  %v1641_v16 = vadd.f32 %v1640_v57, %v1638_v14 }
 0x2cc   : > { %7611 = vst [vmem:[#allocation63_spill] sm:$0xff] %v5946_v26  ;;  %v1691_v40 = vsub.f32 %v5943_v20, %v5946_v26 }
 0x2cd   : > { %1642 = vadd.xlane.f32.xlu2 %v1641_v16 }
 0x2ce   : > { %v5950_v34 = vand.u32 4294901760, %v1691_v40 }
 0x2d0   : > { %7612 = vst [vmem:[#allocation64_spill] sm:$0xff] %v5950_v34 }
 0x33e   : > { %v1634_v15 = vpop.xlane.xlu1 %1633 }
 0x33f   : > { %v1644_v47 = vmul.f32 0.001953125, %v1634_v15 }
 0x340   : > { %v1643_v24 = vpop.xlane.xlu2 %1642 }
 0x341   : > { %v1645_v62 = vmul.f32 0.001953125, %v1643_v24  ;;  %v1646_v7 = vmul.f32 %v1644_v47, %v1644_v47  ;;  %v1649_v61 = vsub.f32 %v1626_v21, %v1644_v47  ;;  %v1650_v6 = vsub.f32 %v1627_v58, %v1644_v47 }
 0x342   : > { %v1651_v45 = vsub.f32 %v1628_v59, %v1644_v47  ;;  %v1652_v32 = vsub.f32 %v1629_v3, %v1644_v47 }
 0x343   : > { %v1647_v54 = vsub.f32 %v1645_v62, %v1646_v7 }
 0x345   : > { %v1648_v23 = vmax.f32 %v1647_v54, 0.0 }
 0x347   : > { %v1653_v56 = vadd.f32 1e-05, %v1648_v23 }
 0x349   : > { %4465 = vrsqrt.f32 %v1653_v56  ;;  %vm1660_vm13 = vweird.f32 %v1653_v56 }
 0x34f   : > { %v4466_v55 = vpop.eup %4465 }
 0x350   : > { %v1655_v11 = vmul.f32 %v4466_v55, %v1653_v56  ;;  %vm1661_vm3 = vweird.f32 %v4466_v55 }
 0x351   : > { %vm1662_vm9 = vmor %vm1660_vm13, %vm1661_vm3  ;;  %vm7614_vm13 = vcmask 1040384   ;;  %vm7615_vm3 = vcmask 1041409  }
 0x352   : > { %v1656_v2 = vmul.f32 %v4466_v55, %v1655_v11 }
 0x354   : > { %v1657_v27 = vmul.f32 0.5, %v1656_v2 }
 0x356   : > { %v1658_v44 = vsub.f32 1.5, %v1657_v27 }
 0x358   : > { %v1659_v1 = vmul.f32 %v4466_v55, %v1658_v44  ;;  %v4368_v44 = vld [vmem:[%s4577_s23 + $0x20] sm:$0xff] }
 0x359   : > { %v2406_v40 = vand.u32 4294901760, %v4368_v44 }
 0x35a   : > { %v1663_v43 = vsel %vm1662_vm9, %v4466_v55, %v1659_v1  ;;  %v4369_v1 = vld [vmem:[%s4577_s23 + $0x28] sm:$0xff]  ;;  %vm7616_vm9 = vcmask 1042434  }
 0x35b   : > { %v1664_v36 = vmul.f32 %v1663_v43, %v1649_v61  ;;  %v1665_v12 = vmul.f32 %v1663_v43, %v1650_v6  ;;  %v1666_v53 = vmul.f32 %v1663_v43, %v1651_v45  ;;  %v1667_v14 = vmul.f32 %v1663_v43, %v1652_v32  ;;  %vm7619_vm1 = vmmov %vm7616_vm9 }
 0x35c   : > { %v5965_v61 = vand.u32 4294901760, %v4369_v1  ;;  %v2433_v6 = vsub.f32 %v4368_v44, %v2406_v40 }
 0x35d   : > { %v1686_v57 = vand.u32 4294901760, %v1664_v36  ;;  %v1832_v16 = vand.u32 4294901760, %v1665_v12  ;;  %v1978_v62 = vand.u32 4294901760, %v1666_v53  ;;  %v2124_v21 = vand.u32 4294901760, %v1667_v14 }
 0x35e   : > { %v2579_v45 = vsub.f32 %v4369_v1, %v5965_v61  ;;  %v2434_v32 = vand.u32 4294901760, %v2433_v6 }
 0x35f   : > { %1687 = vmatpush.msra.mxu0 %v1686_v57  ;;  %1763 = vmatpush.msra.mxu3 %v1686_v57  ;;  %v1713_v15 = vsub.f32 %v1664_v36, %v1686_v57  ;;  %v1859_v24 = vsub.f32 %v1665_v12, %v1832_v16  ;;  %v2005_v7 = vsub.f32 %v1666_v53, %v1978_v62 }
 0x360   : > { %1693 = vmatmul.f32.vlgmr.msra.gmra.mxu0 %v5950_v34  ;;  %1767 = vmatmul.f32.vlgmr.msra.gmra.mxu3 %v5946_v26  ;;  %v2151_v54 = vsub.f32 %v1667_v14, %v2124_v21  ;;  %v2580_v43 = vand.u32 4294901760, %v2579_v45  ;;  %v2435_v36 = vsub.f32 %v2433_v6, %v2434_v32 }
 0x361   : > { %1740 = vmatpush.msra.mxu2 %v1713_v15  ;;  %v1714_v58 = vand.u32 4294901760, %v1713_v15  ;;  %v1860_v59 = vand.u32 4294901760, %v1859_v24  ;;  %v2006_v56 = vand.u32 4294901760, %v2005_v7 }
 0x362   : > { %1743 = vmatmul.f32.vlgmr.msra.gmra.mxu2 %v5943_v20  ;;  %v2152_v42 = vand.u32 4294901760, %v2151_v54  ;;  %v2581_v12 = vsub.f32 %v2579_v45, %v2580_v43  ;;  %v2436_v53 = vand.u32 4294901760, %v2435_v36  ;;  %v7628_v36 = vld [vmem:[#allocation6_spill] sm:$0xff] }
 0x363   : > { %1833 = vmatpush.msrb.mxu2 %v1832_v16  ;;  %1789 = vmatpush.msrb.mxu0 %v1714_v58  ;;  %v1715_v3 = vsub.f32 %v1713_v15, %v1714_v58  ;;  %v1861_v47 = vsub.f32 %v1859_v24, %v1860_v59  ;;  %v2007_v55 = vsub.f32 %v2005_v7, %v2006_v56  ;;  %v4371_v15 = vld [vmem:[%s4577_s23 + $0x38] sm:$0xff] }
 0x364   : > { %v2153_v11 = vsub.f32 %v2151_v54, %v2152_v42  ;;  %v2582_v14 = vand.u32 4294901760, %v2581_v12  ;;  %v7613_v58 = vld [vmem:[#allocation5_spill] sm:$0xff] }
 0x365   : > { %1935 = vmatpush.msra.mxu2 %v1860_v59  ;;  %1886 = vmatpush.msra.mxu0 %v1859_v24  ;;  %v1716_v23 = vand.u32 4294901760, %v1715_v3  ;;  %v1862_v60 = vand.u32 4294901760, %v1861_v47  ;;  %v2008_v2 = vand.u32 4294901760, %v2007_v55 }
 0x366   : > { %v2154_v27 = vand.u32 4294901760, %v2153_v11 }
 0x367   : > { %1717 = vmatpush.msra.mxu1 %v1716_v23  ;;  %1863 = vmatpush.msrb.mxu3 %v1862_v60 }
 0x368   : > { %1719 = vmatmul.f32.vlgmr.msra.gmra.mxu1 %v5940_v35  ;;  %1791 = vmatmul.f32.vlgmr.msrb.gmra.mxu0 %v5940_v35 }
 0x369   : > { %1811 = vmatpush.msrb.mxu1 %v1686_v57  ;;  %1865 = vmatmul.f32.vlgmr.msrb.gmra.mxu3 %v5940_v35  ;;  %v4370_v57 = vld [vmem:[%s4577_s23 + $0x30] sm:$0xff] }
 0x36a   : > { %1957 = vmatpush.msra.mxu3 %v1832_v16  ;;  %1979 = vmatpush.msrb.mxu0 %v1978_v62  ;;  %v2698_v24 = vand.u32 4294901760, %v4370_v57 }
 0x36b   : > { %1909 = vmatpush.msra.mxu1 %v1832_v16  ;;  %1839 = vmatmul.f32.vlgmr.msrb.gmra.mxu2 %v5950_v34  ;;  %v4221_v16 = vrot.slane %v4369_v1, 7 }
 0x36c   : > { %2055 = vmatpush.msrb.mxu3 %v1978_v62  ;;  %2032 = vmatpush.msrb.mxu2 %v2005_v7  ;;  %v4223_v7 = vrot.slane %v4371_v15, 5  ;;  %v2725_v60 = vsub.f32 %v4370_v57, %v2698_v24 }
 0x36d   : > { %v4224_v59 = vsel %vm7614_vm13, %v4368_v44, %v4221_v16  ;;  %v4227_v3 = vsel %vm7615_vm3, %v4368_v44, %v4221_v16  ;;  %v4231_v47 = vsel %vm7616_vm9, %v4368_v44, %v4221_v16  ;;  %v4235_v23 = vsel %vm7618_vm4, %v4368_v44, %v4221_v16  ;;  %vm7620_vm13 = vmmov %vm7618_vm4 }
 0x36e   : > { %vm7621_vm3 = vcmask 1044484   ;;  %vm7622_vm9 = vcmask 1041408   ;;  %vm7624_vm4 = vcmask 1043458   ;;  %v2726_v12 = vand.u32 4294901760, %v2725_v60 }
 0x370   : > { %1813 = vmatmul.f32.vlgmr.msrb.gmra.mxu1 %v5940_v35  ;;  %1889 = vmatmul.f32.vlgmr.msra.gmra.mxu0 %v5943_v20 }
 0x371   : > { %1959 = vmatmul.f32.vlgmr.msra.gmra.mxu3 %v5940_v35  ;;  %2009 = vmatpush.msrb.mxu1 %v2008_v2 }
 0x372   : > { %2081 = vmatpush.msra.mxu0 %v2006_v56  ;;  %2155 = vmatpush.msra.mxu3 %v2154_v27 }
 0x373   : > { %1937 = vmatmul.f32.vlgmr.msra.gmra.mxu2 %v5940_v35 }
 0x374   : > { %2125 = vmatpush.msra.mxu2 %v2124_v21 }
 0x378   : > { %1913 = vmatmul.f32.vlgmr.msra.gmra.mxu1 %v5946_v26  ;;  %1985 = vmatmul.f32.vlgmr.msrb.gmra.mxu0 %v5950_v34 }
 0x379   : > { %2059 = vmatmul.f32.vlgmr.msrb.gmra.mxu3 %v5946_v26  ;;  %2103 = vmatpush.msra.mxu1 %v1978_v62  ;;  %v5983_v62 = vand.u32 4294901760, %v4371_v15 }
 0x37a   : > { %2178 = vmatpush.msrb.mxu0 %v2151_v54  ;;  %2249 = vmatpush.msrb.mxu3 %v2124_v21  ;;  %v7617_v54 = vld [vmem:[#allocation4_spill] sm:$0xff] }
 0x37b   : > { %2035 = vmatmul.f32.vlgmr.msrb.gmra.mxu2 %v5943_v20  ;;  %v2871_v56 = vsub.f32 %v4371_v15, %v5983_v62 }
 0x37c   : > { %2227 = vmatpush.msrb.mxu2 %v2152_v42 }
 0x380   : > { %2011 = vmatmul.f32.vlgmr.msrb.gmra.mxu1 %v5940_v35  ;;  %2083 = vmatmul.f32.vlgmr.msra.gmra.mxu0 %v5940_v35 }
 0x381   : > { %2201 = vmatpush.msrb.mxu1 %v2124_v21  ;;  %2157 = vmatmul.f32.vlgmr.msra.gmra.mxu3 %v5940_v35  ;;  %v4222_v21 = vrot.slane %v4370_v57, 6  ;;  %v7630_v57 = vld [vmem:[#allocation2_spill] sm:$0xff] }
 0x382   : > { %2407 = vmatpush.msra.mxu0 %v2406_v40  ;;  %2483 = vmatpush.msra.mxu3 %v2406_v40 }
 0x383   : > { %2131 = vmatmul.f32.vlgmr.msra.gmra.mxu2 %v5950_v34  ;;  %v4225_v42 = vsel %vm7619_vm1, %v4222_v21, %v4223_v7  ;;  %v4228_v55 = vsel %vm7620_vm13, %v4222_v21, %v4223_v7  ;;  %v4232_v11 = vsel %vm7621_vm3, %v4222_v21, %v4223_v7  ;;  %v4236_v1 = vsel %vm7625_vm11, %v4222_v21, %v4223_v7 }
 0x384   : > { %2460 = vmatpush.msra.mxu2 %v2433_v6  ;;  %v4226_v2 = vsel %vm7622_vm9, %v4224_v59, %v4225_v42  ;;  %v4229_v27 = vsel %vm7623_vm14, %v4227_v3, %v4228_v55  ;;  %v4233_v44 = vsel %vm7624_vm4, %v4231_v47, %v4232_v11  ;;  %vm7629_vm1 = vnez %v7628_v36 }
 0x385   : > { %v4230_v6 = vrot.slane %v4229_v27, 1  ;;  %4372 = vst.msk [vmem:[%s4625_s26 + $0x20] ss:$2 sm:$0xf] %vm7629_vm1, %v4226_v2 }
 0x387   : > { %4373 = vst.msk [vmem:[%s4625_s26 + $0x28] ss:$2 sm:$0xf] %vm7629_vm1, %v4230_v6 }
 0x388   : > { %2105 = vmatmul.f32.vlgmr.msra.gmra.mxu1 %v5940_v35  ;;  %2181 = vmatmul.f32.vlgmr.msrb.gmra.mxu0 %v5943_v20 }
 0x389   : > { %2251 = vmatmul.f32.vlgmr.msrb.gmra.mxu3 %v5940_v35  ;;  %2437 = vmatpush.msra.mxu1 %v2436_v53 }
 0x38a   : > { %2509 = vmatpush.msrb.mxu0 %v2434_v32  ;;  %2583 = vmatpush.msrb.mxu3 %v2582_v14  ;;  %v4237_v32 = vsel %vm7627_vm7, %v4235_v23, %v4236_v1  ;;  %v2872_v14 = vand.u32 4294901760, %v2871_v56 }
 0x38b   : > { %2229 = vmatmul.f32.vlgmr.msrb.gmra.mxu2 %v5940_v35  ;;  %v4238_v53 = vrot.slane %v4237_v32, 3 }
 0x38c   : > { %2553 = vmatpush.msrb.mxu2 %v5965_v61  ;;  %v2873_v16 = vsub.f32 %v2871_v56, %v2872_v14 }
 0x38d   : > { %4375 = vst.msk [vmem:[%s4625_s26 + $0x38] ss:$2 sm:$0xf] %vm7629_vm1, %v4238_v53 }
 0x38e   : > { %v2874_v21 = vand.u32 4294901760, %v2873_v16 }
 0x390   : > { %2205 = vmatmul.f32.vlgmr.msrb.gmra.mxu1 %v5946_v26  ;;  %2413 = vmatmul.f32.vlgmr.msra.gmra.mxu0 %v7613_v58 }
 0x391   : > { %2487 = vmatmul.f32.vlgmr.msra.gmra.mxu3 %v7617_v54  ;;  %2531 = vmatpush.msrb.mxu1 %v2406_v40  ;;  %v7626_v40 = vld [vmem:[#allocation3_spill] sm:$0xff] }
 0x392   : > { %2606 = vmatpush.msra.mxu0 %v2579_v45  ;;  %2677 = vmatpush.msra.mxu3 %v5965_v61  ;;  %v4234_v45 = vrot.slane %v4233_v44, 2 }
 0x393   : > { %2463 = vmatmul.f32.vlgmr.msra.gmra.mxu2 %v7626_v40 }
 0x394   : > { %2655 = vmatpush.msra.mxu2 %v2580_v43  ;;  %4374 = vst.msk [vmem:[%s4625_s26 + $0x30] ss:$2 sm:$0xf] %vm7629_vm1, %v4234_v45  ;;  %v2727_v43 = vsub.f32 %v2725_v60, %v2726_v12 }
 0x396   : > { %v2728_v15 = vand.u32 4294901760, %v2727_v43 }
 0x398   : > { %2439 = vmatmul.f32.vlgmr.msra.gmra.mxu1 %v7630_v57  ;;  %2511 = vmatmul.f32.vlgmr.msrb.gmra.mxu0 %v7630_v57 }
 0x399   : > { %2585 = vmatmul.f32.vlgmr.msrb.gmra.mxu3 %v7630_v57  ;;  %2629 = vmatpush.msra.mxu1 %v5965_v61 }
 0x39a   : > { %2699 = vmatpush.msrb.mxu0 %v2698_v24  ;;  %2775 = vmatpush.msrb.mxu3 %v2698_v24 }
 0x39b   : > { %2559 = vmatmul.f32.vlgmr.msrb.gmra.mxu2 %v7613_v58 }
 0x39c   : > { %2752 = vmatpush.msrb.mxu2 %v2725_v60 }
 0x3a0   : > { %2533 = vmatmul.f32.vlgmr.msrb.gmra.mxu1 %v7630_v57  ;;  %2609 = vmatmul.f32.vlgmr.msra.gmra.mxu0 %v7626_v40 }
 0x3a1   : > { %2679 = vmatmul.f32.vlgmr.msra.gmra.mxu3 %v7630_v57  ;;  %2729 = vmatpush.msrb.mxu1 %v2728_v15 }
 0x3a2   : > { %2801 = vmatpush.msra.mxu0 %v2726_v12  ;;  %2875 = vmatpush.msra.mxu3 %v2874_v21 }
 0x3a3   : > { %2657 = vmatmul.f32.vlgmr.msra.gmra.mxu2 %v7630_v57 }
 0x3a4   : > { %2845 = vmatpush.msra.mxu2 %v5983_v62 }
 0x3a8   : > { %2633 = vmatmul.f32.vlgmr.msra.gmra.mxu1 %v7617_v54  ;;  %2705 = vmatmul.f32.vlgmr.msrb.gmra.mxu0 %v7613_v58 }
 0x3a9   : > { %2779 = vmatmul.f32.vlgmr.msrb.gmra.mxu3 %v7617_v54  ;;  %2823 = vmatpush.msra.mxu1 %v2698_v24 }
 0x3aa   : > { %2898 = vmatpush.msrb.mxu0 %v2871_v56  ;;  %2969 = vmatpush.msrb.mxu3 %v5983_v62 }
 0x3ab   : > { %2755 = vmatmul.f32.vlgmr.msrb.gmra.mxu2 %v7626_v40 }
 0x3ac   : > { %2947 = vmatpush.msrb.mxu2 %v2872_v14 }
 0x3b0   : > { %2731 = vmatmul.f32.vlgmr.msrb.gmra.mxu1 %v7630_v57  ;;  %2803 = vmatmul.f32.vlgmr.msra.gmra.mxu0 %v7630_v57 }
 0x3b1   : > { %2877 = vmatmul.f32.vlgmr.msra.gmra.mxu3 %v7630_v57  ;;  %2921 = vmatpush.msrb.mxu1 %v5983_v62 }
 0x3b3   : > { %2851 = vmatmul.f32.vlgmr.msra.gmra.mxu2 %v7613_v58 }
 0x3b8   : > { %2825 = vmatmul.f32.vlgmr.msra.gmra.mxu1 %v7630_v57  ;;  %2901 = vmatmul.f32.vlgmr.msrb.gmra.mxu0 %v7626_v40 }
 0x3b9   : > { %2971 = vmatmul.f32.vlgmr.msrb.gmra.mxu3 %v7630_v57 }
 0x3bb   : > { %2949 = vmatmul.f32.vlgmr.msrb.gmra.mxu2 %v7630_v57 }
 0x3c0   : > { %2925 = vmatmul.f32.vlgmr.msrb.gmra.mxu1 %v7617_v54 }
 0x3dd   : > { %v1694_v61 = vpop.f32.mrf.mxu0 }
 0x3e3   : > { %v1768_v24 = vpop.f32.mrf.mxu3 }
 0x3e5   : > { %v1720_v59 = vpop.f32.mrf.mxu1  ;;  %v1744_v3 = vpop.f32.mrf.mxu2 }
 0x3e6   : > { %v1721_v47 = vadd.f32 %v1720_v59, %v1694_v61  ;;  %v1792_v7 = vpop.f32.mrf.mxu0 }
 0x3e8   : > { %v1745_v23 = vadd.f32 %v1744_v3, %v1721_v47 }
 0x3ea   : > { %v1769_v62 = vadd.f32 %v1768_v24, %v1745_v23 }
 0x3ec   : > { %v1793_v60 = vadd.f32 %v1792_v7, %v1769_v62  ;;  %v1866_v58 = vpop.f32.mrf.mxu3 }
 0x3ed   : > { %v1814_v56 = vpop.f32.mrf.mxu1 }
 0x3ee   : > { %v6040_v42 = vadd.f32 %v1814_v56, %v1793_v60  ;;  %v1890_v55 = vpop.f32.mrf.mxu0  ;;  %v1840_v11 = vpop.f32.mrf.mxu2 }
 0x3ef   : > { %v1867_v2 = vadd.f32 %v1866_v58, %v1840_v11 }
 0x3f0   : > { %7631 = vst [vmem:[#allocation51_spill] sm:$0xff] %v6040_v42 }
 0x3f1   : > { %v1891_v27 = vadd.f32 %v1890_v55, %v1867_v2 }
 0x3f4   : > { %v1960_v44 = vpop.f32.mrf.mxu3 }
 0x3f5   : > { %v1914_v1 = vpop.f32.mrf.mxu1 }
 0x3f6   : > { %v1915_v54 = vadd.f32 %v1914_v1, %v1891_v27  ;;  %v1986_v40 = vpop.f32.mrf.mxu0  ;;  %v1938_v6 = vpop.f32.mrf.mxu2 }
 0x3f8   : > { %v1939_v45 = vadd.f32 %v1938_v6, %v1915_v54 }
 0x3fa   : > { %v6042_v32 = vadd.f32 %v1960_v44, %v1939_v45 }
 0x3fc   : > { %7632 = vst [vmem:[#allocation60_spill] sm:$0xff] %v6042_v32  ;;  %v2060_v12 = vpop.f32.mrf.mxu3 }
 0x3fd   : > { %v2012_v53 = vpop.f32.mrf.mxu1 }
 0x3fe   : > { %v2013_v14 = vadd.f32 %v2012_v53, %v1986_v40  ;;  %v2084_v57 = vpop.f32.mrf.mxu0  ;;  %v2036_v43 = vpop.f32.mrf.mxu2 }
 0x400   : > { %v2037_v16 = vadd.f32 %v2036_v43, %v2013_v14 }
 0x402   : > { %v2061_v15 = vadd.f32 %v2060_v12, %v2037_v16 }
 0x404   : > { %v2085_v21 = vadd.f32 %v2084_v57, %v2061_v15  ;;  %v2158_v61 = vpop.f32.mrf.mxu3 }
 0x405   : > { %v2106_v24 = vpop.f32.mrf.mxu1 }
 0x406   : > { %v6044_v59 = vadd.f32 %v2106_v24, %v2085_v21  ;;  %v2182_v3 = vpop.f32.mrf.mxu0  ;;  %v2132_v47 = vpop.f32.mrf.mxu2 }
 0x407   : > { %v2159_v7 = vadd.f32 %v2158_v61, %v2132_v47 }
 0x408   : > { %7633 = vst [vmem:[#allocation16_spill] sm:$0xff] %v6044_v59 }
 0x409   : > { %v2183_v23 = vadd.f32 %v2182_v3, %v2159_v7 }
 0x40c   : > { %v2252_v62 = vpop.f32.mrf.mxu3 }
 0x40d   : > { %v2206_v60 = vpop.f32.mrf.mxu1 }
 0x40e   : > { %v2207_v58 = vadd.f32 %v2206_v60, %v2183_v23  ;;  %v2414_v56 = vpop.f32.mrf.mxu0  ;;  %v2230_v55 = vpop.f32.mrf.mxu2 }
 0x410   : > { %v2231_v11 = vadd.f32 %v2230_v55, %v2207_v58 }
 0x412   : > { %v6046_v2 = vadd.f32 %v2252_v62, %v2231_v11 }
 0x414   : > { %7634 = vst [vmem:[#allocation72_spill] sm:$0xff] %v6046_v2  ;;  %v2488_v27 = vpop.f32.mrf.mxu3 }
 0x415   : > { %v2440_v44 = vpop.f32.mrf.mxu1 }
 0x416   : > { %v2512_v1 = vpop.f32.mrf.mxu0  ;;  %v2464_v54 = vpop.f32.mrf.mxu2  ;;  %v2441_v16 = vadd.f32 %v2440_v44, %v2414_v56 }
 0x418   : > { %v2465_v7 = vadd.f32 %v2464_v54, %v2441_v16 }
 0x41a   : > { %v2489_v58 = vadd.f32 %v2488_v27, %v2465_v7 }
 0x41c   : > { %v2586_v40 = vpop.f32.mrf.mxu3  ;;  %v2513_v26 = vadd.f32 %v2512_v1, %v2489_v58 }
 0x41d   : > { %v2534_v6 = vpop.f32.mrf.mxu1 }
 0x41e   : > { %v2610_v45 = vpop.f32.mrf.mxu0  ;;  %v2560_v12 = vpop.f32.mrf.mxu2 }
 0x41f   : > { %v2587_v15 = vadd.f32 %v2586_v40, %v2560_v12  ;;  %v2535_v40 = vadd.f32 %v2534_v6, %v2513_v26 }
 0x421   : > { %v2611_v23 = vadd.f32 %v2610_v45, %v2587_v15  ;;  %v2980_v27 = vmul.f32 %v2535_v40, %v2535_v40 }
 0x424   : > { %v2680_v53 = vpop.f32.mrf.mxu3 }
 0x425   : > { %v2634_v14 = vpop.f32.mrf.mxu1 }
 0x426   : > { %v2706_v57 = vpop.f32.mrf.mxu0  ;;  %v2658_v43 = vpop.f32.mrf.mxu2  ;;  %v2635_v60 = vadd.f32 %v2634_v14, %v2611_v23 }
 0x428   : > { %v2659_v35 = vadd.f32 %v2658_v43, %v2635_v60 }
 0x42a   : > { %v2681_v44 = vadd.f32 %v2680_v53, %v2659_v35 }
 0x42c   : > { %v2780_v21 = vpop.f32.mrf.mxu3  ;;  %v2981_v54 = vmul.f32 %v2681_v44, %v2681_v44  ;;  %v2975_v15 = vadd.f32 %v2681_v44, %v2535_v40 }
 0x42d   : > { %v2732_v61 = vpop.f32.mrf.mxu1 }
 0x42e   : > { %v2733_v24 = vadd.f32 %v2732_v61, %v2706_v57  ;;  %v2756_v3 = vpop.f32.mrf.mxu2  ;;  %v2804_v47 = vpop.f32.mrf.mxu0 }
 0x430   : > { %v2757_v62 = vadd.f32 %v2756_v3, %v2733_v24 }
 0x432   : > { %v2781_v55 = vadd.f32 %v2780_v21, %v2757_v62 }
 0x434   : > { %v2878_v36 = vpop.f32.mrf.mxu3  ;;  %v2805_v34 = vadd.f32 %v2804_v47, %v2781_v55 }
 0x435   : > { %v2826_v11 = vpop.f32.mrf.mxu1 }
 0x436   : > { %v2852_v20 = vpop.f32.mrf.mxu2  ;;  %v2902_v56 = vpop.f32.mrf.mxu0  ;;  %v6048_v12 = vadd.f32 %v2826_v11, %v2805_v34 }
 0x437   : > { %v2879_v4 = vadd.f32 %v2878_v36, %v2852_v20  ;;  %v2984_v36 = vadd.f32 %v2981_v54, %v2980_v27 }
 0x438   : > { %v2982_v43 = vmul.f32 %v6048_v12, %v6048_v12  ;;  %v2976_v20 = vadd.f32 %v2975_v15, %v6048_v12 }
 0x439   : > { %v2903_v57 = vadd.f32 %v2902_v56, %v2879_v4 }
 0x43a   : > { %v2985_v34 = vadd.f32 %v2984_v36, %v2982_v43 }
 0x43c   : > { %v2972_v14 = vpop.f32.mrf.mxu3 }
 0x43d   : > { %v2926_v61 = vpop.f32.mrf.mxu1 }
 0x43e   : > { %v2927_v45 = vadd.f32 %v2926_v61, %v2903_v57  ;;  %v2950_v16 = vpop.f32.mrf.mxu2 }
 0x440   : > { %v2951_v21 = vadd.f32 %v2950_v16, %v2927_v45 }
 0x442   : > { %v2973_v1 = vadd.f32 %v2972_v14, %v2951_v21 }
 0x444   : > { %v2977_v35 = vadd.f32 %v2976_v20, %v2973_v1  ;;  %v2983_v26 = vmul.f32 %v2973_v1, %v2973_v1 }
 0x446   : > { %2978 = vadd.xlane.f32.xlu0 %v2977_v35  ;;  %v2986_v4 = vadd.f32 %v2985_v34, %v2983_v26 }
 0x448   : > { %2987 = vadd.xlane.f32.xlu2 %v2986_v4 }
 0x4b9   : > { %v2979_v6 = vpop.xlane.xlu0 %2978 }
 0x4ba   : > { %v2989_v53 = vmul.f32 0.001953125, %v2979_v6 }
 0x4bb   : > { %v2988_v24 = vpop.xlane.xlu2 %2987 }
 0x4bc   : > { %v2990_v3 = vmul.f32 0.001953125, %v2988_v24  ;;  %v2991_v47 = vmul.f32 %v2989_v53, %v2989_v53  ;;  %v2994_v61 = vsub.f32 %v2535_v40, %v2989_v53  ;;  %v2995_v54 = vsub.f32 %v2681_v44, %v2989_v53 }
 0x4bd   : > { %v2997_v45 = vsub.f32 %v2973_v1, %v2989_v53  ;;  %v2996_v44 = vsub.f32 %v6048_v12, %v2989_v53 }
 0x4be   : > { %v2992_v7 = vsub.f32 %v2990_v3, %v2991_v47 }
 0x4c0   : > { %v2993_v23 = vmax.f32 %v2992_v7, 0.0 }
 0x4c2   : > { %v2998_v62 = vadd.f32 1e-05, %v2993_v23 }
 0x4c4   : > { %4467 = vrsqrt.f32 %v2998_v62  ;;  %vm3005_vm14 = vweird.f32 %v2998_v62 }
 0x4ca   : > { %v4468_v60 = vpop.eup %4467 }
 0x4cb   : > { %v3000_v58 = vmul.f32 %v4468_v60, %v2998_v62  ;;  %vm3006_vm7 = vweird.f32 %v4468_v60 }
 0x4cc   : > { %vm3007_vm11 = vmor %vm3005_vm14, %vm3006_vm7  ;;  %vm7641_vm7 = vcmp.lt.s32.totalorder %v4920_v33, 73  ;;  %vm7644_vm14 = vcmp.lt.s32.totalorder %v4920_v33, 9 }
 0x4cd   : > { %v3001_v55 = vmul.f32 %v4468_v60, %v3000_v58 }
 0x4cf   : > { %v3002_v11 = vmul.f32 0.5, %v3001_v55 }
 0x4d1   : > { %v3003_v56 = vsub.f32 1.5, %v3002_v11 }
 0x4d3   : > { %v3004_v57 = vmul.f32 %v4468_v60, %v3003_v56 }
 0x4d5   : > { %v3008_v16 = vsel %vm3007_vm11, %v4468_v60, %v3004_v57  ;;  %vm7645_vm11 = vcmp.lt.s32.totalorder %v4920_v33, 72 }
 0x4d6   : > { %v3009_v14 = vmul.f32 %v3008_v16, %v2994_v61  ;;  %v3010_v27 = vmul.f32 %v3008_v16, %v2995_v54  ;;  %v3012_v15 = vmul.f32 %v3008_v16, %v2997_v45  ;;  %v3011_v40 = vmul.f32 %v3008_v16, %v2996_v44  ;;  %v7646_v54 = vld [vmem:[#allocation26_spill] sm:$0xff]  ;;  %v7647_v16 = vld [vmem:[#allocation25_spill] sm:$0xff] }
 0x4d8   : > { %vm3013_vm13 = vcmp.ge.f32.partialorder %v3009_v14, 0.0  ;;  %vm3014_vm3 = vcmp.ge.f32.partialorder %v3010_v27, 0.0  ;;  %vm3016_vm9 = vcmp.ge.f32.partialorder %v3012_v15, 0.0  ;;  %v3017_v43 = vmul.f32 0.01, %v3009_v14 }
 0x4d9   : > { %v3018_v21 = vmul.f32 0.01, %v3010_v27  ;;  %v3020_v20 = vmul.f32 0.01, %v3012_v15  ;;  %v3019_v1 = vmul.f32 0.01, %v3011_v40 }
 0x4da   : > { %v6053_v36 = vsel %vm3013_vm13, %v3009_v14, %v3017_v43  ;;  %vm3015_vm4 = vcmp.ge.f32.partialorder %v3011_v40, 0.0  ;;  %v7649_v43 = vld [vmem:[#allocation12_spill] sm:$0xff]  ;;  %vm7650_vm13 = vmmov %vm7641_vm7 }
 0x4db   : > { %7635 = vst [vmem:[#allocation71_spill] sm:$0xff] %v6053_v36  ;;  %v6055_v35 = vsel %vm3014_vm3, %v3010_v27, %v3018_v21  ;;  %v6057_v26 = vsel %vm3016_vm9, %v3012_v15, %v3020_v20  ;;  %3025 = vrot.lane.b32.xlu1 %v6053_v36, %s4507_s29  ;;  %v6096_v34 = vsel %vm3015_vm4, %v3011_v40, %v3019_v1  ;;  %v7648_v27 = vld [vmem:[#allocation14_spill] sm:$0xff]  ;;  %vm7653_vm3 = vmmov %vm7645_vm11  ;;  %vm7654_vm9 = vcmp.lt.s32.totalorder %v4920_v33, 65 }
 0x4dc   : > { %7636 = vst [vmem:[#allocation52_spill] sm:$0xff] %v6055_v35  ;;  %3027 = vrot.lane.b32.xlu2 %v6055_v35, %s4507_s29  ;;  %3031 = vrot.lane.b32.xlu0 %v6057_v26, %s4507_s29  ;;  %vm7655_vm4 = vmmov %vm7644_vm14 }
 0x4dd   : > { %7637 = vst [vmem:[#allocation19_spill] sm:$0xff] %v6057_v26 }
 0x4de   : > { %7638 = vst [vmem:[#allocation46_spill] sm:$0xff] %v6096_v34 }
 0x4e3   : > { %3093 = vrot.lane.b32.xlu1 %v6053_v36, %s4508_s30 }
 0x4e4   : > { %3099 = vrot.lane.b32.xlu2 %v6057_v26, %s4508_s30  ;;  %3237 = vrot.lane.b32.xlu0 %v6053_v36, %s4509_s5 }
 0x4eb   : > { %3239 = vrot.lane.b32.xlu1 %v6055_v35, %s4509_s5 }
 0x4ec   : > { %3243 = vrot.lane.b32.xlu2 %v6057_v26, %s4509_s5  ;;  %3045 = vrot.lane.b32.xlu0 %v6053_v36, %s4512_s8 }
 0x4f3   : > { %3047 = vrot.lane.b32.xlu1 %v6055_v35, %s4512_s8 }
 0x4f4   : > { %3051 = vrot.lane.b32.xlu2 %v6057_v26, %s4512_s8  ;;  %3095 = vrot.lane.b32.xlu0 %v6055_v35, %s4508_s30 }
 0x4fb   : > { %3113 = vrot.lane.b32.xlu1 %v6053_v36, %s4513_s9 }
 0x4fc   : > { %3119 = vrot.lane.b32.xlu2 %v6057_v26, %s4513_s9  ;;  %3257 = vrot.lane.b32.xlu0 %v6053_v36, %s4510_s6 }
 0x503   : > { %3259 = vrot.lane.b32.xlu1 %v6055_v35, %s4510_s6 }
 0x504   : > { %3263 = vrot.lane.b32.xlu2 %v6057_v26, %s4510_s6  ;;  %3305 = vrot.lane.b32.xlu0 %v6053_v36, %s4511_s7 }
 0x50b   : > { %3307 = vrot.lane.b32.xlu1 %v6055_v35, %s4511_s7 }
 0x50c   : > { %3311 = vrot.lane.b32.xlu2 %v6057_v26, %s4511_s7  ;;  %3029 = vrot.lane.b32.xlu0 %v6096_v34, %s4507_s29 }
 0x513   : > { %3065 = vrot.lane.b32.xlu1 %v6053_v36, %s4514_s10 }
 0x514   : > { %3067 = vrot.lane.b32.xlu2 %v6055_v35, %s4514_s10  ;;  %3071 = vrot.lane.b32.xlu0 %v6057_v26, %s4514_s10 }
 0x51b   : > { %3115 = vrot.lane.b32.xlu1 %v6055_v35, %s4513_s9 }
 0x51c   : > { %3133 = vrot.lane.b32.xlu2 %v6053_v36, %s4518_s14  ;;  %3139 = vrot.lane.b32.xlu0 %v6057_v26, %s4518_s14 }
 0x523   : > { %3161 = vrot.lane.b32.xlu1 %v6053_v36, %s4515_s11 }
 0x524   : > { %3163 = vrot.lane.b32.xlu2 %v6055_v35, %s4515_s11  ;;  %3167 = vrot.lane.b32.xlu0 %v6057_v26, %s4515_s11 }
 0x52b   : > { %3241 = vrot.lane.b32.xlu1 %v6096_v34, %s4509_s5 }
 0x52c   : > { %3277 = vrot.lane.b32.xlu2 %v6053_v36, %s4516_s12  ;;  %3279 = vrot.lane.b32.xlu0 %v6055_v35, %s4516_s12 }
 0x533   : > { %3283 = vrot.lane.b32.xlu1 %v6057_v26, %s4516_s12 }
 0x534   : > { %3357 = vrot.lane.b32.xlu2 %v6053_v36, %s4517_s13  ;;  %3359 = vrot.lane.b32.xlu0 %v6055_v35, %s4517_s13 }
 0x536   : > { %v6134_v12 = vpop.permute.xlu2 %3027 }
 0x53b   : > { %3361 = vrot.lane.b32.xlu1 %v6096_v34, %s4517_s13 }
 0x53c   : > { %3049 = vrot.lane.b32.xlu2 %v6096_v34, %s4512_s8  ;;  %3097 = vrot.lane.b32.xlu0 %v6096_v34, %s4508_s30 }
 0x53e   : > { %v6142_v4 = vpop.permute.xlu2 %3099 }
 0x53f   : > { %7639 = vst [vmem:[#allocation54_spill] sm:$0xff] %v6142_v4 }
 0x543   : > { %3135 = vrot.lane.b32.xlu1 %v6055_v35, %s4518_s14 }
 0x544   : > { %3181 = vrot.lane.b32.xlu2 %v6053_v36, %s4519_s16  ;;  %3183 = vrot.lane.b32.xlu0 %v6055_v35, %s4519_s16 }
 0x546   : > { %v6150_v6 = vpop.permute.xlu2 %3243 }
 0x547   : > { %7640 = vst [vmem:[#allocation70_spill] sm:$0xff] %v6150_v6 }
 0x54b   : > { %3187 = vrot.lane.b32.xlu1 %v6057_v26, %s4519_s16 }
 0x54c   : > { %3261 = vrot.lane.b32.xlu2 %v6096_v34, %s4510_s6  ;;  %3309 = vrot.lane.b32.xlu0 %v6096_v34, %s4511_s7 }
 0x54d   : > { %v3026_v24 = vpop.permute.xlu1 %3025 }
 0x54e   : > { %v6158_v53 = vpop.permute.xlu2 %3051  ;;  %v6160_v3 = vpop.permute.xlu0 %3031  ;;  %v3035_v20 = vsel %vm7650_vm13, %v3026_v24, %v6134_v12 }
 0x54f   : > { %v3036_v47 = vsel %vm7641_vm7, %v6160_v3, %v3026_v24  ;;  %v3038_v1 = vsel %vm5004_vm5, %v3035_v20, 0.0  ;;  %vm7658_vm7 = vcmp.lt.s32.totalorder %v4920_v33, 64 }
 0x550   : > { %v3037_v60 = vsel %vm4945_vm15, %v3036_v47, 0.0  ;;  %v3436_v58 = vsel %vm4953_vm12, %v3036_v47, 0.0  ;;  %v3433_v47 = vsel %vm4945_vm15, %v3035_v20, 0.0 }
 0x551   : > { %v3041_v45 = vmul.f32 %v3037_v60, %v7646_v54  ;;  %v3440_v14 = vmul.f32 %v3436_v58, %v7647_v16 }
 0x553   : > { %3333 = vrot.lane.b32.xlu1 %v6053_v36, %s4523_s19 }
 0x554   : > { %3335 = vrot.lane.b32.xlu2 %v6055_v35, %s4523_s19  ;;  %3337 = vrot.lane.b32.xlu0 %v6096_v34, %s4523_s19 }
 0x555   : > { %v6173_v23 = vpop.permute.xlu1 %3093 }
 0x556   : > { %v6171_v7 = vpop.permute.xlu2 %3119  ;;  %v3238_v62 = vpop.permute.xlu0 %3237  ;;  %v3104_v20 = vsel %vm7654_vm9, %v6142_v4, %v6173_v23 }
 0x557   : > { %7642 = vst [vmem:[#allocation68_spill] sm:$0xff] %v6171_v7  ;;  %v3248_v10 = vsel %vm7655_vm4, %v6150_v6, %v3238_v62 }
 0x55b   : > { %3377 = vrot.lane.b32.xlu1 %v6053_v36, %s4521_s17 }
 0x55c   : > { %3379 = vrot.lane.b32.xlu2 %v6055_v35, %s4521_s17  ;;  %3381 = vrot.lane.b32.xlu0 %v6096_v34, %s4521_s17 }
 0x55d   : > { %v6187_v11 = vpop.permute.xlu1 %3239 }
 0x55e   : > { %v6185_v55 = vpop.permute.xlu2 %3263  ;;  %v3046_v56 = vpop.permute.xlu0 %3045  ;;  %v3247_v57 = vsel %vm7644_vm14, %v3238_v62, %v6187_v11  ;;  %vm7660_vm14 = vcmp.lt.s32.totalorder %v4920_v33, 8 }
 0x55f   : > { %7643 = vst [vmem:[#allocation49_spill] sm:$0xff] %v6185_v55  ;;  %v3056_v61 = vsel %vm7645_vm11, %v6158_v53, %v3046_v56  ;;  %vm7666_vm11 = vmmov %vm7660_vm14 }
 0x560   : > { %v3057_v15 = vmul.f32 %v3056_v61, %v7648_v27  ;;  %v3444_v21 = vmul.f32 %v3056_v61, %v7649_v43 }
 0x562   : > { %v6202_v44 = vadd.f32 %v3057_v15, %v3041_v45  ;;  %v6204_v40 = vadd.f32 %v3444_v21, %v3440_v14  ;;  %v3042_v45 = vmul.f32 %v3038_v1, %v7646_v54  ;;  %v3437_v14 = vmul.f32 %v3433_v47, %v7647_v16 }
 0x563   : > { %3069 = vrot.lane.b32.xlu1 %v6096_v34, %s4514_s10  ;;  %v3468_v1 = vsel %vm4953_vm12, %v3104_v20, 0.0  ;;  %v3249_v47 = vsel %vm4945_vm15, %v3248_v10, 0.0 }
 0x564   : > { %3117 = vrot.lane.b32.xlu2 %v6096_v34, %s4513_s9  ;;  %3165 = vrot.lane.b32.xlu0 %v6096_v34, %s4515_s11  ;;  %v3253_v37 = vmul.f32 %v3249_v47, %v7663_v8 }
 0x565   : > { %v6218_v60 = vpop.permute.xlu1 %3047 }
 0x566   : > { %v6216_v24 = vpop.permute.xlu2 %3311  ;;  %v6220_v58 = vpop.permute.xlu0 %3095  ;;  %v3055_v61 = vsel %vm7653_vm3, %v3046_v56, %v6218_v60  ;;  %v3105_v56 = vsel %vm4945_vm15, %v3104_v20, 0.0  ;;  %v3472_v20 = vmul.f32 %v3468_v1, %v7659_v51  ;;  %v3250_v1 = vsel %vm5004_vm5, %v3247_v57, 0.0 }
 0x567   : > { %7651 = vst [vmem:[#allocation67_spill] sm:$0xff] %v6216_v24  ;;  %v3058_v15 = vmul.f32 %v3055_v61, %v7648_v27  ;;  %v3441_v21 = vmul.f32 %v3055_v61, %v7649_v43  ;;  %vm7669_vm3 = vcmp.lt.s32.totalorder %v4920_v33, 71  ;;  %v7672_v24 = vld [vmem:[#allocation35_spill] sm:$0xff] }
 0x568   : > { %7652 = vst [vmem:[#allocation58_spill] sm:$0xff] %v6220_v58  ;;  %vm7670_vm4 = vmmov %vm7669_vm3 }
 0x569   : > { %v3062_v30 = vadd.f32 %v3058_v15, %v3042_v45  ;;  %v3445_v49 = vadd.f32 %v3441_v21, %v3437_v14  ;;  %v7657_v45 = vld [vmem:[#allocation7_spill] sm:$0xff] }
 0x56a   : > { %v3109_v14 = vmul.f32 %v3105_v56, %v7657_v45 }
 0x56b   : > { %3201 = vrot.lane.b32.xlu1 %v6053_v36, %s4524_s20 }
 0x56c   : > { %3203 = vrot.lane.b32.xlu2 %v6055_v35, %s4524_s20  ;;  %3207 = vrot.lane.b32.xlu0 %v6057_v26, %s4524_s20 }
 0x56d   : > { %v6250_v62 = vpop.permute.xlu1 %3113 }
 0x56e   : > { %v6248_v61 = vpop.permute.xlu2 %3067  ;;  %v3258_v15 = vpop.permute.xlu0 %3257  ;;  %v3124_v21 = vsel %vm7658_vm7, %v6171_v7, %v6250_v62  ;;  %vm7673_vm7 = vmmov %vm7650_vm13 }
 0x56f   : > { %7656 = vst [vmem:[#allocation74_spill] sm:$0xff] %v6248_v61  ;;  %v3268_v22 = vsel %vm7660_vm14, %v6185_v55, %v3258_v15  ;;  %v3125_v10 = vmul.f32 %v3124_v21, %v7661_v19  ;;  %v3476_v5 = vmul.f32 %v3124_v21, %v7662_v52  ;;  %vm7675_vm14 = vcmp.lt.s32.totalorder %v4920_v33, 64 }
 0x570   : > { %v3269_v56 = vmul.f32 %v3268_v22, %v7664_v39 }
 0x571   : > { %v6265_v38 = vadd.f32 %v3125_v10, %v3109_v14  ;;  %v6267_v4 = vadd.f32 %v3476_v5, %v3472_v20  ;;  %v3254_v14 = vmul.f32 %v3250_v1, %v7663_v8 }
 0x572   : > { %v6269_v6 = vadd.f32 %v3269_v56, %v3253_v37 }
 0x573   : > { %3281 = vrot.lane.b32.xlu1 %v6096_v34, %s4516_s12 }
 0x574   : > { %3363 = vrot.lane.b32.xlu2 %v6057_v26, %s4517_s13  ;;  %3397 = vrot.lane.b32.xlu0 %v6053_v36, %s4522_s18  ;;  %v7671_v36 = vld [vmem:[#allocation9_spill] sm:$0xff] }
 0x575   : > { %v6281_v22 = vpop.permute.xlu1 %3259 }
 0x576   : > { %v6279_v47 = vpop.permute.xlu2 %3133  ;;  %v6283_v5 = vpop.permute.xlu0 %3305  ;;  %v3267_v37 = vsel %vm7666_vm11, %v3258_v15, %v6281_v22  ;;  %vm7676_vm11 = vcmp.lt.s32.totalorder %v4920_v33, 63 }
 0x577   : > { %7665 = vst [vmem:[#allocation42_spill] sm:$0xff] %v6283_v5  ;;  %v3270_v21 = vmul.f32 %v3267_v37, %v7664_v39 }
 0x579   : > { %v6290_v20 = vadd.f32 %v3270_v21, %v3254_v14 }
 0x57b   : > { %3399 = vrot.lane.b32.xlu1 %v6055_v35, %s4522_s18 }
 0x57c   : > { %3401 = vrot.lane.b32.xlu2 %v6096_v34, %s4522_s18  ;;  %3137 = vrot.lane.b32.xlu0 %v6096_v34, %s4518_s14 }
 0x57d   : > { %v6300_v10 = vpop.permute.xlu1 %3307 }
 0x57e   : > { %v6298_v57 = vpop.permute.xlu2 %3163  ;;  %7667 = vst [vmem:[#allocation33_spill] sm:$0xff] %v6300_v10  ;;  %v3030_v15 = vpop.permute.xlu0 %3029 }
 0x57f   : > { %v3033_v56 = vsel %vm7650_vm13, %v3030_v15, %v6160_v3  ;;  %v3103_v3 = vsel %vm7654_vm9, %v6173_v23, %v6220_v58  ;;  %vm7678_vm13 = vnez %v7677_v17  ;;  %vm7681_vm9 = vcmp.ge.s32.totalorder %v4920_v33, 64 }
 0x580   : > { %v3465_v58 = vsel %vm4945_vm15, %v3103_v3, 0.0 }
 0x583   : > { %3185 = vrot.lane.b32.xlu1 %v6096_v34, %s4519_s16 }
 0x584   : > { %3339 = vrot.lane.b32.xlu2 %v6057_v26, %s4523_s19  ;;  %3383 = vrot.lane.b32.xlu0 %v6057_v26, %s4521_s17 }
 0x585   : > { %v3066_v37 = vpop.permute.xlu1 %3065 }
 0x586   : > { %v6311_v1 = vpop.permute.xlu2 %3277  ;;  %v6313_v14 = vpop.permute.xlu0 %3071  ;;  %v3075_v21 = vsel %vm7669_vm3, %v3066_v37, %v6248_v61 }
 0x587   : > { %7668 = vst [vmem:[#allocation65_spill] sm:$0xff] %v6313_v14  ;;  %v3076_v7 = vsel %vm7670_vm4, %v6313_v14, %v3066_v37  ;;  %v3078_v55 = vsel %vm5078_vm2, %v3075_v21, 0.0  ;;  %v3449_v29 = vsel %vm7593_vm10, %v3075_v21, 0.0  ;;  %v3106_v14 = vsel %vm5004_vm5, %v3103_v3, 0.0 }
 0x588   : > { %v3077_v35 = vsel %vm7593_vm10, %v3076_v7, 0.0  ;;  %v3082_v61 = vmul.f32 %v3078_v55, %v7671_v36  ;;  %v3452_v10 = vsel %vm4979_vm8, %v3076_v7, 0.0  ;;  %v3453_v23 = vmul.f32 %v3449_v29, %v7672_v24 }
 0x589   : > { %v3081_v5 = vmul.f32 %v3077_v35, %v7671_v36  ;;  %v3456_v37 = vmul.f32 %v3452_v10, %v7672_v24  ;;  %v3034_v7 = vsel %vm7673_vm7, %v6134_v12, %v3030_v15  ;;  %v3110_v55 = vmul.f32 %v3106_v14, %v7657_v45 }
 0x58a   : > { %v6339_v18 = vadd.f32 %v3082_v61, %v3062_v30  ;;  %v6341_v21 = vadd.f32 %v3453_v23, %v3445_v49  ;;  %v3469_v61 = vmul.f32 %v3465_v58, %v7659_v51  ;;  %v3039_v12 = vsel %vm5251_vm6, %v3034_v7, 0.0 }
 0x58b   : > { %v3085_v29 = vadd.f32 %v3081_v5, %v6202_v44  ;;  %v3460_v35 = vadd.f32 %v3456_v37, %v6204_v40  ;;  %3205 = vrot.lane.b32.xlu1 %v6096_v34, %s4524_s20  ;;  %v3040_v5 = vsel %vm4953_vm12, %v3033_v56, 0.0  ;;  %v3434_v14 = vsel %vm5004_vm5, %v3034_v7, 0.0 }
 0x58c   : > { %3403 = vrot.lane.b32.xlu2 %v6057_v26, %s4522_s18  ;;  %v3435_v3 = vsel %vm5251_vm6, %v3033_v56, 0.0  ;;  %v3043_v56 = vmul.f32 %v3039_v12, %v7646_v54  ;;  %v3044_v26 = vmul.f32 %v3040_v5, %v7646_v54  ;;  %v3438_v34 = vmul.f32 %v3434_v14, %v7647_v16 }
 0x58d   : > { %v6356_v49 = vpop.permute.xlu1 %3115  ;;  %vm7682_vm4 = vcmp.lt.s32.totalorder %v7479_v9, 448  ;;  %vm7683_vm7 = vcmp.lt.s32.totalorder %v4920_v33, 72 }
 0x58e   : > { %v6354_v30 = vpop.permute.xlu2 %3357  ;;  %v6362_v44 = vpop.permute.xlu0 %3139  ;;  %v3123_v40 = vsel %vm7675_vm14, %v6250_v62, %v6356_v49  ;;  %vm7684_vm14 = vmmov %vm7683_vm7 }
 0x58f   : > { %7674 = vst [vmem:[#allocation59_spill] sm:$0xff] %v6362_v44  ;;  %v3144_v10 = vsel %vm7676_vm11, %v6362_v44, %v6279_v47  ;;  %v3126_v58 = vmul.f32 %v3123_v40, %v7661_v19  ;;  %v3473_v15 = vmul.f32 %v3123_v40, %v7662_v52  ;;  %vm7685_vm11 = vcmp.lt.s32.totalorder %v4920_v33, 57 }
 0x590   : > { %v3145_v62 = vsel %vm7593_vm10, %v3144_v10, 0.0  ;;  %v3484_v23 = vsel %vm4979_vm8, %v3144_v10, 0.0  ;;  %v3439_v10 = vmul.f32 %v3435_v3, %v7647_v16 }
 0x591   : > { %v3149_v37 = vmul.f32 %v3145_v62, %v7568_v13  ;;  %v3488_v44 = vmul.f32 %v3484_v23, %v7569_v63  ;;  %v6386_v24 = vadd.f32 %v3126_v58, %v3110_v55  ;;  %v6388_v36 = vadd.f32 %v3473_v15, %v3469_v61  ;;  %v7679_v23 = vld [vmem:[#allocation38_spill] sm:$0xff] }
 0x592   : > { %v3089_v62 = vsel %vm7678_vm13, %v3085_v29, 0.0  ;;  %vm7680_vm3 = vnez %v7679_v23  ;;  %vm7689_vm13 = vcmp.lt.s32.totalorder %v4920_v33, 9 }
 0x593   : > { %v3153_v40 = vadd.f32 %v3149_v37, %v6265_v38  ;;  %v3492_v7 = vadd.f32 %v3488_v44, %v6267_v4  ;;  %v3464_v55 = vsel %vm7680_vm3, %v3460_v35, 0.0  ;;  %vm7690_vm3 = vcmp.lt.s32.totalorder %v4920_v33, 7 }
 0x595   : > { %v3157_v61 = vsel %vm7681_vm9, %v3153_v40, 0.0  ;;  %v3496_v38 = vsel %vm7682_vm4, %v3492_v7, 0.0  ;;  %v3162_v12 = vpop.permute.xlu1 %3161  ;;  %v7691_v7 = vld [vmem:[#allocation11_spill] sm:$0xff]  ;;  %vm7692_vm9 = vcmp.lt.s32.totalorder %v4920_v33, 8  ;;  %vm7693_vm4 = vmmov %vm7690_vm3 }
 0x596   : > { %v3050_v4 = vpop.permute.xlu2 %3049  ;;  %v6404_v44 = vadd.f32 %v3157_v61, %v3089_v62  ;;  %v6406_v54 = vadd.f32 %v3496_v38, %v3464_v55  ;;  %v6414_v29 = vpop.permute.xlu0 %3167 }
 0x597   : > { %v3053_v17 = vsel %vm7683_vm7, %v3050_v4, %v6158_v53  ;;  %v3054_v16 = vsel %vm7684_vm14, %v6218_v60, %v3050_v4  ;;  %v6423_v15 = vsel %vm7685_vm11, %v6414_v29, %v3162_v12  ;;  %vm7694_vm7 = vcmp.lt.s32.totalorder %v4920_v33, 121 }
 0x598   : > { %v3059_v35 = vmul.f32 %v3054_v16, %v7648_v27  ;;  %v3060_v9 = vmul.f32 %v3053_v17, %v7648_v27  ;;  %v3442_v5 = vmul.f32 %v3054_v16, %v7649_v43  ;;  %v3443_v58 = vmul.f32 %v3053_v17, %v7649_v43  ;;  %vm7696_vm14 = vmmov %vm7694_vm7 }
 0x59a   : > { %v6425_v53 = vadd.f32 %v3059_v35, %v3043_v56  ;;  %v6427_v14 = vadd.f32 %v3060_v9, %v3044_v26  ;;  %v6429_v60 = vadd.f32 %v3442_v5, %v3438_v34  ;;  %v6431_v3 = vadd.f32 %v3443_v58, %v3439_v10 }
 0x59b   : > { %v2255_v58 = vadd.f32 %v6042_v32, %v6040_v42 }
 0x59c   : > { %7686 = vst [vmem:[#allocation61_spill] sm:$0xff] %v6429_v60 }
 0x59d   : > { %7687 = vst [vmem:[#allocation50_spill] sm:$0xff] %v6431_v3  ;;  %v6435_v27 = vpop.permute.xlu1 %3241 }
 0x59e   : > { %v6433_v37 = vpop.permute.xlu2 %3181  ;;  %v6437_v40 = vpop.permute.xlu0 %3279  ;;  %v3246_v43 = vsel %vm7689_vm13, %v6187_v11, %v6435_v27  ;;  %vm7700_vm13 = vcmp.lt.s32.totalorder %v4920_v33, 63 }
 0x59f   : > { %7688 = vst [vmem:[#allocation45_spill] sm:$0xff] %v6437_v40  ;;  %v3287_v26 = vsel %vm7690_vm3, %v6311_v1, %v6437_v40  ;;  %v3251_v62 = vsel %vm5251_vm6, %v3246_v43, 0.0  ;;  %vm7701_vm3 = vcmp.lt.s32.totalorder %v4920_v33, 56 }
 0x5a0   : > { %v3290_v34 = vsel %vm5078_vm2, %v3287_v26, 0.0 }
 0x5a1   : > { %v3294_v56 = vmul.f32 %v3290_v34, %v7691_v7  ;;  %v2256_v34 = vadd.f32 %v2255_v58, %v6044_v59 }
 0x5a3   : > { %v6451_v10 = vadd.f32 %v3294_v56, %v6290_v20  ;;  %v3255_v20 = vmul.f32 %v3251_v62, %v7663_v8  ;;  %v2257_v56 = vadd.f32 %v2256_v34, %v6046_v2 }
 0x5a5   : > { %v6457_v55 = vpop.permute.xlu1 %3283 }
 0x5a6   : > { %v6455_v23 = vpop.permute.xlu2 %3261  ;;  %v3360_v61 = vpop.permute.xlu0 %3359  ;;  %v3288_v38 = vsel %vm7693_vm4, %v6457_v55, %v6311_v1 }
 0x5a7   : > { %v3266_v11 = vsel %vm7692_vm9, %v6281_v22, %v6455_v23  ;;  %v6472_v17 = vsel %vm7694_vm7, %v6354_v30, %v3360_v61  ;;  %v3289_v16 = vsel %vm7593_vm10, %v3288_v38, 0.0  ;;  %vm7704_vm9 = vcmp.lt.s32.totalorder %v4920_v33, 65 }
 0x5a8   : > { %v3271_v4 = vmul.f32 %v3266_v11, %v7664_v39  ;;  %v3293_v22 = vmul.f32 %v3289_v16, %v7691_v7  ;;  %vm7711_vm7 = vcmp.lt.s32.totalorder %v4920_v33, 1 }
 0x5aa   : > { %v6477_v35 = vadd.f32 %v3271_v4, %v3255_v20  ;;  %v6480_v9 = vadd.f32 %v3293_v22, %v6269_v6  ;;  %v3171_v6 = vsel %vm7685_vm11, %v3162_v12, %v6298_v57  ;;  %vm7714_vm11 = vcmp.lt.s32.totalorder %v4920_v33, 64 }
 0x5ab   : > { %v3174_v62 = vsel %vm5004_vm5, %v3171_v6, 0.0  ;;  %v3497_v11 = vsel %vm4945_vm15, %v3171_v6, 0.0 }
 0x5ac   : > { %7695 = vst [vmem:[#allocation37_spill] sm:$0xff] %v6477_v35  ;;  %v3501_v22 = vmul.f32 %v3497_v11, %v7586_v0  ;;  %v7703_v11 = vld [vmem:[#allocation58_spill] sm:$0xff] }
 0x5ad   : > { %v6484_v5 = vpop.permute.xlu1 %3361 }
 0x5ae   : > { %v6482_v1 = vpop.permute.xlu2 %3335  ;;  %v6488_v43 = vpop.permute.xlu0 %3097  ;;  %v6493_v26 = vsel %vm7696_vm14, %v3360_v61, %v6484_v5  ;;  %v7698_v61 = vld [vmem:[#allocation22_spill] sm:$0xff]  ;;  %vm7713_vm14 = vmmov %vm7711_vm7 }
 0x5af   : > { %v3178_v4 = vmul.f32 %v3174_v62, %v7698_v61  ;;  %v3102_v42 = vsel %vm7704_vm9, %v7703_v11, %v6488_v43 }
 0x5b5   : > { %2258 = vadd.xlane.f32.xlu2 %v2257_v56  ;;  %v6506_v20 = vpop.permute.xlu1 %3135  ;;  %v7702_v56 = vld [vmem:[#allocation10_spill] sm:$0xff] }
 0x5b6   : > { %v6504_v38 = vpop.permute.xlu2 %3379  ;;  %7697 = vst [vmem:[#allocation5_spill] sm:$0xff] %v6506_v20  ;;  %v6509_v16 = vpop.permute.xlu0 %3183  ;;  %v3143_v12 = vsel %vm7700_vm13, %v6279_v47, %v6506_v20  ;;  %vm7715_vm13 = vmmov %vm7701_vm3  ;;  %v7782_v20 = vld [vmem:[#allocation59_spill] sm:$0xff] }
 0x5b7   : > { %7699 = vst [vmem:[#allocation4_spill] sm:$0xff] %v6509_v16  ;;  %v3191_v58 = vsel %vm7701_vm3, %v6433_v37, %v6509_v16  ;;  %v3146_v34 = vsel %vm5078_vm2, %v3143_v12, 0.0  ;;  %v3481_v6 = vsel %vm7593_vm10, %v3143_v12, 0.0  ;;  %vm7721_vm3 = vcmp.lt.s32.totalorder %v4920_v33, 127 }
 0x5b8   : > { %v3194_v62 = vmul.f32 %v3191_v58, %v7702_v56  ;;  %v3505_v2 = vmul.f32 %v3191_v58, %v5900_v46  ;;  %v3150_v59 = vmul.f32 %v3146_v34, %v7568_v13  ;;  %v3485_v47 = vmul.f32 %v3481_v6, %v7569_v63  ;;  %v7706_v34 = vld [vmem:[#allocation53_spill] sm:$0xff]  ;;  %vm7723_vm9 = vmmov %vm7721_vm3 }
 0x5b9   : > { %v3090_v58 = vsel %vm5209_vm0, %v6339_v18, 0.0  ;;  %vm7707_vm4 = vnez %v7706_v34  ;;  %v3107_v63 = vsel %vm5251_vm6, %v3102_v42, 0.0  ;;  %v3500_v18 = vsel %vm4953_vm12, %v6423_v15, 0.0 }
 0x5ba   : > { %v6532_v32 = vadd.f32 %v3194_v62, %v3178_v4  ;;  %v6534_v16 = vadd.f32 %v3505_v2, %v3501_v22  ;;  %v3154_v35 = vadd.f32 %v3150_v59, %v6386_v24  ;;  %v3489_v12 = vadd.f32 %v3485_v47, %v6388_v36  ;;  %v7710_v62 = vld [vmem:[#allocation67_spill] sm:$0xff] }
 0x5bb   : > { %v3461_v6 = vsel %vm7707_vm4, %v6341_v21, 0.0  ;;  %v3466_v4 = vsel %vm5004_vm5, %v3102_v42, 0.0  ;;  %v3173_v59 = vsel %vm4945_vm15, %v6423_v15, 0.0  ;;  %v7709_v21 = vld [vmem:[#allocation42_spill] sm:$0xff]  ;;  %v3504_v40 = vmul.f32 %v3500_v18, %v7586_v0 }
 0x5bc   : > { %v6548_v2 = vadd.f32 %v3154_v35, %v3090_v58  ;;  %v6550_v22 = vadd.f32 %v3489_v12, %v3461_v6  ;;  %v3316_v42 = vsel %vm7711_vm7, %v7710_v62, %v7709_v21  ;;  %v7712_v35 = vld [vmem:[#allocation33_spill] sm:$0xff]  ;;  %v3111_v58 = vmul.f32 %v3107_v63, %v7657_v45 }
 0x5bd   : > { %v6558_v24 = vpop.permute.xlu1 %3187  ;;  %v3315_v47 = vsel %vm7713_vm14, %v7709_v21, %v7712_v35  ;;  %v3470_v6 = vmul.f32 %v3466_v4, %v7659_v51  ;;  %v3177_v21 = vmul.f32 %v3173_v59, %v7698_v61  ;;  %v3317_v60 = vsel %vm4945_vm15, %v3316_v42, 0.0  ;;  %v7718_v59 = vld [vmem:[#allocation20_spill] sm:$0xff] }
 0x5be   : > { %v3118_v36 = vpop.permute.xlu2 %3117  ;;  %7708 = vst [vmem:[#allocation3_spill] sm:$0xff] %v6558_v24  ;;  %v3310_v12 = vpop.permute.xlu0 %3309  ;;  %v3192_v15 = vsel %vm7715_vm13, %v6558_v24, %v6433_v37  ;;  %v3318_v4 = vsel %vm5004_vm5, %v3315_v47, 0.0  ;;  %v3321_v18 = vmul.f32 %v3317_v60, %v7718_v59  ;;  %v7719_v42 = vld [vmem:[#allocation8_spill] sm:$0xff]  ;;  %vm7726_vm7 = vcmp.lt.s32.totalorder %v4920_v33, 9 }
 0x5bf   : > { %v3122_v11 = vsel %vm7714_vm11, %v6356_v49, %v3118_v36  ;;  %v3193_v49 = vmul.f32 %v3192_v15, %v7702_v56  ;;  %v3508_v3 = vmul.f32 %v3192_v15, %v5900_v46  ;;  %v3322_v56 = vmul.f32 %v3318_v4, %v7718_v59  ;;  %v7724_v4 = vld [vmem:[#allocation27_spill] sm:$0xff] }
 0x5c0   : > { %v3127_v13 = vmul.f32 %v3122_v11, %v7661_v19  ;;  %v3474_v7 = vmul.f32 %v3122_v11, %v7662_v52  ;;  %vm7730_vm14 = vcmp.lt.s32.totalorder %v4920_v33, 65  ;;  %vm7731_vm11 = vcmp.lt.s32.totalorder %v4920_v33, 1 }
 0x5c1   : > { %v6591_v24 = vadd.f32 %v3193_v49, %v3177_v21  ;;  %v6593_v11 = vadd.f32 %v3508_v3, %v3504_v40  ;;  %v7722_v3 = vld [vmem:[#allocation52_spill] sm:$0xff]  ;;  %vm7732_vm13 = vmmov %vm7731_vm11 }
 0x5c2   : > { %v6585_v37 = vadd.f32 %v3127_v13, %v3111_v58  ;;  %v6587_v63 = vadd.f32 %v3474_v7, %v3470_v6  ;;  %v7720_v13 = vld [vmem:[#allocation71_spill] sm:$0xff]  ;;  %v3326_v40 = vmul.f32 %v7722_v3, %v7719_v42  ;;  %v3301_v3 = vsel %vm7707_vm4, %v6480_v9, 0.0  ;;  %v7727_v9 = vld [vmem:[#allocation49_spill] sm:$0xff] }
 0x5c3   : > { %v3325_v58 = vmul.f32 %v7720_v13, %v7719_v42  ;;  %vm7728_vm4 = vcmp.lt.s32.totalorder %v4920_v33, 8 }
 0x5c4   : > { %7716 = vst [vmem:[#allocation2_spill] sm:$0xff] %v6585_v37  ;;  %v3330_v46 = vadd.f32 %v3326_v40, %v3322_v56  ;;  %v7725_v40 = vld [vmem:[#allocation70_spill] sm:$0xff] }
 0x5c5   : > { %7717 = vst [vmem:[#allocation26_spill] sm:$0xff] %v6587_v63  ;;  %v6599_v15 = vpop.permute.xlu1 %3333  ;;  %v3329_v21 = vadd.f32 %v3325_v58, %v3321_v18  ;;  %v3245_v34 = vsel %vm7726_vm7, %v6435_v27, %v7725_v40  ;;  %v3314_v27 = vsel %vm7732_vm13, %v7712_v35, %v3310_v12  ;;  %v7735_v40 = vld [vmem:[#allocation68_spill] sm:$0xff]  ;;  %vm7747_vm13 = vcmp.lt.s32.totalorder %v4920_v33, 57 }
 0x5c6   : > { %v6597_v0 = vpop.permute.xlu2 %3203  ;;  %v6603_v7 = vpop.permute.xlu0 %3337  ;;  %v3343_v47 = vsel %vm7721_vm3, %v6599_v15, %v6482_v1  ;;  %vm7736_vm3 = vcmp.lt.s32.totalorder %v4920_v33, 64 }
 0x5c7   : > { %v3342_v60 = vsel %vm7723_vm9, %v6482_v1, %v6603_v7  ;;  %v3345_v6 = vsel %vm7593_vm10, %v3343_v47, 0.0  ;;  %v3302_v1 = vsel %vm5209_vm0, %v6451_v10, 0.0  ;;  %v3265_v10 = vsel %vm7728_vm4, %v6455_v23, %v7727_v9 }
 0x5c8   : > { %v3346_v49 = vsel %vm5078_vm2, %v3342_v60, 0.0  ;;  %v3349_v13 = vmul.f32 %v3345_v6, %v7724_v4  ;;  %v7733_v6 = vld [vmem:[#allocation46_spill] sm:$0xff]  ;;  %v3121_v35 = vsel %vm7736_vm3, %v3118_v36, %v7735_v40  ;;  %vm7737_vm9 = vcmp.lt.s32.totalorder %v4920_v33, 121 }
 0x5c9   : > { %v3350_v63 = vmul.f32 %v3346_v49, %v7724_v4  ;;  %v7734_v49 = vld [vmem:[#allocation19_spill] sm:$0xff]  ;;  %vm7738_vm7 = vmmov %vm7737_vm9 }
 0x5ca   : > { %v3353_v37 = vadd.f32 %v3349_v13, %v3329_v21  ;;  %v3327_v21 = vmul.f32 %v7733_v6, %v7719_v42  ;;  %v3328_v13 = vmul.f32 %v7734_v49, %v7719_v42 }
 0x5cb   : > { %v3354_v61 = vadd.f32 %v3350_v63, %v3330_v46  ;;  %v3252_v46 = vsel %vm4953_vm12, %v3245_v34, 0.0  ;;  %v3313_v63 = vsel %vm7731_vm11, %v3310_v12, %v7710_v62  ;;  %v3369_v34 = vsel %vm4945_vm15, %v6472_v17, 0.0 }
 0x5cc   : > { %v6627_v47 = vadd.f32 %v3353_v37, %v3301_v3  ;;  %vm7739_vm15 = vcmp.lt.s32.totalorder %v4920_v33, 120 }
 0x5cd   : > { %v6629_v18 = vadd.f32 %v3354_v61, %v3302_v1  ;;  %v6631_v60 = vpop.permute.xlu1 %3377  ;;  %v7729_v61 = vld [vmem:[#allocation54_spill] sm:$0xff]  ;;  %v3256_v1 = vmul.f32 %v3252_v46, %v7663_v8  ;;  %v3319_v8 = vsel %vm5251_vm6, %v3314_v27, 0.0  ;;  %vm7740_vm4 = vmmov %vm7739_vm15 }
 0x5ce   : > { %v3364_v58 = vpop.permute.xlu2 %3363  ;;  %v6633_v56 = vpop.permute.xlu0 %3381  ;;  %v3101_v37 = vsel %vm7730_vm14, %v6488_v43, %v7729_v61  ;;  %v3272_v43 = vmul.f32 %v3265_v10, %v7664_v39  ;;  %v3320_v39 = vsel %vm4953_vm12, %v3313_v63, 0.0  ;;  %v3387_v17 = vsel %vm7740_vm4, %v6631_v60, %v6504_v38  ;;  %v7741_v63 = vld [vmem:[#allocation74_spill] sm:$0xff] }
 0x5cf   : > { %v3108_v62 = vsel %vm4953_vm12, %v3101_v37, 0.0  ;;  %v3467_v42 = vsel %vm5251_vm6, %v3101_v37, 0.0  ;;  %v3365_v46 = vsel %vm7737_vm9, %v6484_v5, %v3364_v58  ;;  %v3368_v36 = vsel %vm7738_vm7, %v3364_v58, %v6354_v30  ;;  %v7743_v27 = vld [vmem:[#allocation30_spill] sm:$0xff]  ;;  %vm7750_vm9 = vmmov %vm7747_vm13 }
 0x5d0   : > { %v3386_v48 = vsel %vm7739_vm15, %v6504_v38, %v6633_v56  ;;  %v3112_v9 = vmul.f32 %v3108_v62, %v7657_v45  ;;  %v3370_v5 = vsel %vm5004_vm5, %v6493_v26, 0.0  ;;  %v3128_v10 = vmul.f32 %v3121_v35, %v7661_v19  ;;  %v7745_v62 = vld [vmem:[#allocation65_spill] sm:$0xff] }
 0x5d1   : > { %v3475_v30 = vmul.f32 %v3121_v35, %v7662_v52  ;;  %v3471_v58 = vmul.f32 %v3467_v42, %v7659_v51  ;;  %v3323_v61 = vmul.f32 %v3319_v8, %v7718_v59  ;;  %v3324_v37 = vmul.f32 %v3320_v39, %v7718_v59  ;;  %v7744_v51 = vld [vmem:[#allocation24_spill] sm:$0xff]  ;;  %v7748_v39 = vld [vmem:[#allocation62_spill] sm:$0xff] }
 0x5d2   : > { %vm7742_vm14 = vcmp.lt.s32.totalorder %v4920_v33, 71  ;;  %v3371_v45 = vsel %vm5251_vm6, %v3365_v46, 0.0  ;;  %v3372_v26 = vsel %vm4953_vm12, %v3368_v36, 0.0  ;;  %v3390_v19 = vmul.f32 %v3386_v48, %v7743_v27 }
 0x5d3   : > { %v3389_v52 = vmul.f32 %v3387_v17, %v7743_v27  ;;  %v6709_v6 = vadd.f32 %v3272_v43, %v3256_v1  ;;  %v3373_v49 = vmul.f32 %v3369_v34, %v7744_v51  ;;  %v3374_v59 = vmul.f32 %v3370_v5, %v7744_v51  ;;  %vm7746_vm11 = vmmov %vm7742_vm14 }
 0x5d4   : > { %v6716_v35 = vadd.f32 %v3128_v10, %v3112_v9  ;;  %v6718_v42 = vadd.f32 %v3475_v30, %v3471_v58  ;;  %vm7749_vm3 = vnez %v7748_v39  ;;  %v6727_v34 = vadd.f32 %v3327_v21, %v3323_v61  ;;  %v7752_v30 = vld [vmem:[#allocation9_spill] sm:$0xff] }
 0x5d5   : > { %v3070_v3 = vpop.permute.xlu1 %3069  ;;  %v6729_v46 = vadd.f32 %v3328_v13, %v3324_v37  ;;  %v6732_v36 = vmul.f32 %v3371_v45, %v7744_v51  ;;  %v6739_v9 = vadd.f32 %v3390_v19, %v3374_v59  ;;  %vm7753_vm7 = vcmp.lt.s32.totalorder %v4920_v33, 55 }
 0x5d6   : > { %v6659_v23 = vpop.permute.xlu2 %3401  ;;  %v3166_v12 = vpop.permute.xlu0 %3165  ;;  %v3074_v38 = vsel %vm7742_vm14, %v7741_v63, %v3070_v3  ;;  %v3073_v40 = vsel %vm7746_vm11, %v3070_v3, %v7745_v62  ;;  %v6735_v3 = vmul.f32 %v3372_v26, %v7744_v51  ;;  %vm7754_vm15 = vmmov %vm7753_vm7  ;;  %vm7767_vm11 = vcmp.lt.s32.totalorder %v4920_v33, 127 }
 0x5d7   : > { %v6723_v8 = vsel %vm7747_vm13, %v6298_v57, %v3166_v12  ;;  %v3079_v1 = vsel %vm7749_vm3, %v3074_v38, 0.0  ;;  %v6741_v57 = vadd.f32 %v3389_v52, %v3373_v49  ;;  %v3169_v21 = vsel %vm7750_vm9, %v3166_v12, %v6414_v29  ;;  %v7755_v52 = vld [vmem:[#allocation34_spill] sm:$0xff]  ;;  %vm7768_vm13 = vmmov %vm7767_vm11 }
 0x5d8   : > { %v3080_v13 = vsel %vm4979_vm8, %v3073_v40, 0.0  ;;  %v3175_v10 = vsel %vm5251_vm6, %v6723_v8, 0.0  ;;  %v3083_v58 = vmul.f32 %v3079_v1, %v7752_v30  ;;  %v3450_v26 = vsel %vm5078_vm2, %v3074_v38, 0.0  ;;  %v7756_v1 = vld [vmem:[#allocation17_spill] sm:$0xff] }
 0x5d9   : > { %v3451_v19 = vsel %vm7749_vm3, %v3073_v40, 0.0  ;;  %v3176_v59 = vsel %vm4953_vm12, %v3169_v21, 0.0  ;;  %v3498_v62 = vsel %vm5004_vm5, %v6723_v8, 0.0  ;;  %v3499_v38 = vsel %vm5251_vm6, %v3169_v21, 0.0 }
 0x5da   : > { %v3084_v40 = vmul.f32 %v3080_v13, %v7752_v30  ;;  %vm7759_vm5 = vnez %v7758_v28  ;;  %v7760_v13 = vld [vmem:[#allocation41_spill] sm:$0xff]  ;;  %vm7762_vm12 = vcmp.lt.s32.totalorder %v4920_v33, 7 }
 0x5db   : > { %vm7761_vm6 = vnez %v7760_v13  ;;  %vm7773_vm9 = vmmov %vm7762_vm12 }
 0x5dd   : > { %v3202_v43 = vpop.permute.xlu1 %3201 }
 0x5de   : > { %v3340_v48 = vpop.permute.xlu2 %3339  ;;  %v6737_v17 = vpop.permute.xlu0 %3207  ;;  %v3211_v61 = vsel %vm7753_vm7, %v3202_v43, %v6597_v0  ;;  %vm7775_vm7 = vcmp.lt.s32.totalorder %v4920_v33, 119 }
 0x5df   : > { %v3212_v37 = vsel %vm7754_vm15, %v6737_v17, %v3202_v43  ;;  %v3214_v12 = vsel %vm5078_vm2, %v3211_v61, 0.0  ;;  %v3513_v63 = vsel %vm7593_vm10, %v3211_v61, 0.0  ;;  %vm7776_vm15 = vmmov %vm7775_vm7 }
 0x5e0   : > { %v3213_v29 = vsel %vm7593_vm10, %v3212_v37, 0.0  ;;  %v3516_v45 = vsel %vm4979_vm8, %v3212_v37, 0.0  ;;  %v3218_v49 = vmul.f32 %v3214_v12, %v7755_v52  ;;  %v3517_v43 = vmul.f32 %v3513_v63, %v7756_v1  ;;  %v7757_v12 = vld [vmem:[#allocation35_spill] sm:$0xff] }
 0x5e1   : > { %v3217_v51 = vmul.f32 %v3213_v29, %v7755_v52  ;;  %v3520_v61 = vmul.f32 %v3516_v45, %v7756_v1  ;;  %v3454_v50 = vmul.f32 %v3450_v26, %v7757_v12  ;;  %v3455_v52 = vmul.f32 %v3451_v19, %v7757_v12 }
 0x5e2   : > { %v3222_v29 = vadd.f32 %v3218_v49, %v6532_v32  ;;  %v3521_v41 = vadd.f32 %v3517_v43, %v6534_v16  ;;  %v6789_v45 = vadd.f32 %v3083_v58, %v6425_v53  ;;  %v7765_v58 = vld [vmem:[#allocation40_spill] sm:$0xff]  ;;  %v3088_v43 = vadd.f32 %v3084_v40, %v6427_v14  ;;  %v7777_v40 = vld [vmem:[#allocation31_spill] sm:$0xff] }
 0x5e3   : > { %v3221_v37 = vadd.f32 %v3217_v51, %v6591_v24  ;;  %v3524_v8 = vadd.f32 %v3520_v61, %v6593_v11  ;;  %v7763_v11 = vld [vmem:[#allocation69_spill] sm:$0xff]  ;;  %vm7766_vm14 = vnez %v7765_v58  ;;  %v3341_v51 = vsel %vm7767_vm11, %v6603_v7, %v3340_v48  ;;  %vm7786_vm11 = vmmov %vm7775_vm7 }
 0x5e4   : > { %v3226_v24 = vsel %vm7761_vm6, %v3222_v29, 0.0  ;;  %vm7764_vm4 = vnez %v7763_v11  ;;  %v7769_v61 = vld [vmem:[#allocation61_spill] sm:$0xff]  ;;  %v7770_v29 = vld [vmem:[#allocation50_spill] sm:$0xff]  ;;  %v3347_v14 = vsel %vm7749_vm3, %v3341_v51, 0.0 }
 0x5e5   : > { %v3282_v63 = vpop.permute.xlu1 %3281  ;;  %v3225_v21 = vsel %vm7759_vm5, %v3221_v37, 0.0  ;;  %v6802_v16 = vadd.f32 %v6548_v2, %v3226_v24  ;;  %v3525_v53 = vsel %vm7764_vm4, %v3521_v41, 0.0  ;;  %v3528_v19 = vsel %vm7766_vm14, %v3524_v8, 0.0  ;;  %v7771_v41 = vld [vmem:[#allocation22_spill] sm:$0xff] }
 0x5e6   : > { %v3398_v30 = vpop.permute.xlu0 %3397  ;;  %v3285_v32 = vsel %vm7762_vm12, %v3282_v63, %v6457_v55  ;;  %v6799_v26 = vadd.f32 %v6404_v44, %v3225_v21  ;;  %v3344_v55 = vsel %vm7768_vm13, %v3340_v48, %v6599_v15  ;;  %v6815_v44 = vadd.f32 %v6550_v22, %v3525_v53  ;;  %v3404_v49 = vpop.permute.xlu2 %3403  ;;  %v7772_v22 = vld [vmem:[#allocation45_spill] sm:$0xff]  ;;  %v7774_v48 = vld [vmem:[#allocation11_spill] sm:$0xff]  ;;  %v7778_v21 = vld [vmem:[#allocation36_spill] sm:$0xff] }
 0x5e7   : > { %v6818_v2 = vadd.f32 %v6406_v54, %v3528_v19  ;;  %v3458_v37 = vadd.f32 %v3454_v50, %v7769_v61  ;;  %v3459_v12 = vadd.f32 %v3455_v52, %v7770_v29  ;;  %v3292_v7 = vsel %vm4979_vm8, %v3285_v32, 0.0  ;;  %v7780_v53 = vld [vmem:[#allocation39_spill] sm:$0xff]  ;;  %vm7787_vm13 = vmmov %vm7775_vm7 }
 0x5e8   : > { %v6826_v8 = vmul.f32 %v3175_v10, %v7771_v41  ;;  %v6829_v15 = vmul.f32 %v3176_v59, %v7771_v41  ;;  %v3286_v54 = vsel %vm7773_vm9, %v7772_v22, %v3282_v63  ;;  %v3296_v28 = vmul.f32 %v3292_v7, %v7774_v48 }
 0x5e9   : > { %v3348_v52 = vsel %vm4979_vm8, %v3344_v55, 0.0  ;;  %v3405_v10 = vsel %vm7775_vm7, %v6659_v23, %v3404_v49  ;;  %v3408_v59 = vsel %vm7776_vm15, %v3404_v49, %v3398_v30  ;;  %v6845_v50 = vmul.f32 %v3498_v62, %v7777_v40 }
 0x5ea   : > { %v6848_v63 = vmul.f32 %v3499_v38, %v7777_v40  ;;  %vm7779_vm5 = vnez %v7778_v21  ;;  %v6854_v32 = vadd.f32 %v3296_v28, %v6709_v6  ;;  %vm7781_vm12 = vnez %v7780_v53  ;;  %v7788_v28 = vld [vmem:[#allocation21_spill] sm:$0xff] }
 0x5eb   : > { %v3091_v24 = vsel %vm7779_vm5, %v6789_v45, 0.0  ;;  %v3092_v58 = vsel %vm7781_vm12, %v3088_v43, 0.0  ;;  %v3462_v19 = vsel %vm5209_vm0, %v3458_v37, 0.0  ;;  %v3463_v62 = vsel %vm7779_vm5, %v3459_v12, 0.0  ;;  %v7784_v37 = vld [vmem:[#allocation5_spill] sm:$0xff] }
 0x5ec   : > { %v3291_v38 = vsel %vm7749_vm3, %v3286_v54, 0.0  ;;  %v3351_v55 = vmul.f32 %v3347_v14, %v7724_v4  ;;  %v3352_v45 = vmul.f32 %v3348_v52, %v7724_v4  ;;  %v3411_v6 = vsel %vm7749_vm3, %v3405_v10, 0.0  ;;  %v7789_v10 = vld [vmem:[#allocation73_spill] sm:$0xff] }
 0x5ed   : > { %v3400_v51 = vpop.permute.xlu1 %3399  ;;  %v3412_v49 = vsel %vm4979_vm8, %v3408_v59, 0.0  ;;  %vm7783_vm0 = vcmp.lt.s32.totalorder %v4920_v33, 63  ;;  %v3295_v7 = vmul.f32 %v3291_v38, %v7774_v48  ;;  %v7790_v59 = vld [vmem:[#allocation13_spill] sm:$0xff]  ;;  %vm7798_vm7 = vcmp.lt.s32.totalorder %v4920_v33, 120 }
 0x5ee   : > { %v3138_v43 = vpop.permute.xlu0 %3137  ;;  %vm7785_vm14 = vmmov %vm7783_vm0  ;;  %v3406_v12 = vsel %vm7786_vm11, %v3400_v51, %v6659_v23  ;;  %v3407_v4 = vsel %vm7787_vm13, %v3398_v30, %v3400_v51  ;;  %v3415_v48 = vmul.f32 %v3411_v6, %v7790_v59 }
 0x5ef   : > { %v3141_v61 = vsel %vm7783_vm0, %v3138_v43, %v7782_v20  ;;  %v3142_v29 = vsel %vm7785_vm14, %v7784_v37, %v3138_v43  ;;  %v3409_v38 = vsel %vm7593_vm10, %v3407_v4, 0.0  ;;  %v3410_v51 = vsel %vm5078_vm2, %v3406_v12, 0.0  ;;  %v7791_v43 = vld [vmem:[#allocation2_spill] sm:$0xff]  ;;  %vm7799_vm15 = vmmov %vm7798_vm7 }
 0x5f0   : > { %v3147_v41 = vsel %vm7749_vm3, %v3142_v29, 0.0  ;;  %v3148_v22 = vsel %vm4979_vm8, %v3141_v61, 0.0  ;;  %v3482_v54 = vsel %vm5078_vm2, %v3142_v29, 0.0  ;;  %v3483_v23 = vsel %vm7749_vm3, %v3141_v61, 0.0  ;;  %v7792_v29 = vld [vmem:[#allocation26_spill] sm:$0xff] }
 0x5f1   : > { %v3151_v14 = vmul.f32 %v3147_v41, %v7788_v28  ;;  %v3152_v52 = vmul.f32 %v3148_v22, %v7788_v28  ;;  %v3486_v30 = vmul.f32 %v3482_v54, %v7789_v10  ;;  %v3487_v40 = vmul.f32 %v3483_v23, %v7789_v10  ;;  %v7793_v54 = vld [vmem:[#allocation37_spill] sm:$0xff] }
 0x5f2   : > { %v3413_v61 = vmul.f32 %v3409_v38, %v7790_v59  ;;  %v3416_v22 = vmul.f32 %v3412_v49, %v7790_v59  ;;  %v3299_v6 = vadd.f32 %v3295_v7, %v7793_v54  ;;  %v3414_v25 = vmul.f32 %v3410_v51, %v7790_v59  ;;  %v7796_v38 = vld [vmem:[#allocation4_spill] sm:$0xff]  ;;  %v7800_v59 = vld [vmem:[#allocation10_spill] sm:$0xff] }
 0x5f3   : > { %v3155_v20 = vadd.f32 %v3151_v14, %v7791_v43  ;;  %v3156_v37 = vadd.f32 %v3152_v52, %v6716_v35  ;;  %v3490_v41 = vadd.f32 %v3486_v30, %v7792_v29  ;;  %v3491_v28 = vadd.f32 %v3487_v40, %v6718_v42  ;;  %v7794_v30 = vld [vmem:[#allocation3_spill] sm:$0xff] }
 0x5f4   : > { %v3417_v12 = vadd.f32 %v3413_v61, %v6741_v57  ;;  %v3418_v35 = vadd.f32 %v3414_v25, %v6739_v9  ;;  %vm7795_vm10 = vcmp.lt.s32.totalorder %v4920_v33, 56  ;;  %v3303_v11 = vsel %vm7779_vm5, %v3299_v6, 0.0  ;;  %v7808_v25 = vld [vmem:[#allocation34_spill] sm:$0xff] }
 0x5f5   : > { %v3231_v4 = vadd.f32 %v3155_v20, %v3091_v24  ;;  %v3232_v23 = vadd.f32 %v3156_v37, %v3092_v58  ;;  %v3530_v10 = vadd.f32 %v3490_v41, %v3462_v19  ;;  %v3186_v14 = vpop.permute.xlu1 %3185  ;;  %v3531_v43 = vadd.f32 %v3491_v28, %v3463_v62  ;;  %vm7797_vm9 = vmmov %vm7795_vm10 }
 0x5f6   : > { %v3384_v52 = vpop.permute.xlu0 %3383  ;;  %v3189_v49 = vsel %vm7795_vm10, %v3186_v14, %v7794_v30  ;;  %v3190_v42 = vsel %vm7797_vm9, %v7796_v38, %v3186_v14  ;;  %v3304_v24 = vsel %vm7781_vm12, %v6854_v32, 0.0  ;;  %v3421_v57 = vsel %vm7764_vm4, %v3417_v12, 0.0 }
 0x5f7   : > { %v3385_v9 = vsel %vm7798_vm7, %v6633_v56, %v3384_v52  ;;  %v3388_v58 = vsel %vm7799_vm15, %v3384_v52, %v6631_v60  ;;  %v3422_v19 = vsel %vm7761_vm6, %v3418_v35, 0.0  ;;  %v3429_v62 = vadd.f32 %v6627_v47, %v3421_v57  ;;  %v7801_v47 = vld [vmem:[#allocation48_spill] sm:$0xff] }
 0x5f8   : > { %v3391_v7 = vmul.f32 %v3385_v9, %v7743_v27  ;;  %v3392_v32 = vmul.f32 %v3388_v58, %v7743_v27  ;;  %v3430_v53 = vadd.f32 %v6629_v18, %v3422_v19  ;;  %v3195_v56 = vmul.f32 %v3190_v42, %v7800_v59 }
 0x5f9   : > { %v3196_v40 = vmul.f32 %v3189_v49, %v7800_v59  ;;  %v3537_v60 = vadd.f32 %v3429_v62, %v6799_v26  ;;  %v3507_v37 = vmul.f32 %v3189_v49, %v7801_v47  ;;  %v3355_v29 = vadd.f32 %v3351_v55, %v6727_v34  ;;  %v7802_v55 = vld [vmem:[#allocation23_spill] sm:$0xff] }
 0x5fa   : > { %v3395_v51 = vadd.f32 %v3391_v7, %v6732_v36  ;;  %v3396_v20 = vadd.f32 %v3392_v32, %v6735_v3  ;;  %v3356_v27 = vadd.f32 %v3352_v45, %v6729_v46  ;;  %v3538_v21 = vadd.f32 %v3430_v53, %v6802_v16  ;;  %v7804_v16 = vld [vmem:[#allocation56_spill] sm:$0xff] }
 0x5fb   : > { %v3200_v18 = vadd.f32 %v3196_v40, %v6829_v15  ;;  %v3511_v54 = vadd.f32 %v3507_v37, %v6848_v63  ;;  %v6946_v26 = vadd.f32 %v3537_v60, %v6815_v44  ;;  %v3427_v36 = vadd.f32 %v3355_v29, %v3303_v11 }
 0x5fc   : > { %v3419_v41 = vadd.f32 %v3415_v48, %v3395_v51  ;;  %v3420_v61 = vadd.f32 %v3416_v22, %v3396_v20  ;;  %v3428_v6 = vadd.f32 %v3356_v27, %v3304_v24  ;;  %v3199_v3 = vadd.f32 %v3195_v56, %v6826_v8  ;;  %v7810_v20 = vld [vmem:[#allocation51_spill] sm:$0xff]  ;;  %v7812_v27 = vld [vmem:[#allocation72_spill] sm:$0xff] }
 0x5fd   : > { %v3506_v28 = vmul.f32 %v3190_v42, %v7801_v47  ;;  %v3206_v34 = vpop.permute.xlu1 %3205  ;;  %vm7803_vm4 = vnez %v7802_v55  ;;  %vm7805_vm5 = vnez %v7804_v16  ;;  %vm7806_vm12 = vcmp.lt.s32.totalorder %v4920_v33, 55  ;;  %v7811_v47 = vld [vmem:[#allocation16_spill] sm:$0xff] }
 0x5fe   : > { %v3423_v46 = vsel %vm7803_vm4, %v3419_v41, 0.0  ;;  %v3424_v15 = vsel %vm7805_vm5, %v3420_v61, 0.0  ;;  %v3209_v63 = vsel %vm7806_vm12, %v3206_v34, %v6737_v17  ;;  %vm7807_vm0 = vmmov %vm7806_vm12  ;;  %v2262_v37 = vmul.f32 %v7811_v47, %v7811_v47 }
 0x5ff   : > { %v3210_v44 = vsel %vm7807_vm0, %v6597_v0, %v3206_v34  ;;  %v3431_v45 = vadd.f32 %v3427_v36, %v3423_v46  ;;  %v3432_v48 = vadd.f32 %v3428_v6, %v3424_v15  ;;  %v3216_v22 = vsel %vm4979_vm8, %v3209_v63, 0.0 }
 0x600   : > { %v3215_v8 = vsel %vm7749_vm3, %v3210_v44, 0.0  ;;  %v3220_v14 = vmul.f32 %v3216_v22, %v7808_v25  ;;  %v3514_v35 = vsel %vm5078_vm2, %v3210_v44, 0.0  ;;  %v3515_v17 = vsel %vm7749_vm3, %v3209_v63, 0.0 }
 0x601   : > { %v3219_v12 = vmul.f32 %v3215_v8, %v7808_v25  ;;  %v3510_v33 = vadd.f32 %v3506_v28, %v6845_v50  ;;  %v3518_v0 = vmul.f32 %v3514_v35, %v7756_v1  ;;  %v3519_v52 = vmul.f32 %v3515_v17, %v7756_v1 }
 0x602   : > { %v3224_v49 = vadd.f32 %v3220_v14, %v3200_v18  ;;  %vm7817_vm15 = vcmask 1040384   ;;  %vm7820_vm12 = vcmask 1043459  }
 0x603   : > { %v3223_v30 = vadd.f32 %v3219_v12, %v3199_v3  ;;  %v3522_v5 = vadd.f32 %v3518_v0, %v3510_v33  ;;  %v3523_v38 = vadd.f32 %v3519_v52, %v3511_v54 }
 0x604   : > { %v3228_v31 = vsel %vm7805_vm5, %v3224_v49, 0.0  ;;  %vm7819_vm5 = vcmask 1042434  }
 0x605   : > { %v3227_v42 = vsel %vm7803_vm4, %v3223_v30, 0.0  ;;  %v3236_v57 = vadd.f32 %v3232_v23, %v3228_v31  ;;  %v3526_v39 = vsel %vm7761_vm6, %v3522_v5, 0.0  ;;  %v3527_v50 = vsel %vm7803_vm4, %v3523_v38, 0.0  ;;  %vm7821_vm0 = vmmov %vm7819_vm5 }
 0x606   : > { %v3235_v24 = vadd.f32 %v3231_v4, %v3227_v42  ;;  %v3534_v9 = vadd.f32 %v3530_v10, %v3526_v39  ;;  %v3535_v1 = vadd.f32 %v3531_v43, %v3527_v50  ;;  %v3550_v4 = vmul.f32 %v6946_v26, %v6946_v26  ;;  %v7809_v10 = vld [vmem:[#allocation60_spill] sm:$0xff] }
 0x607   : > { %v3540_v19 = vadd.f32 %v3432_v48, %v3236_v57  ;;  %v2261_v43 = vmul.f32 %v7809_v10, %v7809_v10  ;;  %vm7818_vm4 = vcmask 1041409  }
 0x608   : > { %v3539_v58 = vadd.f32 %v3431_v45, %v3235_v24  ;;  %v3542_v62 = vadd.f32 %v3538_v21, %v3534_v9  ;;  %v2263_v21 = vmul.f32 %v7812_v27, %v7812_v27 }
 0x609   : > { %v3544_v32 = vadd.f32 %v3540_v19, %v6818_v2  ;;  %v2260_v2 = vmul.f32 %v7810_v20, %v7810_v20 }
 0x60a   : > { %v3543_v7 = vadd.f32 %v3539_v58, %v3535_v1  ;;  %v3545_v11 = vadd.f32 %v3542_v62, %v6946_v26  ;;  %v3551_v23 = vmul.f32 %v3542_v62, %v3542_v62 }
 0x60b   : > { %v3553_v40 = vmul.f32 %v3544_v32, %v3544_v32  ;;  %v2264_v29 = vadd.f32 %v2261_v43, %v2260_v2 }
 0x60c   : > { %v3552_v53 = vmul.f32 %v3543_v7, %v3543_v7  ;;  %v3546_v13 = vadd.f32 %v3545_v11, %v3543_v7  ;;  %v3554_v59 = vadd.f32 %v3551_v23, %v3550_v4 }
 0x60d   : > { %v2265_v18 = vadd.f32 %v2264_v29, %v2262_v37 }
 0x60e   : > { %v3547_v56 = vadd.f32 %v3546_v13, %v3544_v32  ;;  %v3555_v60 = vadd.f32 %v3554_v59, %v3552_v53  ;;  %v7813_v53 = vld [vmem:[#allocation64_spill] sm:$0xff]  ;;  %v7814_v13 = vld [vmem:[#allocation63_spill] sm:$0xff] }
 0x60f   : > { %v2266_v41 = vadd.f32 %v2265_v18, %v2263_v21 }
 0x610   : > { %3548 = vadd.xlane.f32.xlu0 %v3547_v56  ;;  %v3556_v51 = vadd.f32 %v3555_v60, %v3553_v40 }
 0x612   : > { %3557 = vadd.xlane.f32.xlu1 %v3556_v51  ;;  %v7815_v51 = vld [vmem:[#allocation47_spill] sm:$0xff] }
 0x61a   : > { %2267 = vadd.xlane.f32.xlu1 %v2266_v41 }
 0x628   : > { %v2259_v28 = vpop.xlane.xlu2 %2258 }
 0x629   : > { %v6993_v55 = vmul.f32 0.001953125, %v2259_v28 }
 0x62b   : > { %v2271_v44 = vmul.f32 %v6993_v55, %v6993_v55  ;;  %v2276_v4 = vsub.f32 %v7811_v47, %v6993_v55  ;;  %v2277_v56 = vsub.f32 %v7812_v27, %v6993_v55 }
 0x683   : > { %v3549_v61 = vpop.xlane.xlu0 %3548 }
 0x684   : > { %v3559_v54 = vmul.f32 0.001953125, %v3549_v61 }
 0x685   : > { %v3558_v36 = vpop.xlane.xlu1 %3557 }
 0x686   : > { %v3560_v6 = vmul.f32 0.001953125, %v3558_v36  ;;  %v3561_v3 = vmul.f32 %v3559_v54, %v3559_v54  ;;  %v3567_v52 = vsub.f32 %v3544_v32, %v3559_v54  ;;  %v3564_v30 = vsub.f32 %v6946_v26, %v3559_v54 }
 0x687   : > { %v3565_v49 = vsub.f32 %v3542_v62, %v3559_v54  ;;  %v3566_v5 = vsub.f32 %v3543_v7, %v3559_v54  ;;  %v2274_v26 = vsub.f32 %v7810_v20, %v6993_v55  ;;  %v2275_v7 = vsub.f32 %v7809_v10, %v6993_v55  ;;  %v7816_v55 = vld [vmem:[#allocation66_spill] sm:$0xff] }
 0x688   : > { %v3562_v34 = vsub.f32 %v3560_v6, %v3561_v3 }
 0x68a   : > { %v3563_v46 = vmax.f32 %v3562_v34, 0.0 }
 0x68c   : > { %v3568_v16 = vadd.f32 1e-05, %v3563_v46 }
 0x68d   : > { %v2268_v15 = vpop.xlane.xlu1 %2267 }
 0x68e   : > { %4469 = vrsqrt.f32 %v3568_v16  ;;  %v2270_v63 = vmul.f32 0.001953125, %v2268_v15  ;;  %vm3575_vm8 = vweird.f32 %v3568_v16 }
 0x690   : > { %v2272_v45 = vsub.f32 %v2270_v63, %v2271_v44 }
 0x692   : > { %v2273_v48 = vmax.f32 %v2272_v45, 0.0 }
 0x694   : > { %v4470_v8 = vpop.eup %4469  ;;  %v2278_v22 = vadd.f32 1e-05, %v2273_v48 }
 0x695   : > { %v3570_v25 = vmul.f32 %v4470_v8, %v3568_v16  ;;  %vm3576_vm2 = vweird.f32 %v4470_v8 }
 0x696   : > { %4471 = vrsqrt.f32 %v2278_v22  ;;  %vm3577_vm3 = vmor %vm3575_vm8, %vm3576_vm2  ;;  %vm2285_vm14 = vweird.f32 %v2278_v22  ;;  %vm7823_vm8 = vcmask 1044484  }
 0x697   : > { %v3571_v12 = vmul.f32 %v4470_v8, %v3570_v25  ;;  %vm7822_vm2 = vmmov %vm7820_vm12 }
 0x699   : > { %v3572_v14 = vmul.f32 0.5, %v3571_v12 }
 0x69b   : > { %v3573_v35 = vsub.f32 1.5, %v3572_v14 }
 0x69c   : > { %v4472_v17 = vpop.eup %4471 }
 0x69d   : > { %v3574_v33 = vmul.f32 %v4470_v8, %v3573_v35  ;;  %v2280_v0 = vmul.f32 %v4472_v17, %v2278_v22  ;;  %vm2286_vm6 = vweird.f32 %v4472_v17 }
 0x69e   : > { %vm2287_vm11 = vmor %vm2285_vm14, %vm2286_vm6  ;;  %vm7825_vm6 = vcmask 1041408   ;;  %vm7826_vm14 = vcmask 1042433  }
 0x69f   : > { %v3578_v38 = vsel %vm3577_vm3, %v4470_v8, %v3574_v33  ;;  %v2281_v42 = vmul.f32 %v4472_v17, %v2280_v0  ;;  %vm7824_vm3 = vcmask 1045509  }
 0x6a0   : > { %v3579_v31 = vmul.f32 %v3578_v38, %v3564_v30  ;;  %v3580_v24 = vmul.f32 %v3578_v38, %v3565_v49  ;;  %v3581_v57 = vmul.f32 %v3578_v38, %v3566_v5  ;;  %v3582_v39 = vmul.f32 %v3578_v38, %v3567_v52 }
 0x6a1   : > { %v2282_v50 = vmul.f32 0.5, %v2281_v42 }
 0x6a2   : > { %v6998_v9 = vand.u32 4294901760, %v3579_v31  ;;  %v7000_v1 = vand.u32 4294901760, %v3580_v24  ;;  %v7002_v58 = vand.u32 4294901760, %v3581_v57  ;;  %v7004_v19 = vand.u32 4294901760, %v3582_v39 }
 0x6a3   : > { %v2283_v62 = vsub.f32 1.5, %v2282_v50 }
 0x6a4   : > { %3599 = vmatpush.msra.mxu0 %v6998_v9  ;;  %3675 = vmatpush.msra.mxu3 %v6998_v9  ;;  %v3625_v32 = vsub.f32 %v3579_v31, %v6998_v9  ;;  %v3771_v11 = vsub.f32 %v3580_v24, %v7000_v1  ;;  %v7019_v59 = vsub.f32 %v3581_v57, %v7002_v58 }
 0x6a5   : > { %v2284_v23 = vmul.f32 %v4472_v17, %v2283_v62  ;;  %3605 = vmatmul.f32.vlgmr.msra.gmra.mxu0 %v7813_v53  ;;  %3679 = vmatmul.f32.vlgmr.msra.gmra.mxu3 %v7814_v13  ;;  %v7024_v10 = vsub.f32 %v3582_v39, %v7004_v19 }
 0x6a6   : > { %3652 = vmatpush.msra.mxu2 %v3625_v32  ;;  %v3626_v40 = vand.u32 4294901760, %v3625_v32  ;;  %v3772_v60 = vand.u32 4294901760, %v3771_v11  ;;  %v3918_v21 = vand.u32 4294901760, %v7019_v59 }
 0x6a7   : > { %v2288_v43 = vsel %vm2287_vm11, %v4472_v17, %v2284_v23  ;;  %3655 = vmatmul.f32.vlgmr.msra.gmra.mxu2 %v7815_v51  ;;  %v4064_v18 = vand.u32 4294901760, %v7024_v10  ;;  %vm7827_vm11 = vcmask 1043458  }
 0x6a8   : > { %v2289_v20 = vmul.f32 %v2288_v43, %v2274_v26  ;;  %v2290_v2 = vmul.f32 %v2288_v43, %v2275_v7  ;;  %v2291_v47 = vmul.f32 %v2288_v43, %v2276_v4  ;;  %v2292_v37 = vmul.f32 %v2288_v43, %v2277_v56  ;;  %3745 = vmatpush.msrb.mxu2 %v7000_v1 }
 0x6a9   : > { %3701 = vmatpush.msrb.mxu0 %v3626_v40  ;;  %v3627_v29 = vsub.f32 %v3625_v32, %v3626_v40  ;;  %v3773_v27 = vsub.f32 %v3771_v11, %v3772_v60  ;;  %v3919_v45 = vsub.f32 %v7019_v59, %v3918_v21  ;;  %v4065_v48 = vsub.f32 %v7024_v10, %v4064_v18 }
 0x6aa   : > { %3847 = vmatpush.msra.mxu2 %v3772_v60  ;;  %vm2294_vm13 = vcmp.ge.f32.partialorder %v2290_v2, 0.0  ;;  %vm2295_vm10 = vcmp.ge.f32.partialorder %v2291_v47, 0.0  ;;  %vm2296_vm9 = vcmp.ge.f32.partialorder %v2292_v37, 0.0  ;;  %v2297_v41 = vmul.f32 0.01, %v2289_v20 }
 0x6ab   : > { %3798 = vmatpush.msra.mxu0 %v3771_v11  ;;  %v2298_v61 = vmul.f32 0.01, %v2290_v2  ;;  %v2299_v54 = vmul.f32 0.01, %v2291_v47  ;;  %vm2293_vm7 = vcmp.ge.f32.partialorder %v2289_v20, 0.0  ;;  %v3628_v6 = vand.u32 4294901760, %v3627_v29 }
 0x6ac   : > { %v2300_v36 = vmul.f32 0.01, %v2292_v37  ;;  %v3774_v3 = vand.u32 4294901760, %v3773_v27  ;;  %v2301_v63 = vsel %vm2293_vm7, %v2289_v20, %v2297_v41  ;;  %v3920_v24 = vand.u32 4294901760, %v3919_v45 }
 0x6ad   : > { %v2302_v28 = vsel %vm2294_vm13, %v2290_v2, %v2298_v61  ;;  %v2303_v34 = vsel %vm2295_vm10, %v2291_v47, %v2299_v54  ;;  %3703 = vmatmul.f32.vlgmr.msrb.gmra.mxu0 %v7816_v55  ;;  %3629 = vmatpush.msra.mxu1 %v3628_v6  ;;  %vm7828_vm13 = vcmask 1044483   ;;  %v4066_v57 = vand.u32 4294901760, %v4065_v48 }
 0x6ae   : > { %v2304_v46 = vsel %vm2296_vm9, %v2292_v37, %v2300_v36  ;;  %v2356_v16 = vrot.slane %v2302_v28, 7  ;;  %v2357_v15 = vrot.slane %v2303_v34, 6  ;;  %3775 = vmatpush.msrb.mxu3 %v3774_v3  ;;  %3631 = vmatmul.f32.vlgmr.msra.gmra.mxu1 %v7816_v55 }
 0x6af   : > { %v2358_v44 = vrot.slane %v2304_v46, 5  ;;  %3777 = vmatmul.f32.vlgmr.msrb.gmra.mxu3 %v7816_v55  ;;  %3723 = vmatpush.msrb.mxu1 %v6998_v9 }
 0x6b0   : > { %v2359_v8 = vsel %vm7817_vm15, %v2301_v63, %v2356_v16  ;;  %v2362_v22 = vsel %vm7818_vm4, %v2301_v63, %v2356_v16  ;;  %v2366_v25 = vsel %vm7819_vm5, %v2301_v63, %v2356_v16  ;;  %v2370_v12 = vsel %vm7820_vm12, %v2301_v63, %v2356_v16  ;;  %3869 = vmatpush.msra.mxu3 %v7000_v1 }
 0x6b1   : > { %v2360_v14 = vsel %vm7821_vm0, %v2357_v15, %v2358_v44  ;;  %v2363_v35 = vsel %vm7822_vm2, %v2357_v15, %v2358_v44  ;;  %v2367_v17 = vsel %vm7823_vm8, %v2357_v15, %v2358_v44  ;;  %v2371_v33 = vsel %vm7824_vm3, %v2357_v15, %v2358_v44  ;;  %3891 = vmatpush.msrb.mxu0 %v7002_v58 }
 0x6b2   : > { %v2361_v0 = vsel %vm7825_vm6, %v2359_v8, %v2360_v14  ;;  %v2364_v52 = vsel %vm7826_vm14, %v2362_v22, %v2363_v35  ;;  %v2368_v30 = vsel %vm7827_vm11, %v2366_v25, %v2367_v17  ;;  %v2372_v49 = vsel %vm7828_vm13, %v2370_v12, %v2371_v33  ;;  %3821 = vmatpush.msra.mxu1 %v7000_v1 }
 0x6b3   : > { %v2365_v5 = vrot.slane %v2364_v52, 1  ;;  %v2369_v38 = vrot.slane %v2368_v30, 2  ;;  %v2373_v42 = vrot.slane %v2372_v49, 3  ;;  %4364 = vst.msk [vmem:[%s4625_s26 + $0x1] ss:$2 sm:$0xf] %vm7629_vm1, %v2361_v0  ;;  %3967 = vmatpush.msrb.mxu3 %v7002_v58  ;;  %3751 = vmatmul.f32.vlgmr.msrb.gmra.mxu2 %v7813_v53 }
 0x6b4   : > { %3944 = vmatpush.msrb.mxu2 %v7019_v59  ;;  %vm7830_vm0 = vcmask 1040384   ;;  %vm7831_vm2 = vcmask 1041409   ;;  %vm7832_vm8 = vcmask 1042434   ;;  %vm7833_vm3 = vcmask 1043459  }
 0x6b5   : > { %4365 = vst.msk [vmem:[%s4625_s26 + $0x9] ss:$2 sm:$0xf] %vm7629_vm1, %v2365_v5  ;;  %3801 = vmatmul.f32.vlgmr.msra.gmra.mxu0 %v7815_v51  ;;  %vm7834_vm6 = vmmov %vm7832_vm8  ;;  %vm7836_vm11 = vcmask 1044484   ;;  %vm7837_vm13 = vcmask 1045509  }
 0x6b6   : > { %4366 = vst.msk [vmem:[%s4625_s26 + $0x11] ss:$2 sm:$0xf] %vm7629_vm1, %v2369_v38  ;;  %3993 = vmatpush.msra.mxu0 %v3918_v21  ;;  %3725 = vmatmul.f32.vlgmr.msrb.gmra.mxu1 %v7816_v55  ;;  %vm7835_vm14 = vmmov %vm7833_vm3 }
 0x6b7   : > { %4367 = vst.msk [vmem:[%s4625_s26 + $0x19] ss:$2 sm:$0xf] %vm7629_vm1, %v2373_v42  ;;  %3871 = vmatmul.f32.vlgmr.msra.gmra.mxu3 %v7816_v55  ;;  %3921 = vmatpush.msrb.mxu1 %v3920_v24 }
 0x6b8   : > { %4067 = vmatpush.msra.mxu3 %v4066_v57 }
 0x6bb   : > { %3849 = vmatmul.f32.vlgmr.msra.gmra.mxu2 %v7816_v55 }
 0x6bc   : > { %4037 = vmatpush.msra.mxu2 %v7004_v19 }
 0x6bd   : > { %3897 = vmatmul.f32.vlgmr.msrb.gmra.mxu0 %v7813_v53 }
 0x6be   : > { %4090 = vmatpush.msrb.mxu0 %v7024_v10  ;;  %3825 = vmatmul.f32.vlgmr.msra.gmra.mxu1 %v7814_v13 }
 0x6bf   : > { %3971 = vmatmul.f32.vlgmr.msrb.gmra.mxu3 %v7814_v13  ;;  %4015 = vmatpush.msra.mxu1 %v7002_v58 }
 0x6c0   : > { %4161 = vmatpush.msrb.mxu3 %v7004_v19 }
 0x6c3   : > { %3947 = vmatmul.f32.vlgmr.msrb.gmra.mxu2 %v7815_v51 }
 0x6c4   : > { %4139 = vmatpush.msrb.mxu2 %v4064_v18 }
 0x6c5   : > { %3995 = vmatmul.f32.vlgmr.msra.gmra.mxu0 %v7816_v55 }
 0x6c6   : > { %3923 = vmatmul.f32.vlgmr.msrb.gmra.mxu1 %v7816_v55 }
 0x6c7   : > { %4069 = vmatmul.f32.vlgmr.msra.gmra.mxu3 %v7816_v55  ;;  %4113 = vmatpush.msrb.mxu1 %v7004_v19 }
 0x6cb   : > { %4043 = vmatmul.f32.vlgmr.msra.gmra.mxu2 %v7813_v53 }
 0x6cd   : > { %4093 = vmatmul.f32.vlgmr.msrb.gmra.mxu0 %v7815_v51 }
 0x6ce   : > { %4017 = vmatmul.f32.vlgmr.msra.gmra.mxu1 %v7816_v55 }
 0x6cf   : > { %4163 = vmatmul.f32.vlgmr.msrb.gmra.mxu3 %v7816_v55 }
 0x6d3   : > { %4141 = vmatmul.f32.vlgmr.msrb.gmra.mxu2 %v7816_v55 }
 0x6d6   : > { %4117 = vmatmul.f32.vlgmr.msrb.gmra.mxu1 %v7814_v13 }
 0x722   : > { %v3606_v39 = vpop.f32.mrf.mxu0 }
 0x728   : > { %v3680_v50 = vpop.f32.mrf.mxu3 }
 0x72a   : > { %v3704_v9 = vpop.f32.mrf.mxu0  ;;  %v3656_v58 = vpop.f32.mrf.mxu2 }
 0x72b   : > { %v3632_v1 = vpop.f32.mrf.mxu1 }
 0x72c   : > { %v3633_v59 = vadd.f32 %v3632_v1, %v3606_v39 }
 0x72e   : > { %v3657_v43 = vadd.f32 %v3656_v58, %v3633_v59 }
 0x730   : > { %v3681_v47 = vadd.f32 %v3680_v50, %v3657_v43 }
 0x732   : > { %v3778_v26 = vpop.f32.mrf.mxu3  ;;  %v3802_v62 = vpop.f32.mrf.mxu0  ;;  %v3705_v41 = vadd.f32 %v3704_v9, %v3681_v47 }
 0x733   : > { %v3726_v19 = vpop.f32.mrf.mxu1 }
 0x734   : > { %v3727_v28 = vadd.f32 %v3726_v19, %v3705_v41 }
 0x736   : > { %v3752_v7 = vpop.f32.mrf.mxu2  ;;  %v4172_v44 = vmul.f32 %v3727_v28, %v3727_v28 }
 0x737   : > { %v3779_v56 = vadd.f32 %v3778_v26, %v3752_v7 }
 0x739   : > { %v3803_v51 = vadd.f32 %v3802_v62, %v3779_v56 }
 0x73a   : > { %v3872_v32 = vpop.f32.mrf.mxu3  ;;  %v3898_v4 = vpop.f32.mrf.mxu0 }
 0x73b   : > { %v3826_v11 = vpop.f32.mrf.mxu1 }
 0x73c   : > { %v3827_v2 = vadd.f32 %v3826_v11, %v3803_v51 }
 0x73e   : > { %v3850_v23 = vpop.f32.mrf.mxu2 }
 0x73f   : > { %v3851_v21 = vadd.f32 %v3850_v23, %v3827_v2 }
 0x741   : > { %v3873_v6 = vadd.f32 %v3872_v32, %v3851_v21 }
 0x742   : > { %v3972_v53 = vpop.f32.mrf.mxu3  ;;  %v3996_v10 = vpop.f32.mrf.mxu0 }
 0x743   : > { %v3924_v40 = vpop.f32.mrf.mxu1  ;;  %v4173_v16 = vmul.f32 %v3873_v6, %v3873_v6  ;;  %v4167_v45 = vadd.f32 %v3873_v6, %v3727_v28 }
 0x744   : > { %v3925_v60 = vadd.f32 %v3924_v40, %v3898_v4 }
 0x745   : > { %v4176_v22 = vadd.f32 %v4173_v16, %v4172_v44 }
 0x746   : > { %v3948_v13 = vpop.f32.mrf.mxu2 }
 0x747   : > { %v3949_v20 = vadd.f32 %v3948_v13, %v3925_v60 }
 0x749   : > { %v3973_v37 = vadd.f32 %v3972_v53, %v3949_v20 }
 0x74a   : > { %v4070_v27 = vpop.f32.mrf.mxu3  ;;  %v4094_v36 = vpop.f32.mrf.mxu0 }
 0x74b   : > { %v4018_v29 = vpop.f32.mrf.mxu1  ;;  %v3997_v61 = vadd.f32 %v3996_v10, %v3973_v37 }
 0x74d   : > { %v4019_v34 = vadd.f32 %v4018_v29, %v3997_v61 }
 0x74e   : > { %v4044_v18 = vpop.f32.mrf.mxu2 }
 0x74f   : > { %v4071_v54 = vadd.f32 %v4070_v27, %v4044_v18  ;;  %v4174_v48 = vmul.f32 %v4019_v34, %v4019_v34  ;;  %v4168_v25 = vadd.f32 %v4167_v45, %v4019_v34 }
 0x751   : > { %v4095_v3 = vadd.f32 %v4094_v36, %v4071_v54  ;;  %v4177_v17 = vadd.f32 %v4176_v22, %v4174_v48 }
 0x752   : > { %v4164_v63 = vpop.f32.mrf.mxu3 }
 0x753   : > { %v4118_v55 = vpop.f32.mrf.mxu1 }
 0x754   : > { %v4119_v46 = vadd.f32 %v4118_v55, %v4095_v3 }
 0x756   : > { %v4142_v15 = vpop.f32.mrf.mxu2 }
 0x757   : > { %v4143_v8 = vadd.f32 %v4142_v15, %v4119_v46 }
 0x759   : > { %v4165_v12 = vadd.f32 %v4164_v63, %v4143_v8 }
 0x75b   : > { %v4175_v14 = vmul.f32 %v4165_v12, %v4165_v12  ;;  %v4169_v35 = vadd.f32 %v4168_v25, %v4165_v12 }
 0x75d   : > { %4170 = vadd.xlane.f32.xlu0 %v4169_v35  ;;  %v4178_v33 = vadd.f32 %v4177_v17, %v4175_v14 }
 0x75f   : > { %4179 = vadd.xlane.f32.xlu2 %v4178_v33 }
 0x7d0   : > { %v4171_v0 = vpop.xlane.xlu0 %4170 }
 0x7d1   : > { %v4181_v52 = vmul.f32 0.001953125, %v4171_v0 }
 0x7d2   : > { %v4180_v30 = vpop.xlane.xlu2 %4179 }
 0x7d3   : > { %v4183_v49 = vmul.f32 %v4181_v52, %v4181_v52  ;;  %v4182_v5 = vmul.f32 0.001953125, %v4180_v30  ;;  %v4186_v26 = vsub.f32 %v3727_v28, %v4181_v52  ;;  %v4187_v62 = vsub.f32 %v3873_v6, %v4181_v52 }
 0x7d4   : > { %v4188_v19 = vsub.f32 %v4019_v34, %v4181_v52  ;;  %v4189_v7 = vsub.f32 %v4165_v12, %v4181_v52 }
 0x7d5   : > { %v4184_v38 = vsub.f32 %v4182_v5, %v4183_v49 }
 0x7d7   : > { %v4185_v42 = vmax.f32 %v4184_v38, 0.0 }
 0x7d9   : > { %v4190_v24 = vadd.f32 1e-05, %v4185_v42 }
 0x7db   : > { %4473 = vrsqrt.f32 %v4190_v24  ;;  %vm4197_vm9 = vweird.f32 %v4190_v24 }
 0x7e1   : > { %v4474_v57 = vpop.eup %4473 }
 0x7e2   : > { %v4192_v39 = vmul.f32 %v4474_v57, %v4190_v24  ;;  %vm4198_vm10 = vweird.f32 %v4474_v57 }
 0x7e3   : > { %vm4199_vm7 = vmor %vm4197_vm9, %vm4198_vm10  ;;  %vm7838_vm10 = vcmask 1041408   ;;  %vm7839_vm9 = vcmask 1042433  }
 0x7e4   : > { %v4193_v50 = vmul.f32 %v4474_v57, %v4192_v39 }
 0x7e6   : > { %v4194_v9 = vmul.f32 0.5, %v4193_v50 }
 0x7e8   : > { %v4195_v1 = vsub.f32 1.5, %v4194_v9 }
 0x7ea   : > { %v4196_v58 = vmul.f32 %v4474_v57, %v4195_v1 }
 0x7ec   : > { %v4200_v32 = vsel %vm4199_vm7, %v4474_v57, %v4196_v58  ;;  %vm7840_vm7 = vcmask 1043458  }
 0x7ed   : > { %v4201_v11 = vmul.f32 %v4200_v32, %v4186_v26  ;;  %v4202_v4 = vmul.f32 %v4200_v32, %v4187_v62  ;;  %v4203_v23 = vmul.f32 %v4200_v32, %v4188_v19  ;;  %v4204_v53 = vmul.f32 %v4200_v32, %v4189_v7 }
 0x7ef   : > { %vm4206_vm15 = vcmp.ge.f32.partialorder %v4202_v4, 0.0  ;;  %vm4207_vm4 = vcmp.ge.f32.partialorder %v4203_v23, 0.0  ;;  %vm4208_vm5 = vcmp.ge.f32.partialorder %v4204_v53, 0.0  ;;  %v4209_v59 = vmul.f32 0.01, %v4201_v11 }
 0x7f0   : > { %v4210_v56 = vmul.f32 0.01, %v4202_v4  ;;  %v4211_v40 = vmul.f32 0.01, %v4203_v23  ;;  %vm4205_vm12 = vcmp.ge.f32.partialorder %v4201_v11, 0.0 }
 0x7f1   : > { %v4212_v60 = vmul.f32 0.01, %v4204_v53  ;;  %v4213_v2 = vsel %vm4205_vm12, %v4201_v11, %v4209_v59 }
 0x7f2   : > { %v4214_v10 = vsel %vm4206_vm15, %v4202_v4, %v4210_v56  ;;  %v4215_v13 = vsel %vm4207_vm4, %v4203_v23, %v4211_v40  ;;  %vm7841_vm15 = vcmask 1044483  }
 0x7f3   : > { %v4216_v43 = vsel %vm4208_vm5, %v4204_v53, %v4212_v60  ;;  %v4255_v51 = vrot.slane %v4214_v10, 7  ;;  %v4256_v20 = vrot.slane %v4215_v13, 6 }
 0x7f4   : > { %v4257_v47 = vrot.slane %v4216_v43, 5 }
 0x7f5   : > { %v4258_v37 = vsel %vm7830_vm0, %v4213_v2, %v4255_v51  ;;  %v4261_v29 = vsel %vm7831_vm2, %v4213_v2, %v4255_v51  ;;  %v4265_v27 = vsel %vm7832_vm8, %v4213_v2, %v4255_v51  ;;  %v4269_v21 = vsel %vm7833_vm3, %v4213_v2, %v4255_v51 }
 0x7f6   : > { %v4259_v18 = vsel %vm7834_vm6, %v4256_v20, %v4257_v47  ;;  %v4262_v41 = vsel %vm7835_vm14, %v4256_v20, %v4257_v47  ;;  %v4266_v61 = vsel %vm7836_vm11, %v4256_v20, %v4257_v47  ;;  %v4270_v54 = vsel %vm7837_vm13, %v4256_v20, %v4257_v47 }
 0x7f7   : > { %v4260_v36 = vsel %vm7838_vm10, %v4258_v37, %v4259_v18  ;;  %v4263_v6 = vsel %vm7839_vm9, %v4261_v29, %v4262_v41  ;;  %v4267_v3 = vsel %vm7840_vm7, %v4265_v27, %v4266_v61  ;;  %v4271_v28 = vsel %vm7841_vm15, %v4269_v21, %v4270_v54 }
 0x7f8   : > { %v4264_v34 = vrot.slane %v4263_v6, 1  ;;  %v4268_v55 = vrot.slane %v4267_v3, 2  ;;  %v4272_v46 = vrot.slane %v4271_v28, 3  ;;  %4376 = vst.msk [vmem:[%s4625_s26 + $0x21] ss:$2 sm:$0xf] %vm7629_vm1, %v4260_v36 }
 0x7fa   : > { %4377 = vst.msk [vmem:[%s4625_s26 + $0x29] ss:$2 sm:$0xf] %vm7629_vm1, %v4264_v34 }
 0x7fb   : > { %4378 = vst.msk [vmem:[%s4625_s26 + $0x31] ss:$2 sm:$0xf] %vm7629_vm1, %v4268_v55 }
 0x7fc   : > { %4379 = vst.msk [vmem:[%s4625_s26 + $0x39] ss:$2 sm:$0xf] %vm7629_vm1, %v4272_v46 }
 0x7fd PF: > { %s14_s15 = sadd.s32 1, %s4481_s15  }
 0x7fe   : > { %p11_p4 = scmp.ge.s32.totalorder %s14_s15, 4  }
 0x800   :  { %13 = sbr.rel (!%p11_p4) target bundleno = 1 (0x1), region = 82 }

</bundles_post_ra>
